<compile_context>
chip_gen: v7x
topology: tpu7x:2x2x1
jax: 0.10.0
libtpu: 0.0.40
codegen_flags: <defaults>
</compile_context>

<pallas_src>
import jax
import jax.numpy as jnp
from jax.experimental import pallas as pl
from jax.experimental.pallas import tpu as pltpu


def _fold_bn(params):
    """Fold eval-mode BN scale into conv weights (f32); keep shift as bias.

    Also repacks the 3x3x3 conv weight kw-major along Cin:
    (3, 3, 3, P, P) -> (3, 3, 3P, P), matching the kw-packed activation slab.
    """
    w1, s1, b1, w2, s2, b2, w3, s3, b3 = params
    P = w1.shape[1]
    w1f = w1 * s1                                            # (Cin, P)
    w2f = (w2 * s2.reshape(1, 1, 1, 1, P)).reshape(3, 3, 3 * P, P)
    w3f = w3 * s3                                            # (P, 4P)
    return w1f, b1, w2f, b2, w3f, b3


def _bottleneck_kernel(x_ref, w1_ref, b1_ref, w2_ref, b2_ref, w3_ref, b3_ref,
                       o_ref, pad_ref):
    _, D, H, W, Cin = x_ref.shape
    P = w1_ref.shape[1]
    HW = H * W
    K2 = 3 * P
    bf16 = jnp.bfloat16

    # ---- constant zero fills: D halo planes, H halo rows, W edge columns.
    # Batched whole-tile stores; rewritten every grid step so iterations stay
    # independent (batch axis may be "parallel").
    pad_ref[0, :, :, :] = jnp.zeros((H + 2, W, K2), bf16)
    pad_ref[D + 1, :, :, :] = jnp.zeros((H + 2, W, K2), bf16)
    zrow = jnp.zeros((D, 1, W, K2), bf16)
    pad_ref[1:D + 1, 0:1, :, :] = zrow
    pad_ref[1:D + 1, H + 1:H + 2, :, :] = zrow
    zcol = jnp.zeros((D, H, 1, P), bf16)
    pad_ref[1:D + 1, 1:H + 1, 0:1, 0:P] = zcol                 # kw=0 tap, w == 0
    pad_ref[1:D + 1, 1:H + 1, W - 1:W, 2 * P:K2] = zcol        # kw=2 tap, w == W-1

    # ---- phase A: conv1 (1x1x1, BN scale folded) + bias + ReLU, per D-plane.
    # fori_loop bounds vreg live ranges; the three W-shifted copies go into
    # channel groups [kw*P : (kw+1)*P] of the packed bf16 slab.
    def conv1_plane(d, carry):
        xd = x_ref[0, d, :, :, :].reshape(HW, Cin).astype(bf16)
        h1 = jnp.dot(xd, w1_ref[...], preferred_element_type=jnp.float32)
        h1b = jnp.maximum(h1 + b1_ref[...], 0.0).astype(bf16).reshape(H, W, P)
        pad_ref[d + 1, 1:H + 1, :, P:2 * P] = h1b                     # kw = 1
        pad_ref[d + 1, 1:H + 1, 1:W, 0:P] = h1b[:, :W - 1, :]         # kw = 0
        pad_ref[d + 1, 1:H + 1, 0:W - 1, 2 * P:K2] = h1b[:, 1:, :]    # kw = 2
        return carry

    jax.lax.fori_loop(0, D, conv1_plane, 0)

    # ---- phase B: conv2 (3x3x3 as 9 K=3P matmuls, register accumulator)
    # + BN2/ReLU + conv3 (1x1x1) + BN3 + residual + ReLU, fused per D-plane.
    def out_plane(d, carry):
        acc = None
        for kd in range(3):
            for kh in range(3):
                patch = pad_ref[d + kd, kh:kh + H, :, :].reshape(HW, K2)
                t = jnp.dot(patch, w2_ref[kd, kh],
                            preferred_element_type=jnp.float32)
                acc = t if acc is None else acc + t     # chained sum -> regs/MRB
        h2 = jnp.maximum(acc + b2_ref[...], 0.0).astype(bf16)
        h3 = jnp.dot(h2, w3_ref[...], preferred_element_type=jnp.float32)
        resid = x_ref[0, d, :, :, :].reshape(HW, Cin)   # f32, short live range
        out = jnp.maximum(h3 + b3_ref[...] + resid, 0.0)
        o_ref[0, d, :, :, :] = out.reshape(H, W, Cin).astype(o_ref.dtype)
        return carry

    jax.lax.fori_loop(0, D, out_plane, 0)


def bottleneck_forward(x, params):
    """x: (N, D, H, W, Cin) channels-last; params: conv weights + BN stats."""
    N, D, H, W, Cin = x.shape
    w1f, b1, w2f, b2, w3f, b3 = _fold_bn(params)
    P = w1f.shape[1]
    if Cin != 4 * P:
        raise ValueError(
            f"Bottleneck with downsample=None requires Cin == 4*planes "
            f"(got Cin={Cin}, planes={P}).")
    if W % 16 != 0:
        # TODO(synk): pad W to a multiple of 16 so the bf16 (H,W,C)->(HW,C)
        # flatten stays copy-free for real widths (28/56).
        raise ValueError(f"W={W} must be a multiple of 16 (bf16 sublane tile).")

    bf16 = jnp.bfloat16
    weights = (w1f.astype(bf16), b1, w2f.astype(bf16), b2, w3f.astype(bf16), b3)

    def full_spec(a):
        zeros = (0,) * a.ndim
        return pl.BlockSpec(a.shape, lambda n, _z=zeros: _z)

    return pl.pallas_call(
        _bottleneck_kernel,
        out_shape=jax.ShapeDtypeStruct(x.shape, x.dtype),
        grid=(N,),
        in_specs=[pl.BlockSpec((1, D, H, W, Cin), lambda n: (n, 0, 0, 0, 0))]
                 + [full_spec(a) for a in weights],
        out_specs=pl.BlockSpec((1, D, H, W, Cin), lambda n: (n, 0, 0, 0, 0)),
        scratch_shapes=[
            pltpu.VMEM((D + 2, H + 2, W, 3 * P), bf16),  # kw-packed padded slab
        ],
        compiler_params=pltpu.CompilerParams(
            dimension_semantics=("parallel",),
            vmem_limit_bytes=48 * 1024 * 1024),
    )(x, *weights)


def make_params(key, in_planes, planes, eps=1e-5):
    """Deterministic synthetic parameters: conv weights + eval-mode BN stats.

    Weights are fan-in scaled so activations stay O(1) through the block."""
    exp = 4
    ks = jax.random.split(key, 15)

    def bn(kg, kb, km, kv, c):
        gamma = 1.0 + 0.1 * jax.random.normal(kg, (c,), jnp.float32)
        beta = 0.1 * jax.random.normal(kb, (c,), jnp.float32)
        mean = 0.1 * jax.random.normal(km, (c,), jnp.float32)
        var = 1.0 + 0.1 * jax.random.uniform(kv, (c,), jnp.float32)
        scale = gamma / jnp.sqrt(var + eps)
        shift = beta - mean * scale
        return scale.reshape(1, c), shift.reshape(1, c)

    w1 = jax.random.normal(ks[0], (in_planes, planes),
                           jnp.float32) * (in_planes ** -0.5)
    s1, b1 = bn(ks[1], ks[2], ks[3], ks[4], planes)
    w2 = jax.random.normal(ks[5], (3, 3, 3, planes, planes),
                           jnp.float32) * ((27 * planes) ** -0.5)
    s2, b2 = bn(ks[6], ks[7], ks[8], ks[9], planes)
    w3 = jax.random.normal(ks[10], (planes, planes * exp),
                           jnp.float32) * (planes ** -0.5)
    s3, b3 = bn(ks[11], ks[12], ks[13], ks[14], planes * exp)
    return (w1, s1, b1, w2, s2, b2, w3, s3, b3)


def bottleneck_reference(x, params):
    """Pure-JAX reference mirroring the kernel's exact numeric recipe
    (same folded bf16 weights, same kw-packed K=3P contractions, same
    bias/ReLU ordering) so the only divergence is matmul accumulation order."""
    bf16 = jnp.bfloat16
    N, D, H, W, Cin = x.shape
    w1f, b1, w2p, b2, w3f, b3 = _fold_bn(params)
    P = w1f.shape[1]
    w1b, w2b, w3b = w1f.astype(bf16), w2p.astype(bf16), w3f.astype(bf16)

    # conv1 + bias + ReLU, rounded to bf16 like the kernel's slab.
    h1 = jnp.dot(x.reshape(-1, Cin).astype(bf16), w1b,
                 preferred_element_type=jnp.float32)
    h1 = jnp.maximum(h1 + b1, 0.0).astype(bf16).reshape(N, D, H, W, P)

    # kw-packed, (D, H)-zero-padded slab, identical to the kernel's pad_ref.
    h1p = jnp.pad(h1, ((0, 0), (1, 1), (1, 1), (0, 0), (0, 0)))
    zc = jnp.zeros((N, D + 2, H + 2, 1, P), bf16)
    left = jnp.concatenate([zc, h1p[:, :, :, :W - 1, :]], axis=3)   # kw=0 tap
    right = jnp.concatenate([h1p[:, :, :, 1:, :], zc], axis=3)      # kw=2 tap
    slab = jnp.concatenate([left, h1p, right], axis=-1)             # (..., 3P)

    acc = None
    for kd in range(3):
        for kh in range(3):
            patch = slab[:, kd:kd + D, kh:kh + H, :, :].reshape(-1, 3 * P)
            t = jnp.dot(patch, w2b[kd, kh], preferred_element_type=jnp.float32)
            acc = t if acc is None else acc + t
    h2 = jnp.maximum(acc + b2, 0.0).astype(bf16)
    h3 = jnp.dot(h2, w3b, preferred_element_type=jnp.float32)
    out = jnp.maximum(h3 + b3 + x.reshape(-1, Cin), 0.0)
    return out.reshape(x.shape).astype(x.dtype)


if __name__ == "__main__":
    # Channel dims are 128-aligned (planes=128 -> Cin=Cout=512) so matmul K/N
    # fill the MXU/lane width and output stores are lane-dense; spatial dims
    # stay small (W=16 keeps the bf16 flatten copy-free).
    planes = 128
    in_planes = planes * 4      # residual add requires Cin == 4*planes
    N, D, H, W = 2, 4, 8, 16

    key = jax.random.PRNGKey(0)
    kx, kp = jax.random.split(key)
    x = jax.random.normal(kx, (N, D, H, W, in_planes), jnp.float32)
    params = make_params(kp, in_planes, planes)

    out = jax.block_until_ready(bottleneck_forward(x, params))
    ref = jax.block_until_ready(bottleneck_reference(x, params))

    assert out.shape == x.shape
    max_diff = float(jnp.max(jnp.abs(out - ref)))
    # bf16 MXU operands + bf16-rounded intermediates: allow up to ~one bf16 ulp
    # of divergence on an O(1) intermediate propagating to the output.
    assert max_diff < 2e-2, f"max abs diff {max_diff}"

    print("KERNEL_OK")
</pallas_src>

<mosaic_0001>
module attributes {stable_mosaic.version = 11 : i64} {
  func.func @_bottleneck_kernel(%arg0: i32, %arg1: memref<1x4x8x16x512xf32, #tpu.memory_space<vmem>>, %arg2: memref<512x128xbf16, #tpu.memory_space<vmem>>, %arg3: memref<1x128xf32, #tpu.memory_space<vmem>>, %arg4: memref<3x3x384x128xbf16, #tpu.memory_space<vmem>>, %arg5: memref<1x128xf32, #tpu.memory_space<vmem>>, %arg6: memref<128x512xbf16, #tpu.memory_space<vmem>>, %arg7: memref<1x512xf32, #tpu.memory_space<vmem>>, %arg8: memref<1x4x8x16x512xf32, #tpu.memory_space<vmem>>, %arg9: memref<6x10x16x384xbf16, #tpu.memory_space<vmem>>) attributes {dimension_semantics = [#tpu.dimension_semantics<parallel>], iteration_bounds = array<i64: 2>, scalar_prefetch = 0 : i64, scratch_operands = 1 : i64, tpu.core_type = #tpu.core_type<tc>, window_params = [{transform_indices = @transform_0, window_bounds = array<i64: 1, 4, 8, 16, 512>}, {pipeline_mode = #tpu.pipeline_mode<synchronous>, transform_indices = @transform_1, window_bounds = array<i64: 512, 128>}, {pipeline_mode = #tpu.pipeline_mode<synchronous>, transform_indices = @transform_2, window_bounds = array<i64: 1, 128>}, {pipeline_mode = #tpu.pipeline_mode<synchronous>, transform_indices = @transform_3, window_bounds = array<i64: 3, 3, 384, 128>}, {pipeline_mode = #tpu.pipeline_mode<synchronous>, transform_indices = @transform_4, window_bounds = array<i64: 1, 128>}, {pipeline_mode = #tpu.pipeline_mode<synchronous>, transform_indices = @transform_5, window_bounds = array<i64: 128, 512>}, {pipeline_mode = #tpu.pipeline_mode<synchronous>, transform_indices = @transform_6, window_bounds = array<i64: 1, 512>}, {transform_indices = @transform_7, window_bounds = array<i64: 1, 4, 8, 16, 512>}]} {
    %cst = arith.constant 0.000000e+00 : bf16
    %0 = vector.broadcast %cst : bf16 to vector<10x16x384xbf16>
    %c0 = arith.constant 0 : index
    %c0_0 = arith.constant 0 : index
    %c0_1 = arith.constant 0 : index
    %c0_2 = arith.constant 0 : index
    %1 = vector.load %arg9[%c0, %c0_0, %c0_1, %c0_2] : memref<6x10x16x384xbf16, #tpu.memory_space<vmem>>, vector<1x10x16x384xbf16>
    %2 = vector.shape_cast %1 : vector<1x10x16x384xbf16> to vector<10x16x384xbf16>
    %3 = vector.shape_cast %0 : vector<10x16x384xbf16> to vector<1x10x16x384xbf16>
    tpu.vector_store %arg9[%c0, %c0_0, %c0_1, %c0_2], %3 {strides = array<i32>} : memref<6x10x16x384xbf16, #tpu.memory_space<vmem>>, vector<1x10x16x384xbf16>,
    %cst_3 = arith.constant 0.000000e+00 : bf16
    %4 = vector.broadcast %cst_3 : bf16 to vector<10x16x384xbf16>
    %c5 = arith.constant 5 : index
    %c0_4 = arith.constant 0 : index
    %c0_5 = arith.constant 0 : index
    %c0_6 = arith.constant 0 : index
    %5 = vector.load %arg9[%c5, %c0_4, %c0_5, %c0_6] : memref<6x10x16x384xbf16, #tpu.memory_space<vmem>>, vector<1x10x16x384xbf16>
    %6 = vector.shape_cast %5 : vector<1x10x16x384xbf16> to vector<10x16x384xbf16>
    %7 = vector.shape_cast %4 : vector<10x16x384xbf16> to vector<1x10x16x384xbf16>
    tpu.vector_store %arg9[%c5, %c0_4, %c0_5, %c0_6], %7 {strides = array<i32>} : memref<6x10x16x384xbf16, #tpu.memory_space<vmem>>, vector<1x10x16x384xbf16>,
    %cst_7 = arith.constant 0.000000e+00 : bf16
    %8 = vector.broadcast %cst_7 : bf16 to vector<4x1x16x384xbf16>
    %c1 = arith.constant 1 : index
    %c0_8 = arith.constant 0 : index
    %c0_9 = arith.constant 0 : index
    %c0_10 = arith.constant 0 : index
    %9 = vector.load %arg9[%c1, %c0_8, %c0_9, %c0_10] : memref<6x10x16x384xbf16, #tpu.memory_space<vmem>>, vector<4x1x16x384xbf16>
    tpu.vector_store %arg9[%c1, %c0_8, %c0_9, %c0_10], %8 {strides = array<i32>} : memref<6x10x16x384xbf16, #tpu.memory_space<vmem>>, vector<4x1x16x384xbf16>,
    %c1_11 = arith.constant 1 : index
    %c9 = arith.constant 9 : index
    %c0_12 = arith.constant 0 : index
    %c0_13 = arith.constant 0 : index
    %10 = vector.load %arg9[%c1_11, %c9, %c0_12, %c0_13] : memref<6x10x16x384xbf16, #tpu.memory_space<vmem>>, vector<4x1x16x384xbf16>
    tpu.vector_store %arg9[%c1_11, %c9, %c0_12, %c0_13], %8 {strides = array<i32>} : memref<6x10x16x384xbf16, #tpu.memory_space<vmem>>, vector<4x1x16x384xbf16>,
    %cst_14 = arith.constant 0.000000e+00 : bf16
    %11 = vector.broadcast %cst_14 : bf16 to vector<4x8x1x128xbf16>
    %c1_15 = arith.constant 1 : index
    %c1_16 = arith.constant 1 : index
    %c0_17 = arith.constant 0 : index
    %c0_18 = arith.constant 0 : index
    %12 = vector.load %arg9[%c1_15, %c1_16, %c0_17, %c0_18] : memref<6x10x16x384xbf16, #tpu.memory_space<vmem>>, vector<4x8x1x128xbf16>
    tpu.vector_store %arg9[%c1_15, %c1_16, %c0_17, %c0_18], %11 {strides = array<i32>} : memref<6x10x16x384xbf16, #tpu.memory_space<vmem>>, vector<4x8x1x128xbf16>,
    %c1_19 = arith.constant 1 : index
    %c1_20 = arith.constant 1 : index
    %c15 = arith.constant 15 : index
    %c256 = arith.constant 256 : index
    %13 = vector.load %arg9[%c1_19, %c1_20, %c15, %c256] : memref<6x10x16x384xbf16, #tpu.memory_space<vmem>>, vector<4x8x1x128xbf16>
    tpu.vector_store %arg9[%c1_19, %c1_20, %c15, %c256], %11 {strides = array<i32>} : memref<6x10x16x384xbf16, #tpu.memory_space<vmem>>, vector<4x8x1x128xbf16>,
    %c0_i32 = arith.constant 0 : i32
    %c4_i32 = arith.constant 4 : i32
    %14 = arith.addi %c0_i32, %c4_i32 : i32
    %c1_i32 = arith.constant 1 : i32
    scf.for %arg10 = %c0_i32 to %14 step %c1_i32  : i32 {
      %c0_26 = arith.constant 0 : index
      %16 = arith.index_cast %arg10 : i32 to index
      %c0_27 = arith.constant 0 : index
      %c0_28 = arith.constant 0 : index
      %c0_29 = arith.constant 0 : index
      %17 = vector.load %arg1[%c0_26, %16, %c0_27, %c0_28, %c0_29] : memref<1x4x8x16x512xf32, #tpu.memory_space<vmem>>, vector<1x1x8x16x512xf32>
      %18 = vector.shape_cast %17 : vector<1x1x8x16x512xf32> to vector<8x16x512xf32>
      %19 = vector.shape_cast %18 : vector<8x16x512xf32> to vector<128x512xf32>
      %20 = arith.truncf %19 : vector<128x512xf32> to vector<128x512xbf16>
      %c0_30 = arith.constant 0 : index
      %c0_31 = arith.constant 0 : index
      %21 = vector.load %arg2[%c0_30, %c0_31] : memref<512x128xbf16, #tpu.memory_space<vmem>>, vector<512x128xbf16>
      %cst_32 = arith.constant dense<0.000000e+00> : vector<128x128xf32>
      %22 = tpu.matmul %20, %21, %cst_32 {dimension_numbers = #tpu.dot_dimension_numbers<[1], [0], [0], [1], [0, 0, 1, 1], [], []>} : vector<128x512xbf16>, vector<512x128xbf16>, vector<128x128xf32> -> vector<128x128xf32>
      %c0_33 = arith.constant 0 : index
      %c0_34 = arith.constant 0 : index
      %23 = vector.load %arg3[%c0_33, %c0_34] : memref<1x128xf32, #tpu.memory_space<vmem>>, vector<1x128xf32>
      %24 = vector.broadcast %23 : vector<1x128xf32> to vector<128x128xf32>
      %25 = arith.addf %22, %24 : vector<128x128xf32>
      %cst_35 = arith.constant 0.000000e+00 : f32
      %26 = vector.broadcast %cst_35 : f32 to vector<128x128xf32>
      %27 = arith.maximumf %25, %26 : vector<128x128xf32>
      %28 = arith.truncf %27 : vector<128x128xf32> to vector<128x128xbf16>
      %29 = vector.shape_cast %28 : vector<128x128xbf16> to vector<8x16x128xbf16>
      %c1_i32_36 = arith.constant 1 : i32
      %30 = arith.addi %arg10, %c1_i32_36 : i32
      %31 = arith.index_cast %30 : i32 to index
      %c1_37 = arith.constant 1 : index
      %c0_38 = arith.constant 0 : index
      %c128 = arith.constant 128 : index
      %32 = vector.load %arg9[%31, %c1_37, %c0_38, %c128] : memref<6x10x16x384xbf16, #tpu.memory_space<vmem>>, vector<1x8x16x128xbf16>
      %33 = vector.shape_cast %32 : vector<1x8x16x128xbf16> to vector<8x16x128xbf16>
      %34 = vector.shape_cast %29 : vector<8x16x128xbf16> to vector<1x8x16x128xbf16>
      tpu.vector_store %arg9[%31, %c1_37, %c0_38, %c128], %34 {strides = array<i32>} : memref<6x10x16x384xbf16, #tpu.memory_space<vmem>>, vector<1x8x16x128xbf16>,
      %35 = vector.extract_strided_slice %29 {offsets = [0, 0, 0], sizes = [8, 15, 128], strides = [1, 1, 1]} : vector<8x16x128xbf16> to vector<8x15x128xbf16>
      %c1_i32_39 = arith.constant 1 : i32
      %36 = arith.addi %arg10, %c1_i32_39 : i32
      %37 = arith.index_cast %36 : i32 to index
      %c1_40 = arith.constant 1 : index
      %c1_41 = arith.constant 1 : index
      %c0_42 = arith.constant 0 : index
      %38 = vector.load %arg9[%37, %c1_40, %c1_41, %c0_42] : memref<6x10x16x384xbf16, #tpu.memory_space<vmem>>, vector<1x8x15x128xbf16>
      %39 = vector.shape_cast %38 : vector<1x8x15x128xbf16> to vector<8x15x128xbf16>
      %40 = vector.shape_cast %35 : vector<8x15x128xbf16> to vector<1x8x15x128xbf16>
      tpu.vector_store %arg9[%37, %c1_40, %c1_41, %c0_42], %40 {strides = array<i32>} : memref<6x10x16x384xbf16, #tpu.memory_space<vmem>>, vector<1x8x15x128xbf16>,
      %41 = vector.extract_strided_slice %29 {offsets = [0, 1, 0], sizes = [8, 15, 128], strides = [1, 1, 1]} : vector<8x16x128xbf16> to vector<8x15x128xbf16>
      %c1_i32_43 = arith.constant 1 : i32
      %42 = arith.addi %arg10, %c1_i32_43 : i32
      %43 = arith.index_cast %42 : i32 to index
      %c1_44 = arith.constant 1 : index
      %c0_45 = arith.constant 0 : index
      %c256_46 = arith.constant 256 : index
      %44 = vector.load %arg9[%43, %c1_44, %c0_45, %c256_46] : memref<6x10x16x384xbf16, #tpu.memory_space<vmem>>, vector<1x8x15x128xbf16>
      %45 = vector.shape_cast %44 : vector<1x8x15x128xbf16> to vector<8x15x128xbf16>
      %46 = vector.shape_cast %41 : vector<8x15x128xbf16> to vector<1x8x15x128xbf16>
      tpu.vector_store %arg9[%43, %c1_44, %c0_45, %c256_46], %46 {strides = array<i32>} : memref<6x10x16x384xbf16, #tpu.memory_space<vmem>>, vector<1x8x15x128xbf16>,
    }
    %c4_i32_21 = arith.constant 4 : i32
    %c0_i32_22 = arith.constant 0 : i32
    %c4_i32_23 = arith.constant 4 : i32
    %15 = arith.addi %c0_i32_22, %c4_i32_23 : i32
    %c1_i32_24 = arith.constant 1 : i32
    scf.for %arg10 = %c0_i32_22 to %15 step %c1_i32_24  : i32 {
      %c0_i32_26 = arith.constant 0 : i32
      %16 = arith.addi %arg10, %c0_i32_26 : i32
      %17 = arith.index_cast %16 : i32 to index
      %c0_27 = arith.constant 0 : index
      %c0_28 = arith.constant 0 : index
      %c0_29 = arith.constant 0 : index
      %18 = vector.load %arg9[%17, %c0_27, %c0_28, %c0_29] : memref<6x10x16x384xbf16, #tpu.memory_space<vmem>>, vector<1x8x16x384xbf16>
      %19 = vector.shape_cast %18 : vector<1x8x16x384xbf16> to vector<8x16x384xbf16>
      %20 = vector.shape_cast %19 : vector<8x16x384xbf16> to vector<128x384xbf16>
      %c0_30 = arith.constant 0 : index
      %c0_31 = arith.constant 0 : index
      %c0_32 = arith.constant 0 : index
      %c0_33 = arith.constant 0 : index
      %21 = vector.load %arg4[%c0_30, %c0_31, %c0_32, %c0_33] : memref<3x3x384x128xbf16, #tpu.memory_space<vmem>>, vector<1x1x384x128xbf16>
      %22 = vector.shape_cast %21 : vector<1x1x384x128xbf16> to vector<384x128xbf16>
      %cst_34 = arith.constant dense<0.000000e+00> : vector<128x128xf32>
      %23 = tpu.matmul %20, %22, %cst_34 {dimension_numbers = #tpu.dot_dimension_numbers<[1], [0], [0], [1], [0, 0, 1, 1], [], []>} : vector<128x384xbf16>, vector<384x128xbf16>, vector<128x128xf32> -> vector<128x128xf32>
      %c0_i32_35 = arith.constant 0 : i32
      %24 = arith.addi %arg10, %c0_i32_35 : i32
      %25 = arith.index_cast %24 : i32 to index
      %c1_36 = arith.constant 1 : index
      %c0_37 = arith.constant 0 : index
      %c0_38 = arith.constant 0 : index
      %26 = vector.load %arg9[%25, %c1_36, %c0_37, %c0_38] : memref<6x10x16x384xbf16, #tpu.memory_space<vmem>>, vector<1x8x16x384xbf16>
      %27 = vector.shape_cast %26 : vector<1x8x16x384xbf16> to vector<8x16x384xbf16>
      %28 = vector.shape_cast %27 : vector<8x16x384xbf16> to vector<128x384xbf16>
      %c0_39 = arith.constant 0 : index
      %c1_40 = arith.constant 1 : index
      %c0_41 = arith.constant 0 : index
      %c0_42 = arith.constant 0 : index
      %29 = vector.load %arg4[%c0_39, %c1_40, %c0_41, %c0_42] : memref<3x3x384x128xbf16, #tpu.memory_space<vmem>>, vector<1x1x384x128xbf16>
      %30 = vector.shape_cast %29 : vector<1x1x384x128xbf16> to vector<384x128xbf16>
      %cst_43 = arith.constant dense<0.000000e+00> : vector<128x128xf32>
      %31 = tpu.matmul %28, %30, %cst_43 {dimension_numbers = #tpu.dot_dimension_numbers<[1], [0], [0], [1], [0, 0, 1, 1], [], []>} : vector<128x384xbf16>, vector<384x128xbf16>, vector<128x128xf32> -> vector<128x128xf32>
      %32 = arith.addf %23, %31 : vector<128x128xf32>
      %c0_i32_44 = arith.constant 0 : i32
      %33 = arith.addi %arg10, %c0_i32_44 : i32
      %34 = arith.index_cast %33 : i32 to index
      %c2 = arith.constant 2 : index
      %c0_45 = arith.constant 0 : index
      %c0_46 = arith.constant 0 : index
      %35 = vector.load %arg9[%34, %c2, %c0_45, %c0_46] : memref<6x10x16x384xbf16, #tpu.memory_space<vmem>>, vector<1x8x16x384xbf16>
      %36 = vector.shape_cast %35 : vector<1x8x16x384xbf16> to vector<8x16x384xbf16>
      %37 = vector.shape_cast %36 : vector<8x16x384xbf16> to vector<128x384xbf16>
      %c0_47 = arith.constant 0 : index
      %c2_48 = arith.constant 2 : index
      %c0_49 = arith.constant 0 : index
      %c0_50 = arith.constant 0 : index
      %38 = vector.load %arg4[%c0_47, %c2_48, %c0_49, %c0_50] : memref<3x3x384x128xbf16, #tpu.memory_space<vmem>>, vector<1x1x384x128xbf16>
      %39 = vector.shape_cast %38 : vector<1x1x384x128xbf16> to vector<384x128xbf16>
      %cst_51 = arith.constant dense<0.000000e+00> : vector<128x128xf32>
      %40 = tpu.matmul %37, %39, %cst_51 {dimension_numbers = #tpu.dot_dimension_numbers<[1], [0], [0], [1], [0, 0, 1, 1], [], []>} : vector<128x384xbf16>, vector<384x128xbf16>, vector<128x128xf32> -> vector<128x128xf32>
      %41 = arith.addf %32, %40 : vector<128x128xf32>
      %c1_i32_52 = arith.constant 1 : i32
      %42 = arith.addi %arg10, %c1_i32_52 : i32
      %43 = arith.index_cast %42 : i32 to index
      %c0_53 = arith.constant 0 : index
      %c0_54 = arith.constant 0 : index
      %c0_55 = arith.constant 0 : index
      %44 = vector.load %arg9[%43, %c0_53, %c0_54, %c0_55] : memref<6x10x16x384xbf16, #tpu.memory_space<vmem>>, vector<1x8x16x384xbf16>
      %45 = vector.shape_cast %44 : vector<1x8x16x384xbf16> to vector<8x16x384xbf16>
      %46 = vector.shape_cast %45 : vector<8x16x384xbf16> to vector<128x384xbf16>
      %c1_56 = arith.constant 1 : index
      %c0_57 = arith.constant 0 : index
      %c0_58 = arith.constant 0 : index
      %c0_59 = arith.constant 0 : index
      %47 = vector.load %arg4[%c1_56, %c0_57, %c0_58, %c0_59] : memref<3x3x384x128xbf16, #tpu.memory_space<vmem>>, vector<1x1x384x128xbf16>
      %48 = vector.shape_cast %47 : vector<1x1x384x128xbf16> to vector<384x128xbf16>
      %cst_60 = arith.constant dense<0.000000e+00> : vector<128x128xf32>
      %49 = tpu.matmul %46, %48, %cst_60 {dimension_numbers = #tpu.dot_dimension_numbers<[1], [0], [0], [1], [0, 0, 1, 1], [], []>} : vector<128x384xbf16>, vector<384x128xbf16>, vector<128x128xf32> -> vector<128x128xf32>
      %50 = arith.addf %41, %49 : vector<128x128xf32>
      %c1_i32_61 = arith.constant 1 : i32
      %51 = arith.addi %arg10, %c1_i32_61 : i32
      %52 = arith.index_cast %51 : i32 to index
      %c1_62 = arith.constant 1 : index
      %c0_63 = arith.constant 0 : index
      %c0_64 = arith.constant 0 : index
      %53 = vector.load %arg9[%52, %c1_62, %c0_63, %c0_64] : memref<6x10x16x384xbf16, #tpu.memory_space<vmem>>, vector<1x8x16x384xbf16>
      %54 = vector.shape_cast %53 : vector<1x8x16x384xbf16> to vector<8x16x384xbf16>
      %55 = vector.shape_cast %54 : vector<8x16x384xbf16> to vector<128x384xbf16>
      %c1_65 = arith.constant 1 : index
      %c1_66 = arith.constant 1 : index
      %c0_67 = arith.constant 0 : index
      %c0_68 = arith.constant 0 : index
      %56 = vector.load %arg4[%c1_65, %c1_66, %c0_67, %c0_68] : memref<3x3x384x128xbf16, #tpu.memory_space<vmem>>, vector<1x1x384x128xbf16>
      %57 = vector.shape_cast %56 : vector<1x1x384x128xbf16> to vector<384x128xbf16>
      %cst_69 = arith.constant dense<0.000000e+00> : vector<128x128xf32>
      %58 = tpu.matmul %55, %57, %cst_69 {dimension_numbers = #tpu.dot_dimension_numbers<[1], [0], [0], [1], [0, 0, 1, 1], [], []>} : vector<128x384xbf16>, vector<384x128xbf16>, vector<128x128xf32> -> vector<128x128xf32>
      %59 = arith.addf %50, %58 : vector<128x128xf32>
      %c1_i32_70 = arith.constant 1 : i32
      %60 = arith.addi %arg10, %c1_i32_70 : i32
      %61 = arith.index_cast %60 : i32 to index
      %c2_71 = arith.constant 2 : index
      %c0_72 = arith.constant 0 : index
      %c0_73 = arith.constant 0 : index
      %62 = vector.load %arg9[%61, %c2_71, %c0_72, %c0_73] : memref<6x10x16x384xbf16, #tpu.memory_space<vmem>>, vector<1x8x16x384xbf16>
      %63 = vector.shape_cast %62 : vector<1x8x16x384xbf16> to vector<8x16x384xbf16>
      %64 = vector.shape_cast %63 : vector<8x16x384xbf16> to vector<128x384xbf16>
      %c1_74 = arith.constant 1 : index
      %c2_75 = arith.constant 2 : index
      %c0_76 = arith.constant 0 : index
      %c0_77 = arith.constant 0 : index
      %65 = vector.load %arg4[%c1_74, %c2_75, %c0_76, %c0_77] : memref<3x3x384x128xbf16, #tpu.memory_space<vmem>>, vector<1x1x384x128xbf16>
      %66 = vector.shape_cast %65 : vector<1x1x384x128xbf16> to vector<384x128xbf16>
      %cst_78 = arith.constant dense<0.000000e+00> : vector<128x128xf32>
      %67 = tpu.matmul %64, %66, %cst_78 {dimension_numbers = #tpu.dot_dimension_numbers<[1], [0], [0], [1], [0, 0, 1, 1], [], []>} : vector<128x384xbf16>, vector<384x128xbf16>, vector<128x128xf32> -> vector<128x128xf32>
      %68 = arith.addf %59, %67 : vector<128x128xf32>
      %c2_i32 = arith.constant 2 : i32
      %69 = arith.addi %arg10, %c2_i32 : i32
      %70 = arith.index_cast %69 : i32 to index
      %c0_79 = arith.constant 0 : index
      %c0_80 = arith.constant 0 : index
      %c0_81 = arith.constant 0 : index
      %71 = vector.load %arg9[%70, %c0_79, %c0_80, %c0_81] : memref<6x10x16x384xbf16, #tpu.memory_space<vmem>>, vector<1x8x16x384xbf16>
      %72 = vector.shape_cast %71 : vector<1x8x16x384xbf16> to vector<8x16x384xbf16>
      %73 = vector.shape_cast %72 : vector<8x16x384xbf16> to vector<128x384xbf16>
      %c2_82 = arith.constant 2 : index
      %c0_83 = arith.constant 0 : index
      %c0_84 = arith.constant 0 : index
      %c0_85 = arith.constant 0 : index
      %74 = vector.load %arg4[%c2_82, %c0_83, %c0_84, %c0_85] : memref<3x3x384x128xbf16, #tpu.memory_space<vmem>>, vector<1x1x384x128xbf16>
      %75 = vector.shape_cast %74 : vector<1x1x384x128xbf16> to vector<384x128xbf16>
      %cst_86 = arith.constant dense<0.000000e+00> : vector<128x128xf32>
      %76 = tpu.matmul %73, %75, %cst_86 {dimension_numbers = #tpu.dot_dimension_numbers<[1], [0], [0], [1], [0, 0, 1, 1], [], []>} : vector<128x384xbf16>, vector<384x128xbf16>, vector<128x128xf32> -> vector<128x128xf32>
      %77 = arith.addf %68, %76 : vector<128x128xf32>
      %c2_i32_87 = arith.constant 2 : i32
      %78 = arith.addi %arg10, %c2_i32_87 : i32
      %79 = arith.index_cast %78 : i32 to index
      %c1_88 = arith.constant 1 : index
      %c0_89 = arith.constant 0 : index
      %c0_90 = arith.constant 0 : index
      %80 = vector.load %arg9[%79, %c1_88, %c0_89, %c0_90] : memref<6x10x16x384xbf16, #tpu.memory_space<vmem>>, vector<1x8x16x384xbf16>
      %81 = vector.shape_cast %80 : vector<1x8x16x384xbf16> to vector<8x16x384xbf16>
      %82 = vector.shape_cast %81 : vector<8x16x384xbf16> to vector<128x384xbf16>
      %c2_91 = arith.constant 2 : index
      %c1_92 = arith.constant 1 : index
      %c0_93 = arith.constant 0 : index
      %c0_94 = arith.constant 0 : index
      %83 = vector.load %arg4[%c2_91, %c1_92, %c0_93, %c0_94] : memref<3x3x384x128xbf16, #tpu.memory_space<vmem>>, vector<1x1x384x128xbf16>
      %84 = vector.shape_cast %83 : vector<1x1x384x128xbf16> to vector<384x128xbf16>
      %cst_95 = arith.constant dense<0.000000e+00> : vector<128x128xf32>
      %85 = tpu.matmul %82, %84, %cst_95 {dimension_numbers = #tpu.dot_dimension_numbers<[1], [0], [0], [1], [0, 0, 1, 1], [], []>} : vector<128x384xbf16>, vector<384x128xbf16>, vector<128x128xf32> -> vector<128x128xf32>
      %86 = arith.addf %77, %85 : vector<128x128xf32>
      %c2_i32_96 = arith.constant 2 : i32
      %87 = arith.addi %arg10, %c2_i32_96 : i32
      %88 = arith.index_cast %87 : i32 to index
      %c2_97 = arith.constant 2 : index
      %c0_98 = arith.constant 0 : index
      %c0_99 = arith.constant 0 : index
      %89 = vector.load %arg9[%88, %c2_97, %c0_98, %c0_99] : memref<6x10x16x384xbf16, #tpu.memory_space<vmem>>, vector<1x8x16x384xbf16>
      %90 = vector.shape_cast %89 : vector<1x8x16x384xbf16> to vector<8x16x384xbf16>
      %91 = vector.shape_cast %90 : vector<8x16x384xbf16> to vector<128x384xbf16>
      %c2_100 = arith.constant 2 : index
      %c2_101 = arith.constant 2 : index
      %c0_102 = arith.constant 0 : index
      %c0_103 = arith.constant 0 : index
      %92 = vector.load %arg4[%c2_100, %c2_101, %c0_102, %c0_103] : memref<3x3x384x128xbf16, #tpu.memory_space<vmem>>, vector<1x1x384x128xbf16>
      %93 = vector.shape_cast %92 : vector<1x1x384x128xbf16> to vector<384x128xbf16>
      %cst_104 = arith.constant dense<0.000000e+00> : vector<128x128xf32>
      %94 = tpu.matmul %91, %93, %cst_104 {dimension_numbers = #tpu.dot_dimension_numbers<[1], [0], [0], [1], [0, 0, 1, 1], [], []>} : vector<128x384xbf16>, vector<384x128xbf16>, vector<128x128xf32> -> vector<128x128xf32>
      %95 = arith.addf %86, %94 : vector<128x128xf32>
      %c0_105 = arith.constant 0 : index
      %c0_106 = arith.constant 0 : index
      %96 = vector.load %arg5[%c0_105, %c0_106] : memref<1x128xf32, #tpu.memory_space<vmem>>, vector<1x128xf32>
      %97 = vector.broadcast %96 : vector<1x128xf32> to vector<128x128xf32>
      %98 = arith.addf %95, %97 : vector<128x128xf32>
      %cst_107 = arith.constant 0.000000e+00 : f32
      %99 = vector.broadcast %cst_107 : f32 to vector<128x128xf32>
      %100 = arith.maximumf %98, %99 : vector<128x128xf32>
      %101 = arith.truncf %100 : vector<128x128xf32> to vector<128x128xbf16>
      %c0_108 = arith.constant 0 : index
      %c0_109 = arith.constant 0 : index
      %102 = vector.load %arg6[%c0_108, %c0_109] : memref<128x512xbf16, #tpu.memory_space<vmem>>, vector<128x512xbf16>
      %cst_110 = arith.constant dense<0.000000e+00> : vector<128x512xf32>
      %103 = tpu.matmul %101, %102, %cst_110 {dimension_numbers = #tpu.dot_dimension_numbers<[1], [0], [0], [1], [0, 0, 1, 1], [], []>} : vector<128x128xbf16>, vector<128x512xbf16>, vector<128x512xf32> -> vector<128x512xf32>
      %c0_111 = arith.constant 0 : index
      %104 = arith.index_cast %arg10 : i32 to index
      %c0_112 = arith.constant 0 : index
      %c0_113 = arith.constant 0 : index
      %c0_114 = arith.constant 0 : index
      %105 = vector.load %arg1[%c0_111, %104, %c0_112, %c0_113, %c0_114] : memref<1x4x8x16x512xf32, #tpu.memory_space<vmem>>, vector<1x1x8x16x512xf32>
      %106 = vector.shape_cast %105 : vector<1x1x8x16x512xf32> to vector<8x16x512xf32>
      %107 = vector.shape_cast %106 : vector<8x16x512xf32> to vector<128x512xf32>
      %c0_115 = arith.constant 0 : index
      %c0_116 = arith.constant 0 : index
      %108 = vector.load %arg7[%c0_115, %c0_116] : memref<1x512xf32, #tpu.memory_space<vmem>>, vector<1x512xf32>
      %109 = vector.broadcast %108 : vector<1x512xf32> to vector<128x512xf32>
      %110 = arith.addf %103, %109 : vector<128x512xf32>
      %111 = arith.addf %110, %107 : vector<128x512xf32>
      %cst_117 = arith.constant 0.000000e+00 : f32
      %112 = vector.broadcast %cst_117 : f32 to vector<128x512xf32>
      %113 = arith.maximumf %111, %112 : vector<128x512xf32>
      %114 = vector.shape_cast %113 : vector<128x512xf32> to vector<8x16x512xf32>
      %c0_118 = arith.constant 0 : index
      %115 = arith.index_cast %arg10 : i32 to index
      %c0_119 = arith.constant 0 : index
      %c0_120 = arith.constant 0 : index
      %c0_121 = arith.constant 0 : index
      %116 = vector.load %arg8[%c0_118, %115, %c0_119, %c0_120, %c0_121] : memref<1x4x8x16x512xf32, #tpu.memory_space<vmem>>, vector<1x1x8x16x512xf32>
      %117 = vector.shape_cast %116 : vector<1x1x8x16x512xf32> to vector<8x16x512xf32>
      %118 = vector.shape_cast %114 : vector<8x16x512xf32> to vector<1x1x8x16x512xf32>
      tpu.vector_store %arg8[%c0_118, %115, %c0_119, %c0_120, %c0_121], %118 {strides = array<i32>} : memref<1x4x8x16x512xf32, #tpu.memory_space<vmem>>, vector<1x1x8x16x512xf32>,
    }
    %c4_i32_25 = arith.constant 4 : i32
    return
  }
  func.func @transform_0(%arg0: i32) -> (i32, i32, i32, i32, i32) {
    %c0_i32 = arith.constant 0 : i32
    %c0_i32_0 = arith.constant 0 : i32
    %c0_i32_1 = arith.constant 0 : i32
    %c0_i32_2 = arith.constant 0 : i32
    %c0_i32_3 = arith.constant 0 : i32
    return %arg0, %c0_i32, %c0_i32_0, %c0_i32_1, %c0_i32_2 : i32, i32, i32, i32, i32
  }
  func.func @transform_1(%arg0: i32) -> (i32, i32) {
    %c0_i32 = arith.constant 0 : i32
    %c0_i32_0 = arith.constant 0 : i32
    %c0_i32_1 = arith.constant 0 : i32
    return %c0_i32, %c0_i32_0 : i32, i32
  }
  func.func @transform_2(%arg0: i32) -> (i32, i32) {
    %c0_i32 = arith.constant 0 : i32
    %c0_i32_0 = arith.constant 0 : i32
    %c0_i32_1 = arith.constant 0 : i32
    return %c0_i32, %c0_i32_0 : i32, i32
  }
  func.func @transform_3(%arg0: i32) -> (i32, i32, i32, i32) {
    %c0_i32 = arith.constant 0 : i32
    %c0_i32_0 = arith.constant 0 : i32
    %c0_i32_1 = arith.constant 0 : i32
    %c0_i32_2 = arith.constant 0 : i32
    %c0_i32_3 = arith.constant 0 : i32
    return %c0_i32, %c0_i32_0, %c0_i32_1, %c0_i32_2 : i32, i32, i32, i32
  }
  func.func @transform_4(%arg0: i32) -> (i32, i32) {
    %c0_i32 = arith.constant 0 : i32
    %c0_i32_0 = arith.constant 0 : i32
    %c0_i32_1 = arith.constant 0 : i32
    return %c0_i32, %c0_i32_0 : i32, i32
  }
  func.func @transform_5(%arg0: i32) -> (i32, i32) {
    %c0_i32 = arith.constant 0 : i32
    %c0_i32_0 = arith.constant 0 : i32
    %c0_i32_1 = arith.constant 0 : i32
    return %c0_i32, %c0_i32_0 : i32, i32
  }
  func.func @transform_6(%arg0: i32) -> (i32, i32) {
    %c0_i32 = arith.constant 0 : i32
    %c0_i32_0 = arith.constant 0 : i32
    %c0_i32_1 = arith.constant 0 : i32
    return %c0_i32, %c0_i32_0 : i32, i32
  }
  func.func @transform_7(%arg0: i32) -> (i32, i32, i32, i32, i32) {
    %c0_i32 = arith.constant 0 : i32
    %c0_i32_0 = arith.constant 0 : i32
    %c0_i32_1 = arith.constant 0 : i32
    %c0_i32_2 = arith.constant 0 : i32
    %c0_i32_3 = arith.constant 0 : i32
    return %arg0, %c0_i32, %c0_i32_0, %c0_i32_1, %c0_i32_2 : i32, i32, i32, i32, i32
  }
}

</mosaic_0001>

<bundles_post_ra>
// kernel: tpu_custom_call.1
= control target key start
LH: loop header
LB: loop body
LE: loop exit
PB: predicated region body
PF: predicated region fallthrough
CT: control target
= control target key end

     0   :  { %s10818_s0 = inlined_call_operand.hbm [shape: f32[2,4,8,16,512], index: 0, kind: input, shape index: {}]   ;;  %s10819_s1 = inlined_call_operand.hbm [shape: bf16[512,128], index: 1, kind: input, shape index: {}]   ;;  %s10820_s2 = inlined_call_operand.hbm [shape: f32[1,128], index: 2, kind: input, shape index: {}]   ;;  %s10821_s3 = inlined_call_operand.hbm [shape: bf16[3,3,384,128], index: 3, kind: input, shape index: {}]   ;;  %s10822_s4 = inlined_call_operand.hbm [shape: f32[1,128], index: 4, kind: input, shape index: {}]   ;;  %s10823_s5 = inlined_call_operand.hbm [shape: bf16[128,512], index: 5, kind: input, shape index: {}]   ;;  %s10824_s6 = inlined_call_operand.hbm [shape: f32[1,512], index: 6, kind: input, shape index: {}]   ;;  %s10825_s7 = inlined_call_operand.hbm [shape: f32[2,4,8,16,512], index: 7, kind: output, shape index: {}]  }
   0x1   :  { %10829 = sst [smem:[#allocation21_spill]] %s10819_s1 }
   0x2   :  { %12 = vsyncpa [#allocation4], 0 }
   0x3   :  { %14 = vsyncpa [#allocation4 + $0x1], 0 }
   0x4   :  { %15 = vsyncpa [#allocation7], 0 }
   0x5   :  { %16 = vsyncpa [#allocation10], 0 }
   0x6   :  { %17 = vsyncpa [#allocation13], 0 }
   0x7   :  { %18 = vsyncpa [#allocation5], 0 }
   0x8   :  { %20 = vsyncpa [#allocation5 + $0x1], 0  ;;  %s8958_s24 = smov 0   ;;  %s8960_s25 = smov 0  }
   0x9   :  { %s8962_s26 = smov 0   ;;  %s8964_s27 = smov 0  }
   0xa LB: > { %s8900_s28 = smov [#allocation6]   ;;  %s8979_s30 = sadd.s32 4294967295, %s8890_s27   ;;  %s8890_s27 = sphi %s8964_s27, %s10861_s27   ;;  %s8886_s26 = sphi %s8962_s26, %s10860_s26   ;;  %s8882_s25 = sphi %s8960_s25, %s10859_s25   ;;  %s8878_s24 = sphi %s8958_s24, %s10858_s24  }
   0xb   : > { %s221_s29 = sshll.u32 %s8900_s28, 4  ;;  %p6195_p0 = scmp.ge.s32.totalorder %s8890_s27, 1  ;;  %s8984_s29 = int_to_ptr.vmem [resolvable:$true] %s221_s29 }
   0xc   : > { %p10826_p1 = scmp.eq.s32.totalorder %s8979_s30, 0  ;;  %p209_p2 = scmp.lt.s32.totalorder %s8890_s27, 3 }
   0xd   : > { %s8901_s9 = smov [#allocation9]   ;;  %s8902_s12 = smov [#allocation12]  }
   0xe   : > { %p8986_p3 = pnand %p6195_p0, %p209_p2  ;;  %s245_s10 = sshll.u32 %s8901_s9, 4  ;;  %s8999_s10 = int_to_ptr.vmem [resolvable:$true] %s245_s10 }
   0xf   : > { %s269_s13 = sshll.u32 %s8902_s12, 4  ;;  %s10832_s1 = sld [smem:[#allocation21_spill]]  ;;  %s9001_s13 = int_to_ptr.vmem [resolvable:$true] %s269_s13 }
  0x10   : > { %s10830_s8 = scalar_select %p8986_p3, 1, 0 }
  0x11   : > { %p8205_p5 = pneg %p8986_p3 }
  0x13   : > { %p8995_p6 = pnand %p8205_p5, %p10826_p1 }
  0x15   : > { %s8606_s16 = scalar_lea.hbm %s10832_s1, 4096  ;;  %p9011_p8 = pneg %p8995_p6 }
  0x16   : > { %p8607_p7 = scmp.ne.s32.totalorder %s10832_s1, %s8606_s16  ;;  %p8613_p11 = scmp.lt.u32.totalorder %s8606_s16, %s10832_s1 }
  0x18   : > { %p8609_p9 = pnand %p9011_p8, %p8607_p7 }
  0x1a   : > { %p8610_p10 = pneg %p8609_p9 }
  0x1c   : > { %p8615_p12 = pnand %p8613_p11, %p8610_p10 }
  0x1e   : > { %8618 = shalt.err (!%p8615_p12)
}
  0x1f   : > { %s8619_s22 = scalar_lea.vmem %s8984_s29, 4096  ;;  %p8627_p5 = scmp.lt.s32.totalorder %s8984_s29, %s8984_s29 }
  0x20   : > { %p8620_p13 = scmp.ne.s32.totalorder %s8984_s29, %s8619_s22  ;;  %p8628_p4 = scmp.lt.s32.totalorder %s8619_s22, %s8619_s22 }
  0x22   : > { %p8622_p0 = pnand %p8620_p13, %p9011_p8  ;;  %p8629_p7 = por %p8628_p4, %p8627_p5 }
  0x24   : > { %p8623_p2 = pneg %p8622_p0 }
  0x26   : > { %p8630_p9 = pnand %p8629_p7, %p8623_p2 }
  0x28   : > { %8633 = shalt.err (!%p8630_p9)
}
  0x29   : > { %s8903_s23 = smov 64   ;;  %s8904_s28 = smov 4  }
  0x2a   : > { %8208 = dma.hbm_to_vmem [thread:$0]  (!%p8995_p6), %s10832_s1, 4096, %s8984_s29, [#allocation7], %s8903_s23, %s8903_s23, %s8904_s28  }
  0x2b   : > { %s8634_s16 = scalar_lea.hbm %s10821_s3, 27648 }
  0x2c   : > { %p8635_p4 = scmp.ne.s32.totalorder %s10821_s3, %s8634_s16  ;;  %p8641_p12 = scmp.lt.u32.totalorder %s8634_s16, %s10821_s3 }
  0x2e   : > { %p8637_p10 = pnand %p8635_p4, %p9011_p8 }
  0x30   : > { %p8638_p11 = pneg %p8637_p10 }
  0x32   : > { %p8643_p13 = pnand %p8641_p12, %p8638_p11 }
  0x34   : > { %8646 = shalt.err (!%p8643_p13)
}
  0x35   : > { %s8647_s29 = scalar_lea.vmem %s8999_s10, 27648  ;;  %p8655_p7 = scmp.lt.s32.totalorder %s8999_s10, %s8999_s10 }
  0x36   : > { %p8648_p0 = scmp.ne.s32.totalorder %s8999_s10, %s8647_s29  ;;  %p8656_p9 = scmp.lt.s32.totalorder %s8647_s29, %s8647_s29 }
  0x38   : > { %p8650_p2 = pnand %p8648_p0, %p9011_p8  ;;  %p8657_p4 = por %p8656_p9, %p8655_p7 }
  0x3a   : > { %p8651_p5 = pneg %p8650_p2 }
  0x3c   : > { %p8658_p10 = pnand %p8657_p4, %p8651_p5 }
  0x3e   : > { %8661 = shalt.err (!%p8658_p10)
}
  0x3f   : > { %8214 = dma.hbm_to_vmem [thread:$0]  (!%p8995_p6), %s10821_s3, 27648, %s8999_s10, [#allocation10], %s8903_s23, %s8903_s23, %s8904_s28  }
  0x40   : > { %s8662_s15 = scalar_lea.hbm %s10823_s5, 4096 }
  0x41   : > { %p8663_p11 = scmp.ne.s32.totalorder %s10823_s5, %s8662_s15  ;;  %p8669_p0 = scmp.lt.u32.totalorder %s8662_s15, %s10823_s5 }
  0x43   : > { %p8665_p12 = pnand %p8663_p11, %p9011_p8 }
  0x45   : > { %p8666_p13 = pneg %p8665_p12 }
  0x47   : > { %p8671_p2 = pnand %p8669_p0, %p8666_p13 }
  0x49   : > { %8674 = shalt.err (!%p8671_p2)
}
  0x4a   : > { %s8675_s10 = scalar_lea.vmem %s9001_s13, 4096  ;;  %p8683_p4 = scmp.lt.s32.totalorder %s9001_s13, %s9001_s13 }
  0x4b   : > { %p8676_p5 = scmp.ne.s32.totalorder %s9001_s13, %s8675_s10  ;;  %p8684_p10 = scmp.lt.s32.totalorder %s8675_s10, %s8675_s10 }
  0x4d   : > { %p8678_p7 = pnand %p8676_p5, %p9011_p8  ;;  %p8685_p11 = por %p8684_p10, %p8683_p4 }
  0x4f   : > { %p8679_p9 = pneg %p8678_p7 }
  0x51   : > { %p8686_p12 = pnand %p8685_p11, %p8679_p9 }
  0x53   : > { %8689 = shalt.err (!%p8686_p12)
}
  0x54   : > { %s8905_s23 = smov 256   ;;  %s8906_s28 = smov 16  }
  0x55   : > { %8220 = dma.hbm_to_vmem [thread:$0]  (!%p8995_p6), %s10823_s5, 4096, %s9001_s13, [#allocation13], %s8905_s23, %s8905_s23, %s8906_s28  }
  0x56   : > { %s8907_s22 = smov [#allocation8]   ;;  %s8908_s12 = smov [#allocation11]  }
  0x57   : > { %s235_s9 = sshll.u32 %s8907_s22, 4  ;;  %s259_s14 = sshll.u32 %s8908_s12, 4  ;;  %s236_s9 = int_to_ptr.vmem [resolvable:$true] %s235_s9  ;;  %s260_s14 = int_to_ptr.vmem [resolvable:$true] %s259_s14 }
  0x58   : > { %s8690_s17 = scalar_lea.hbm %s10820_s2, 16 }
  0x59   : > { %p8691_p13 = scmp.ne.s32.totalorder %s10820_s2, %s8690_s17  ;;  %p8697_p5 = scmp.lt.u32.totalorder %s8690_s17, %s10820_s2 }
  0x5b   : > { %p8693_p0 = pnand %p8691_p13, %p9011_p8 }
  0x5d   : > { %p8694_p2 = pneg %p8693_p0 }
  0x5f   : > { %p8699_p7 = pnand %p8697_p5, %p8694_p2 }
  0x61   : > { %8702 = shalt.err (!%p8699_p7)
}
  0x62   : > { %s8703_s13 = scalar_lea.vmem %s236_s9, 16  ;;  %s8710_s23 = scalar_lea.vmem %s236_s9, 32 }
  0x63   : > { %p8704_p9 = scmp.ne.s32.totalorder %s236_s9, %s8703_s13  ;;  %p8711_p11 = scmp.lt.s32.totalorder %s236_s9, %s236_s9 }
  0x64   : > { %p8712_p12 = scmp.lt.s32.totalorder %s8710_s23, %s8703_s13 }
  0x65   : > { %p8706_p4 = pnand %p8704_p9, %p9011_p8 }
  0x66   : > { %p8713_p1 = por %p8712_p12, %p8711_p11 }
  0x67   : > { %p8707_p10 = pneg %p8706_p4 }
  0x69   : > { %p8714_p3 = pnand %p8713_p1, %p8707_p10 }
  0x6b   : > { %8717 = shalt.err (!%p8714_p3)
}
  0x6c   : > { %8211 = dma.hbm_to_vmem [thread:$0]  (!%p8995_p6), %s10820_s2, 16, %s236_s9, [#allocation7]  }
  0x6d   : > { %s8718_s22 = scalar_lea.hbm %s10822_s4, 16 }
  0x6e   : > { %p8719_p13 = scmp.ne.s32.totalorder %s10822_s4, %s8718_s22  ;;  %p8725_p3 = scmp.lt.u32.totalorder %s8718_s22, %s10822_s4 }
  0x70   : > { %p8721_p0 = pnand %p8719_p13, %p9011_p8 }
  0x72   : > { %p8722_p1 = pneg %p8721_p0 }
  0x74   : > { %p8727_p2 = pnand %p8725_p3, %p8722_p1 }
  0x76   : > { %8730 = shalt.err (!%p8727_p2)
}
  0x77   : > { %s8731_s18 = scalar_lea.vmem %s260_s14, 16  ;;  %s8738_s9 = scalar_lea.vmem %s260_s14, 32 }
  0x78   : > { %p8732_p5 = scmp.ne.s32.totalorder %s260_s14, %s8731_s18  ;;  %p8739_p4 = scmp.lt.s32.totalorder %s260_s14, %s260_s14 }
  0x79   : > { %p8740_p10 = scmp.lt.s32.totalorder %s8738_s9, %s8731_s18 }
  0x7a   : > { %p8734_p7 = pnand %p8732_p5, %p9011_p8 }
  0x7b   : > { %p8741_p11 = por %p8740_p10, %p8739_p4 }
  0x7c   : > { %p8735_p9 = pneg %p8734_p7 }
  0x7e   : > { %p8742_p12 = pnand %p8741_p11, %p8735_p9 }
  0x80   : > { %8745 = shalt.err (!%p8742_p12)
}
  0x81   : > { %8217 = dma.hbm_to_vmem [thread:$0]  (!%p8995_p6), %s10822_s4, 16, %s260_s14, [#allocation10]  }
  0x82   : > { %s8909_s13 = smov [#allocation14]   ;;  %s8746_s1 = scalar_lea.hbm %s10824_s6, 64 }
  0x83   : > { %s283_s23 = sshll.u32 %s8909_s13, 4  ;;  %p8747_p13 = scmp.ne.s32.totalorder %s10824_s6, %s8746_s1  ;;  %s284_s23 = int_to_ptr.vmem [resolvable:$true] %s283_s23 }
  0x84   : > { %p8753_p3 = scmp.lt.u32.totalorder %s8746_s1, %s10824_s6 }
  0x85   : > { %p8749_p0 = pnand %p8747_p13, %p9011_p8 }
  0x87   : > { %p8750_p1 = pneg %p8749_p0 }
  0x89   : > { %p8755_p2 = pnand %p8753_p3, %p8750_p1 }
  0x8b   : > { %8758 = shalt.err (!%p8755_p2)
}
  0x8c   : > { %s8759_s14 = scalar_lea.vmem %s284_s23, 64  ;;  %p8767_p4 = scmp.lt.s32.totalorder %s284_s23, %s284_s23 }
  0x8d   : > { %p8760_p5 = scmp.ne.s32.totalorder %s284_s23, %s8759_s14  ;;  %p8768_p10 = scmp.lt.s32.totalorder %s8759_s14, %s8759_s14 }
  0x8f   : > { %p8762_p7 = pnand %p8760_p5, %p9011_p8  ;;  %p8769_p11 = por %p8768_p10, %p8767_p4 }
  0x91   : > { %p8763_p9 = pneg %p8762_p7 }
  0x93   : > { %p8770_p12 = pnand %p8769_p11, %p8763_p9 }
  0x95   : > { %8773 = shalt.err (!%p8770_p12)
}
  0x96   : > { %8223 = dma.hbm_to_vmem [thread:$0]  (!%p8995_p6), %s10824_s6, 64, %s284_s23, [#allocation13]  }
  0x97   : > { %s6194_s19 = sadd.s32 4294967294, %s8890_s27   ;;  %s9134_s11 = sadd.s32 1, %s8890_s27  }
  0x98   : > { %s30_s18 = ssub.s32 %s8890_s27, %s9134_s11  ;;  %s33_s9 = sadd.s32 1, %s8886_s26 }
  0x99   : > { %p31_p8 = scmp.eq.s32.totalorder %s30_s18, 0  ;;  %p40_p13 = scmp.ne.s32.totalorder %s8886_s26, %s8882_s25 }
  0x9a   : > { %p41_p0 = scmp.eq.s32.totalorder %s8890_s27, 0  ;;  %p46_p1 = scmp.ne.s32.totalorder %s8882_s25, %s8878_s24 }
  0x9b   : > { %s9145_s20 = scalar_select %p31_p8, %s8886_s26, %s33_s9  }
  0x9c   : > { %p9147_p3 = por %p41_p0, %p40_p13  ;;  %p10835_p2 = scmp.eq.s32.totalorder %s8979_s30, 0 }
  0x9d   : > { %p196_p5 = scmp.eq.s32.totalorder %s8979_s30, 1  ;;  %p202_p7 = scmp.eq.s32.totalorder %s6194_s19, 1 }
  0x9e   : > { %p9153_p6 = por %p10835_p2, %p46_p1  ;;  %p8238_p9 = scmp.lt.s32.totalorder %s8890_s27, 2 }
  0x9f   : > { %s294_s23 = sand.u32 1, %s8886_s26   ;;  %p9160_p4 = por %p196_p5, %p40_p13 }
  0xa0   : > { %p9164_p10 = por %p202_p7, %p46_p1  ;;  %s6203_s1 = sshll.u32 %s294_s23, 11 }
  0xa1   : > { %s10837_s28 = scalar_select %p9160_p4, 1, 0 }
  0xa2   : > { %s10838_s21 = scalar_select %p9164_p10, 1, 0 }
  0xa3   : > { %s6747_s29 = sshll.u32 %s8890_s27, 15  ;;  %s298_s14 = scalar_lea.vmem [#allocation3], %s6203_s1 }
  0xa4   : > { %s9172_s15 = scalar_lea.hbm %s10818_s0, %s6747_s29  ;;  %s305_s16 = sshll.u32 %s298_s14, 4  ;;  %s9174_s16 = int_to_ptr.vmem [resolvable:$true] %s305_s16 }
  0xa5   : > { %p9178_p11 = pnand %p8238_p9, %p9147_p3  ;;  %s9182_s19 = scalar_lea.sflag [#allocation4], %s294_s23 }
  0xa6   : > { %s8774_s18 = scalar_lea.hbm %s9172_s15, 32768  ;;  %s8779_s10 = scalar_lea.hbm %s10818_s0, 65536 }
  0xa7   : > { %p8775_p12 = scmp.ne.s32.totalorder %s9172_s15, %s8774_s18  ;;  %p8776_p8 = pneg %p9178_p11 }
  0xa8   : > { %p8780_p1 = scmp.lt.u32.totalorder %s9172_s15, %s10818_s0  ;;  %p8781_p3 = scmp.lt.u32.totalorder %s8779_s10, %s8774_s18 }
  0xa9   : > { %p8777_p13 = pnand %p8776_p8, %p8775_p12  ;;  %p8783_p5 = scmp.lt.u32.totalorder %s8774_s18, %s9172_s15 }
  0xaa   : > { %p8782_p2 = por %p8781_p3, %p8780_p1 }
  0xab   : > { %p8778_p0 = pneg %p8777_p13 }
  0xac   : > { %p8784_p7 = por %p8783_p5, %p8782_p2 }
  0xae   : > { %p8785_p9 = pnand %p8784_p7, %p8778_p0 }
  0xb0   : > { %8788 = shalt.err (!%p8785_p9)
}
  0xb1   : > { %s8789_s23 = scalar_lea.vmem %s9174_s16, 32768  ;;  %s8910_s12 = smov [#allocation3]  }
  0xb2   : > { %p8790_p12 = scmp.ne.s32.totalorder %s9174_s16, %s8789_s23  ;;  %s8794_s14 = sshll.u32 %s8910_s12, 4  ;;  %s8795_s14 = int_to_ptr.vmem [resolvable:$false] %s8794_s14 }
  0xb3   : > { %s8796_s9 = scalar_lea.vmem %s8795_s14, 65536  ;;  %p8797_p4 = scmp.lt.s32.totalorder %s9174_s16, %s8795_s14 }
  0xb4   : > { %p8792_p13 = pnand %p8790_p12, %p8776_p8  ;;  %p8798_p1 = scmp.lt.s32.totalorder %s8796_s9, %s8789_s23 }
  0xb6   : > { %p8793_p10 = pneg %p8792_p13  ;;  %p8799_p3 = por %p8798_p1, %p8797_p4 }
  0xb8   : > { %p8800_p2 = pnand %p8799_p3, %p8793_p10 }
  0xba   : > { %8803 = shalt.err (!%p8800_p2)
}
  0xbb   : > { %s8911_s18 = smov 512   ;;  %s8912_s1 = smov 32  }
  0xbc   : > { %8227 = dma.hbm_to_vmem [thread:$0]  (!%p9178_p11), %s9172_s15, 32768, %s9174_s16, %s9182_s19, %s8911_s18, %s8911_s18, %s8912_s1  }
  0xbd   : > { %p10840_p8 = scmp.ne.s32.totalorder %s10830_s8, 0 }
  0xbe   : > { %s9213_s10 = sand.u32 (!%p10840_p8), 1, %s8882_s25  }
  0xbf   : > { %317 = sbr.rel (%p10840_p8) target bundleno = 1572 (0x624), region = 48  ;;  %s6207_s29 = sshll.u32 (!%p10840_p8), %s9213_s10, 11 }
  0xc0   : > { %s320_s22 = scalar_lea.sflag (!%p10840_p8), [#allocation4], %s9213_s10  ;;  %s9219_s23 = scalar_lea.vmem (!%p10840_p8), [#allocation3], %s6207_s29 }
  0xc6   : > { %8857 = dma.done.wait (%p9153_p6), %s320_s22, 32768  }
  0xc7   : > { %8859 = vsyncadd (%p9153_p6), %s320_s22, 4294934528  ;;  %p10841_p4 = scmp.eq.s32.totalorder %s8979_s30, 0 }
  0xc9   : > { %8861 = dma.done.wait (%p10841_p4), [#allocation7], 4112   ;;  %p10842_p10 = pmov %p10841_p4 }
  0xca   : > { %p10843_p11 = pmov %p10841_p4 }
  0xcb   : > { %8863 = vsyncadd (%p10842_p10), [#allocation7], 4294963184 }
  0xcc   : > { %8865 = dma.done.wait (%p10843_p11), [#allocation10], 27664   ;;  %p10844_p0 = pmov %p10841_p4 }
  0xce   : > { %8867 = vsyncadd (%p10844_p0), [#allocation10], 4294939632  ;;  %p10845_p5 = pmov %p10844_p0 }
  0xcf   : > { %p10846_p7 = pmov %p10844_p0 }
  0xd0   : > { %8869 = dma.done.wait (%p10845_p5), [#allocation13], 4160  }
  0xd1   : > { %8871 = vsyncadd (%p10846_p7), [#allocation13], 4294963136  ;;  %v8913_v0 = vmov 0   ;;  %vm467_vm0 = vcmask 1040384   ;;  %vm468_vm1 = vsmask.f32 256 }
  0xd2   : > { %379 = vst [vmem:[#allocation2] sm:$0xff] %v8913_v0  ;;  %380 = vst [vmem:[#allocation2 + $0x8] sm:$0xff] %v8913_v0  ;;  %v470_v2 = vld [vmem:[#allocation2 + $0x108] sm:$0x1]  ;;  %v473_v3 = vld [vmem:[#allocation2 + $0x120] sm:$0x1] }
  0xd3   : > { %381 = vst [vmem:[#allocation2 + $0x10] sm:$0xff] %v8913_v0  ;;  %382 = vst [vmem:[#allocation2 + $0x18] sm:$0xff] %v8913_v0  ;;  %v476_v4 = vld [vmem:[#allocation2 + $0x138] sm:$0x1]  ;;  %v479_v8 = vld [vmem:[#allocation2 + $0x150] sm:$0x1] }
  0xd4   : > { %383 = vst [vmem:[#allocation2 + $0x20] sm:$0xff] %v8913_v0  ;;  %384 = vst [vmem:[#allocation2 + $0x28] sm:$0xff] %v8913_v0  ;;  %v482_v10 = vld [vmem:[#allocation2 + $0x168] sm:$0x1]  ;;  %v485_v11 = vld [vmem:[#allocation2 + $0x180] sm:$0x1] }
  0xd5   : > { %385 = vst [vmem:[#allocation2 + $0x30] sm:$0xff] %v8913_v0  ;;  %386 = vst [vmem:[#allocation2 + $0x38] sm:$0xff] %v8913_v0  ;;  %v488_v14 = vld [vmem:[#allocation2 + $0x198] sm:$0x1]  ;;  %v491_v15 = vld [vmem:[#allocation2 + $0x1b0] sm:$0x1] }
  0xd6   : > { %387 = vst [vmem:[#allocation2 + $0x40] sm:$0xff] %v8913_v0  ;;  %388 = vst [vmem:[#allocation2 + $0x48] sm:$0xff] %v8913_v0  ;;  %vm566_vm3 = vcmask 1047559   ;;  %vm567_vm4 = vsmask.f32 7966  ;;  %s9461_s8 = scalar_lea.vmem [#allocation15], %s6207_s29 }
  0xd7   : > { %389 = vst [vmem:[#allocation2 + $0x50] sm:$0xff] %v8913_v0  ;;  %390 = vst [vmem:[#allocation2 + $0x58] sm:$0xff] %v8913_v0  ;;  %v494_v18 = vld [vmem:[#allocation2 + $0x1f8] sm:$0x1]  ;;  %v497_v19 = vld [vmem:[#allocation2 + $0x210] sm:$0x1] }
  0xd8   : > { %391 = vst [vmem:[#allocation2 + $0x60] sm:$0xff] %v8913_v0  ;;  %392 = vst [vmem:[#allocation2 + $0x68] sm:$0xff] %v8913_v0  ;;  %v500_v22 = vld [vmem:[#allocation2 + $0x228] sm:$0x1]  ;;  %v503_v23 = vld [vmem:[#allocation2 + $0x240] sm:$0x1] }
  0xd9   : > { %393 = vst [vmem:[#allocation2 + $0x70] sm:$0xff] %v8913_v0  ;;  %394 = vst [vmem:[#allocation2 + $0x78] sm:$0xff] %v8913_v0  ;;  %v506_v26 = vld [vmem:[#allocation2 + $0x258] sm:$0x1]  ;;  %v509_v27 = vld [vmem:[#allocation2 + $0x270] sm:$0x1] }
  0xda   : > { %395 = vst [vmem:[#allocation2 + $0x80] sm:$0xff] %v8913_v0  ;;  %396 = vst [vmem:[#allocation2 + $0x88] sm:$0xff] %v8913_v0  ;;  %v512_v30 = vld [vmem:[#allocation2 + $0x288] sm:$0x1]  ;;  %v515_v31 = vld [vmem:[#allocation2 + $0x2a0] sm:$0x1] }
  0xdb   : > { %397 = vst [vmem:[#allocation2 + $0x90] sm:$0xff] %v8913_v0  ;;  %398 = vst [vmem:[#allocation2 + $0x98] sm:$0xff] %v8913_v0  ;;  %v518_v34 = vld [vmem:[#allocation2 + $0x2e8] sm:$0x1]  ;;  %v521_v35 = vld [vmem:[#allocation2 + $0x300] sm:$0x1] }
  0xdc   : > { %399 = vst [vmem:[#allocation2 + $0xa0] sm:$0xff] %v8913_v0  ;;  %400 = vst [vmem:[#allocation2 + $0xa8] sm:$0xff] %v8913_v0  ;;  %v524_v38 = vld [vmem:[#allocation2 + $0x318] sm:$0x1]  ;;  %v527_v39 = vld [vmem:[#allocation2 + $0x330] sm:$0x1] }
  0xdd   : > { %401 = vst [vmem:[#allocation2 + $0xb0] sm:$0xff] %v8913_v0  ;;  %402 = vst [vmem:[#allocation2 + $0xb8] sm:$0xff] %v8913_v0  ;;  %v530_v42 = vld [vmem:[#allocation2 + $0x348] sm:$0x1]  ;;  %v533_v43 = vld [vmem:[#allocation2 + $0x360] sm:$0x1] }
  0xde   : > { %403 = vst [vmem:[#allocation2 + $0xc0] sm:$0xff] %v8913_v0  ;;  %404 = vst [vmem:[#allocation2 + $0xc8] sm:$0xff] %v8913_v0  ;;  %v536_v46 = vld [vmem:[#allocation2 + $0x378] sm:$0x1]  ;;  %v539_v47 = vld [vmem:[#allocation2 + $0x390] sm:$0x1] }
  0xdf   : > { %405 = vst [vmem:[#allocation2 + $0xd0] sm:$0xff] %v8913_v0  ;;  %406 = vst [vmem:[#allocation2 + $0xd8] sm:$0xff] %v8913_v0  ;;  %v542_v50 = vld [vmem:[#allocation2 + $0x3d8] sm:$0x1]  ;;  %v545_v51 = vld [vmem:[#allocation2 + $0x3f0] sm:$0x1] }
  0xe0   : > { %407 = vst [vmem:[#allocation2 + $0xe0] sm:$0xff] %v8913_v0  ;;  %408 = vst [vmem:[#allocation2 + $0xe8] sm:$0xff] %v8913_v0  ;;  %v548_v54 = vld [vmem:[#allocation2 + $0x408] sm:$0x1]  ;;  %v551_v55 = vld [vmem:[#allocation2 + $0x420] sm:$0x1] }
  0xe1   : > { %410 = vst [vmem:[#allocation2 + $0x4b0] sm:$0xff] %v8913_v0  ;;  %411 = vst [vmem:[#allocation2 + $0x4b8] sm:$0xff] %v8913_v0  ;;  %v554_v58 = vld [vmem:[#allocation2 + $0x438] sm:$0x1]  ;;  %v557_v59 = vld [vmem:[#allocation2 + $0x450] sm:$0x1] }
  0xe2   : > { %412 = vst [vmem:[#allocation2 + $0x4c0] sm:$0xff] %v8913_v0  ;;  %413 = vst [vmem:[#allocation2 + $0x4c8] sm:$0xff] %v8913_v0  ;;  %v560_v63 = vld [vmem:[#allocation2 + $0x468] sm:$0x1]  ;;  %s9463_s13 = smov 0  }
  0xe3   : > { %414 = vst [vmem:[#allocation2 + $0x4d0] sm:$0xff] %v8913_v0  ;;  %415 = vst [vmem:[#allocation2 + $0x4d8] sm:$0xff] %v8913_v0 }
  0xe4   : > { %416 = vst [vmem:[#allocation2 + $0x4e0] sm:$0xff] %v8913_v0  ;;  %417 = vst [vmem:[#allocation2 + $0x4e8] sm:$0xff] %v8913_v0 }
  0xe5   : > { %418 = vst [vmem:[#allocation2 + $0x4f0] sm:$0xff] %v8913_v0  ;;  %419 = vst [vmem:[#allocation2 + $0x4f8] sm:$0xff] %v8913_v0 }
  0xe6   : > { %420 = vst [vmem:[#allocation2 + $0x500] sm:$0xff] %v8913_v0  ;;  %421 = vst [vmem:[#allocation2 + $0x508] sm:$0xff] %v8913_v0 }
  0xe7   : > { %422 = vst [vmem:[#allocation2 + $0x510] sm:$0xff] %v8913_v0  ;;  %423 = vst [vmem:[#allocation2 + $0x518] sm:$0xff] %v8913_v0 }
  0xe8   : > { %424 = vst [vmem:[#allocation2 + $0x520] sm:$0xff] %v8913_v0  ;;  %425 = vst [vmem:[#allocation2 + $0x528] sm:$0xff] %v8913_v0 }
  0xe9   : > { %426 = vst [vmem:[#allocation2 + $0x530] sm:$0xff] %v8913_v0  ;;  %427 = vst [vmem:[#allocation2 + $0x538] sm:$0xff] %v8913_v0 }
  0xea   : > { %428 = vst [vmem:[#allocation2 + $0x540] sm:$0xff] %v8913_v0  ;;  %429 = vst [vmem:[#allocation2 + $0x548] sm:$0xff] %v8913_v0 }
  0xeb   : > { %430 = vst [vmem:[#allocation2 + $0x550] sm:$0xff] %v8913_v0  ;;  %431 = vst [vmem:[#allocation2 + $0x558] sm:$0xff] %v8913_v0 }
  0xec   : > { %432 = vst [vmem:[#allocation2 + $0x560] sm:$0xff] %v8913_v0  ;;  %433 = vst [vmem:[#allocation2 + $0x568] sm:$0xff] %v8913_v0 }
  0xed   : > { %434 = vst [vmem:[#allocation2 + $0x570] sm:$0xff] %v8913_v0  ;;  %435 = vst [vmem:[#allocation2 + $0x578] sm:$0xff] %v8913_v0 }
  0xee   : > { %436 = vst [vmem:[#allocation2 + $0x580] sm:$0xff] %v8913_v0  ;;  %437 = vst [vmem:[#allocation2 + $0x588] sm:$0xff] %v8913_v0 }
  0xef   : > { %438 = vst [vmem:[#allocation2 + $0x590] sm:$0xff] %v8913_v0  ;;  %439 = vst [vmem:[#allocation2 + $0x598] sm:$0xff] %v8913_v0 }
  0xf0   : > { %441 = vst [vmem:[#allocation2 + $0xf0] sm:$0xff] %v8913_v0  ;;  %442 = vst [vmem:[#allocation2 + $0xf8] sm:$0xff] %v8913_v0 }
  0xf1   : > { %443 = vst [vmem:[#allocation2 + $0x100] sm:$0xff] %v8913_v0  ;;  %444 = vst [vmem:[#allocation2 + $0x1e0] sm:$0xff] %v8913_v0 }
  0xf2   : > { %445 = vst [vmem:[#allocation2 + $0x1e8] sm:$0xff] %v8913_v0  ;;  %446 = vst [vmem:[#allocation2 + $0x1f0] sm:$0xff] %v8913_v0 }
  0xf3   : > { %447 = vst [vmem:[#allocation2 + $0x2d0] sm:$0xff] %v8913_v0  ;;  %448 = vst [vmem:[#allocation2 + $0x2d8] sm:$0xff] %v8913_v0 }
  0xf4   : > { %449 = vst [vmem:[#allocation2 + $0x2e0] sm:$0xff] %v8913_v0  ;;  %450 = vst [vmem:[#allocation2 + $0x3c0] sm:$0xff] %v8913_v0 }
  0xf5   : > { %451 = vst [vmem:[#allocation2 + $0x3c8] sm:$0xff] %v8913_v0  ;;  %452 = vst [vmem:[#allocation2 + $0x3d0] sm:$0xff] %v8913_v0 }
  0xf6   : > { %454 = vst [vmem:[#allocation2 + $0x1c8] sm:$0xff] %v8913_v0  ;;  %455 = vst [vmem:[#allocation2 + $0x1d0] sm:$0xff] %v8913_v0 }
  0xf7   : > { %456 = vst [vmem:[#allocation2 + $0x1d8] sm:$0xff] %v8913_v0  ;;  %457 = vst [vmem:[#allocation2 + $0x2b8] sm:$0xff] %v8913_v0 }
  0xf8   : > { %458 = vst [vmem:[#allocation2 + $0x2c0] sm:$0xff] %v8913_v0  ;;  %459 = vst [vmem:[#allocation2 + $0x2c8] sm:$0xff] %v8913_v0 }
  0xf9   : > { %460 = vst [vmem:[#allocation2 + $0x3a8] sm:$0xff] %v8913_v0  ;;  %461 = vst [vmem:[#allocation2 + $0x3b0] sm:$0xff] %v8913_v0 }
  0xfa   : > { %462 = vst [vmem:[#allocation2 + $0x3b8] sm:$0xff] %v8913_v0  ;;  %463 = vst [vmem:[#allocation2 + $0x498] sm:$0xff] %v8913_v0 }
  0xfb   : > { %464 = vst [vmem:[#allocation2 + $0x4a0] sm:$0xff] %v8913_v0  ;;  %465 = vst [vmem:[#allocation2 + $0x4a8] sm:$0xff] %v8913_v0  ;;  %v563_v0 = vld [vmem:[#allocation2 + $0x480] sm:$0x1] }
  0xfc   : > { %vm9321_vm2 = vmand %vm467_vm0, %vm468_vm1 }
  0xfd   : > { %v471_v5 = vsel %vm9321_vm2, 0, %v470_v2  ;;  %v474_v6 = vsel %vm9321_vm2, 0, %v473_v3  ;;  %v477_v7 = vsel %vm9321_vm2, 0, %v476_v4  ;;  %v480_v9 = vsel %vm9321_vm2, 0, %v479_v8  ;;  %vm9383_vm5 = vmand %vm566_vm3, %vm567_vm4  ;;  %v569_v4 = vld [vmem:[#allocation2 + $0x118] sm:$0x80] }
  0xfe   : > { %472 = vst [vmem:[#allocation2 + $0x108] sm:$0x1] %v471_v5  ;;  %475 = vst [vmem:[#allocation2 + $0x120] sm:$0x1] %v474_v6  ;;  %v483_v12 = vsel %vm9321_vm2, 0, %v482_v10  ;;  %v486_v13 = vsel %vm9321_vm2, 0, %v485_v11 }
  0xff   : > { %478 = vst [vmem:[#allocation2 + $0x138] sm:$0x1] %v477_v7  ;;  %481 = vst [vmem:[#allocation2 + $0x150] sm:$0x1] %v480_v9  ;;  %v489_v16 = vsel %vm9321_vm2, 0, %v488_v14  ;;  %v492_v17 = vsel %vm9321_vm2, 0, %v491_v15 }
 0x100   : > { %484 = vst [vmem:[#allocation2 + $0x168] sm:$0x1] %v483_v12  ;;  %487 = vst [vmem:[#allocation2 + $0x180] sm:$0x1] %v486_v13  ;;  %v495_v20 = vsel %vm9321_vm2, 0, %v494_v18  ;;  %v498_v21 = vsel %vm9321_vm2, 0, %v497_v19 }
 0x101   : > { %490 = vst [vmem:[#allocation2 + $0x198] sm:$0x1] %v489_v16  ;;  %493 = vst [vmem:[#allocation2 + $0x1b0] sm:$0x1] %v492_v17  ;;  %v501_v24 = vsel %vm9321_vm2, 0, %v500_v22  ;;  %v504_v25 = vsel %vm9321_vm2, 0, %v503_v23 }
 0x102   : > { %496 = vst [vmem:[#allocation2 + $0x1f8] sm:$0x1] %v495_v20  ;;  %499 = vst [vmem:[#allocation2 + $0x210] sm:$0x1] %v498_v21  ;;  %v507_v28 = vsel %vm9321_vm2, 0, %v506_v26  ;;  %v510_v29 = vsel %vm9321_vm2, 0, %v509_v27 }
 0x103   : > { %502 = vst [vmem:[#allocation2 + $0x228] sm:$0x1] %v501_v24  ;;  %505 = vst [vmem:[#allocation2 + $0x240] sm:$0x1] %v504_v25  ;;  %v513_v32 = vsel %vm9321_vm2, 0, %v512_v30  ;;  %v516_v33 = vsel %vm9321_vm2, 0, %v515_v31 }
 0x104   : > { %508 = vst [vmem:[#allocation2 + $0x258] sm:$0x1] %v507_v28  ;;  %511 = vst [vmem:[#allocation2 + $0x270] sm:$0x1] %v510_v29  ;;  %v519_v36 = vsel %vm9321_vm2, 0, %v518_v34  ;;  %v522_v37 = vsel %vm9321_vm2, 0, %v521_v35 }
 0x105   : > { %514 = vst [vmem:[#allocation2 + $0x288] sm:$0x1] %v513_v32  ;;  %517 = vst [vmem:[#allocation2 + $0x2a0] sm:$0x1] %v516_v33  ;;  %v525_v40 = vsel %vm9321_vm2, 0, %v524_v38  ;;  %v528_v41 = vsel %vm9321_vm2, 0, %v527_v39 }
 0x106   : > { %520 = vst [vmem:[#allocation2 + $0x2e8] sm:$0x1] %v519_v36  ;;  %523 = vst [vmem:[#allocation2 + $0x300] sm:$0x1] %v522_v37  ;;  %v531_v44 = vsel %vm9321_vm2, 0, %v530_v42  ;;  %v534_v45 = vsel %vm9321_vm2, 0, %v533_v43 }
 0x107   : > { %526 = vst [vmem:[#allocation2 + $0x318] sm:$0x1] %v525_v40  ;;  %529 = vst [vmem:[#allocation2 + $0x330] sm:$0x1] %v528_v41  ;;  %v537_v48 = vsel %vm9321_vm2, 0, %v536_v46  ;;  %v540_v49 = vsel %vm9321_vm2, 0, %v539_v47 }
 0x108   : > { %532 = vst [vmem:[#allocation2 + $0x348] sm:$0x1] %v531_v44  ;;  %535 = vst [vmem:[#allocation2 + $0x360] sm:$0x1] %v534_v45  ;;  %v543_v52 = vsel %vm9321_vm2, 0, %v542_v50  ;;  %v546_v53 = vsel %vm9321_vm2, 0, %v545_v51 }
 0x109   : > { %538 = vst [vmem:[#allocation2 + $0x378] sm:$0x1] %v537_v48  ;;  %541 = vst [vmem:[#allocation2 + $0x390] sm:$0x1] %v540_v49  ;;  %v549_v56 = vsel %vm9321_vm2, 0, %v548_v54  ;;  %v552_v57 = vsel %vm9321_vm2, 0, %v551_v55 }
 0x10a   : > { %544 = vst [vmem:[#allocation2 + $0x3d8] sm:$0x1] %v543_v52  ;;  %547 = vst [vmem:[#allocation2 + $0x3f0] sm:$0x1] %v546_v53  ;;  %v555_v61 = vsel %vm9321_vm2, 0, %v554_v58  ;;  %v558_v62 = vsel %vm9321_vm2, 0, %v557_v59 }
 0x10b   : > { %550 = vst [vmem:[#allocation2 + $0x408] sm:$0x1] %v549_v56  ;;  %553 = vst [vmem:[#allocation2 + $0x420] sm:$0x1] %v552_v57  ;;  %v561_v2 = vsel %vm9321_vm2, 0, %v560_v63  ;;  %v564_v3 = vsel %vm9321_vm2, 0, %v563_v0 }
 0x10c   : > { %556 = vst [vmem:[#allocation2 + $0x438] sm:$0x1] %v555_v61  ;;  %559 = vst [vmem:[#allocation2 + $0x450] sm:$0x1] %v558_v62  ;;  %v572_v5 = vld [vmem:[#allocation2 + $0x130] sm:$0x80] }
 0x10d   : > { %562 = vst [vmem:[#allocation2 + $0x468] sm:$0x1] %v561_v2  ;;  %565 = vst [vmem:[#allocation2 + $0x480] sm:$0x1] %v564_v3  ;;  %v570_v6 = vsel %vm9383_vm5, 0, %v569_v4  ;;  %v573_v7 = vsel %vm9383_vm5, 0, %v572_v5 }
 0x10e   : > { %v575_v8 = vld [vmem:[#allocation2 + $0x148] sm:$0x80]  ;;  %v578_v9 = vld [vmem:[#allocation2 + $0x160] sm:$0x80]  ;;  %571 = vst [vmem:[#allocation2 + $0x118] sm:$0x80] %v570_v6 }
 0x10f   : > { %574 = vst [vmem:[#allocation2 + $0x130] sm:$0x80] %v573_v7  ;;  %v576_v10 = vsel %vm9383_vm5, 0, %v575_v8  ;;  %v579_v1 = vsel %vm9383_vm5, 0, %v578_v9  ;;  %v581_v11 = vld [vmem:[#allocation2 + $0x178] sm:$0x80] }
 0x110   : > { %v584_v12 = vld [vmem:[#allocation2 + $0x190] sm:$0x80]  ;;  %577 = vst [vmem:[#allocation2 + $0x148] sm:$0x80] %v576_v10  ;;  %580 = vst [vmem:[#allocation2 + $0x160] sm:$0x80] %v579_v1 }
 0x111   : > { %v582_v13 = vsel %vm9383_vm5, 0, %v581_v11  ;;  %v585_v14 = vsel %vm9383_vm5, 0, %v584_v12  ;;  %v587_v15 = vld [vmem:[#allocation2 + $0x1a8] sm:$0x80]  ;;  %v590_v16 = vld [vmem:[#allocation2 + $0x1c0] sm:$0x80] }
 0x112   : > { %583 = vst [vmem:[#allocation2 + $0x178] sm:$0x80] %v582_v13  ;;  %586 = vst [vmem:[#allocation2 + $0x190] sm:$0x80] %v585_v14  ;;  %v588_v17 = vsel %vm9383_vm5, 0, %v587_v15  ;;  %v591_v18 = vsel %vm9383_vm5, 0, %v590_v16 }
 0x113   : > { %v593_v19 = vld [vmem:[#allocation2 + $0x208] sm:$0x80]  ;;  %v596_v20 = vld [vmem:[#allocation2 + $0x220] sm:$0x80]  ;;  %589 = vst [vmem:[#allocation2 + $0x1a8] sm:$0x80] %v588_v17 }
 0x114   : > { %592 = vst [vmem:[#allocation2 + $0x1c0] sm:$0x80] %v591_v18  ;;  %v594_v21 = vsel %vm9383_vm5, 0, %v593_v19  ;;  %v597_v22 = vsel %vm9383_vm5, 0, %v596_v20  ;;  %v599_v23 = vld [vmem:[#allocation2 + $0x238] sm:$0x80] }
 0x115   : > { %v602_v24 = vld [vmem:[#allocation2 + $0x250] sm:$0x80]  ;;  %595 = vst [vmem:[#allocation2 + $0x208] sm:$0x80] %v594_v21  ;;  %598 = vst [vmem:[#allocation2 + $0x220] sm:$0x80] %v597_v22 }
 0x116   : > { %v600_v25 = vsel %vm9383_vm5, 0, %v599_v23  ;;  %v603_v26 = vsel %vm9383_vm5, 0, %v602_v24  ;;  %v605_v27 = vld [vmem:[#allocation2 + $0x268] sm:$0x80]  ;;  %v608_v28 = vld [vmem:[#allocation2 + $0x280] sm:$0x80] }
 0x117   : > { %601 = vst [vmem:[#allocation2 + $0x238] sm:$0x80] %v600_v25  ;;  %604 = vst [vmem:[#allocation2 + $0x250] sm:$0x80] %v603_v26  ;;  %v606_v29 = vsel %vm9383_vm5, 0, %v605_v27  ;;  %v609_v30 = vsel %vm9383_vm5, 0, %v608_v28 }
 0x118   : > { %v611_v31 = vld [vmem:[#allocation2 + $0x298] sm:$0x80]  ;;  %v614_v32 = vld [vmem:[#allocation2 + $0x2b0] sm:$0x80]  ;;  %607 = vst [vmem:[#allocation2 + $0x268] sm:$0x80] %v606_v29 }
 0x119   : > { %610 = vst [vmem:[#allocation2 + $0x280] sm:$0x80] %v609_v30  ;;  %v612_v33 = vsel %vm9383_vm5, 0, %v611_v31  ;;  %v615_v34 = vsel %vm9383_vm5, 0, %v614_v32  ;;  %v617_v35 = vld [vmem:[#allocation2 + $0x2f8] sm:$0x80] }
 0x11a   : > { %v620_v36 = vld [vmem:[#allocation2 + $0x310] sm:$0x80]  ;;  %613 = vst [vmem:[#allocation2 + $0x298] sm:$0x80] %v612_v33  ;;  %616 = vst [vmem:[#allocation2 + $0x2b0] sm:$0x80] %v615_v34 }
 0x11b   : > { %v618_v37 = vsel %vm9383_vm5, 0, %v617_v35  ;;  %v621_v38 = vsel %vm9383_vm5, 0, %v620_v36  ;;  %v623_v39 = vld [vmem:[#allocation2 + $0x328] sm:$0x80]  ;;  %v626_v40 = vld [vmem:[#allocation2 + $0x340] sm:$0x80] }
 0x11c   : > { %619 = vst [vmem:[#allocation2 + $0x2f8] sm:$0x80] %v618_v37  ;;  %622 = vst [vmem:[#allocation2 + $0x310] sm:$0x80] %v621_v38  ;;  %v624_v41 = vsel %vm9383_vm5, 0, %v623_v39  ;;  %v627_v42 = vsel %vm9383_vm5, 0, %v626_v40 }
 0x11d   : > { %v629_v43 = vld [vmem:[#allocation2 + $0x358] sm:$0x80]  ;;  %v632_v44 = vld [vmem:[#allocation2 + $0x370] sm:$0x80]  ;;  %625 = vst [vmem:[#allocation2 + $0x328] sm:$0x80] %v624_v41 }
 0x11e   : > { %628 = vst [vmem:[#allocation2 + $0x340] sm:$0x80] %v627_v42  ;;  %v630_v45 = vsel %vm9383_vm5, 0, %v629_v43  ;;  %v633_v46 = vsel %vm9383_vm5, 0, %v632_v44  ;;  %v635_v47 = vld [vmem:[#allocation2 + $0x388] sm:$0x80] }
 0x11f   : > { %v638_v48 = vld [vmem:[#allocation2 + $0x3a0] sm:$0x80]  ;;  %631 = vst [vmem:[#allocation2 + $0x358] sm:$0x80] %v630_v45  ;;  %634 = vst [vmem:[#allocation2 + $0x370] sm:$0x80] %v633_v46 }
 0x120   : > { %v636_v49 = vsel %vm9383_vm5, 0, %v635_v47  ;;  %v639_v50 = vsel %vm9383_vm5, 0, %v638_v48  ;;  %v641_v51 = vld [vmem:[#allocation2 + $0x3e8] sm:$0x80]  ;;  %v644_v52 = vld [vmem:[#allocation2 + $0x400] sm:$0x80] }
 0x121   : > { %637 = vst [vmem:[#allocation2 + $0x388] sm:$0x80] %v636_v49  ;;  %640 = vst [vmem:[#allocation2 + $0x3a0] sm:$0x80] %v639_v50  ;;  %v642_v53 = vsel %vm9383_vm5, 0, %v641_v51  ;;  %v645_v54 = vsel %vm9383_vm5, 0, %v644_v52 }
 0x122   : > { %v647_v55 = vld [vmem:[#allocation2 + $0x418] sm:$0x80]  ;;  %v650_v56 = vld [vmem:[#allocation2 + $0x430] sm:$0x80]  ;;  %643 = vst [vmem:[#allocation2 + $0x3e8] sm:$0x80] %v642_v53 }
 0x123   : > { %646 = vst [vmem:[#allocation2 + $0x400] sm:$0x80] %v645_v54  ;;  %v648_v57 = vsel %vm9383_vm5, 0, %v647_v55  ;;  %v651_v58 = vsel %vm9383_vm5, 0, %v650_v56  ;;  %v653_v59 = vld [vmem:[#allocation2 + $0x448] sm:$0x80] }
 0x124   : > { %v656_v61 = vld [vmem:[#allocation2 + $0x460] sm:$0x80]  ;;  %649 = vst [vmem:[#allocation2 + $0x418] sm:$0x80] %v648_v57  ;;  %652 = vst [vmem:[#allocation2 + $0x430] sm:$0x80] %v651_v58 }
 0x125   : > { %v654_v62 = vsel %vm9383_vm5, 0, %v653_v59  ;;  %v657_v63 = vsel %vm9383_vm5, 0, %v656_v61  ;;  %v659_v0 = vld [vmem:[#allocation2 + $0x478] sm:$0x80]  ;;  %v662_v2 = vld [vmem:[#allocation2 + $0x490] sm:$0x80] }
 0x126   : > { %655 = vst [vmem:[#allocation2 + $0x448] sm:$0x80] %v654_v62  ;;  %658 = vst [vmem:[#allocation2 + $0x460] sm:$0x80] %v657_v63  ;;  %v660_v3 = vsel %vm9383_vm5, 0, %v659_v0  ;;  %v663_v4 = vsel %vm9383_vm5, 0, %v662_v2 }
 0x127   : > { %661 = vst [vmem:[#allocation2 + $0x478] sm:$0x80] %v660_v3  ;;  %664 = vst [vmem:[#allocation2 + $0x490] sm:$0x80] %v663_v4 }
 0x128 LB: >> { %v8310_v5 = vld [vmem:[#allocation6 + $0x40] sm:$0xff]   ;;  %v8314_v60 = vld [vmem:[#allocation6 + $0x48] sm:$0xff]   ;;  %v8318_v11 = vld [vmem:[#allocation6 + $0x50] sm:$0xff]   ;;  %s6748_s15 = sshll.u32 %s8894_s13, 9  ;;  %s6250_s17 = smul.u32 240, %s8894_s13  ;;  %vm1328_vm6 = vcmask 1047552   ;;  %s8894_s13 = sphi %s9463_s13, %s670_s13  }
 0x129   : >> { %v8311_v6 = vld [vmem:[#allocation6 + $0xc0] sm:$0xff]   ;;  %6753 = vmatprep.subr.bf16.mxu0 %v8310_v5  ;;  %v8315_v9 = vld [vmem:[#allocation6 + $0xc8] sm:$0xff]   ;;  %v8319_v12 = vld [vmem:[#allocation6 + $0xd0] sm:$0xff]   ;;  %s9470_s16 = scalar_lea.vmem %s9219_s23, %s6748_s15 [#allocation3]  ;;  %vm1329_vm7 = vsmask.f32 7938  ;;  %s670_s13 = sadd.s32 1, %s8894_s13  }
 0x12a   : >> { %v8312_v7 = vld [vmem:[#allocation6] sm:$0xff]   ;;  %6817 = vmatprep.subr.bf16.mxu1 %v8311_v6  ;;  %v8316_v10 = vld [vmem:[#allocation6 + $0x8] sm:$0xff]   ;;  %v8320_v13 = vld [vmem:[#allocation6 + $0x10] sm:$0xff]   ;;  %vm1379_vm8 = vsmask.f32 7424  ;;  %s9542_s19 = scalar_lea.vmem [#allocation2], %s6250_s17 }
 0x12b   : >> { %v8313_v8 = vld [vmem:[#allocation6 + $0x80] sm:$0xff]   ;;  %6754 = vmatpush3.bf16.msra.mxu0 %v8312_v7  ;;  %v8317_v1 = vld [vmem:[#allocation6 + $0x88] sm:$0xff]   ;;  %v8321_v14 = vld [vmem:[#allocation6 + $0x90] sm:$0xff]   ;;  %p667_p6 = scmp.ge.s32.totalorder %s670_s13, 4  }
 0x12c   : >> { %6818 = vmatpush3.bf16.msra.mxu1 %v8313_v8  ;;  %6755 = vmatprep.subr.bf16.mxu0 %v8314_v60  ;;  %v8322_v15 = vld [vmem:[#allocation6 + $0x58] sm:$0xff]   ;;  %v8326_v19 = vld [vmem:[#allocation6 + $0x60] sm:$0xff]   ;;  %v8330_v23 = vld [vmem:[#allocation6 + $0x68] sm:$0xff]   ;;  %s9642_s12 = smov (%p667_p6), 0  }
 0x12d   : >> { %6819 = vmatprep.subr.bf16.mxu1 %v8315_v9  ;;  %v8323_v16 = vld [vmem:[#allocation6 + $0xd8] sm:$0xff]   ;;  %v8327_v20 = vld [vmem:[#allocation6 + $0xe0] sm:$0xff]   ;;  %v8331_v24 = vld [vmem:[#allocation6 + $0xe8] sm:$0xff]  }
 0x12e   : >> { %v8324_v17 = vld [vmem:[#allocation6 + $0x18] sm:$0xff]   ;;  %v8328_v21 = vld [vmem:[#allocation6 + $0x20] sm:$0xff]   ;;  %v8332_v25 = vld [vmem:[#allocation6 + $0x28] sm:$0xff]  }
 0x12f   : >> { %6756 = vmatpush3.bf16.msra.mxu0 %v8316_v10  ;;  %v8325_v18 = vld [vmem:[#allocation6 + $0x98] sm:$0xff]   ;;  %v8329_v22 = vld [vmem:[#allocation6 + $0xa0] sm:$0xff]   ;;  %v8333_v26 = vld [vmem:[#allocation6 + $0xa8] sm:$0xff]  }
 0x130   : >> { %6820 = vmatpush3.bf16.msra.mxu1 %v8317_v1  ;;  %6757 = vmatprep.subr.bf16.mxu0 %v8318_v11  ;;  %v8334_v27 = vld [vmem:[#allocation6 + $0x70] sm:$0xff]   ;;  %v8338_v31 = vld [vmem:[#allocation6 + $0x78] sm:$0xff]   ;;  %v675_v35 = vld [vmem:[%s9470_s16 + $0x8] sm:$0xff] }
 0x131   : >> { %6821 = vmatprep.subr.bf16.mxu1 %v8319_v12  ;;  %v8335_v28 = vld [vmem:[#allocation6 + $0xf0] sm:$0xff]   ;;  %v8339_v32 = vld [vmem:[#allocation6 + $0xf8] sm:$0xff]   ;;  %v679_v36 = vld [vmem:[%s9470_s16 + $0x28] sm:$0xff] }
 0x132   : >> { %v8336_v29 = vld [vmem:[#allocation6 + $0x30] sm:$0xff]   ;;  %v8340_v33 = vld [vmem:[#allocation6 + $0x38] sm:$0xff]   ;;  %v739_v38 = vpack.c.bf16 %v679_v36, %v675_v35  ;;  %v674_v40 = vld [vmem:[%s9470_s16] sm:$0xff] }
 0x133   : >> { %6758 = vmatpush3.bf16.msra.mxu0 %v8320_v13  ;;  %v8337_v30 = vld [vmem:[#allocation6 + $0xb0] sm:$0xff]   ;;  %v8341_v34 = vld [vmem:[#allocation6 + $0xb8] sm:$0xff]   ;;  %v678_v41 = vld [vmem:[%s9470_s16 + $0x20] sm:$0xff] }
 0x134   : >> { %6822 = vmatpush3.bf16.msra.mxu1 %v8321_v14  ;;  %6759 = vmatprep.subr.bf16.mxu0 %v8322_v15  ;;  %v677_v37 = vld [vmem:[%s9470_s16 + $0x18] sm:$0xff]  ;;  %v738_v43 = vpack.c.bf16 %v678_v41, %v674_v40  ;;  %v676_v44 = vld [vmem:[%s9470_s16 + $0x10] sm:$0xff]  ;;  %v683_v46 = vld [vmem:[%s9470_s16 + $0x48] sm:$0xff] }
 0x135   : >> { %6823 = vmatprep.subr.bf16.mxu1 %v8323_v16  ;;  %v681_v39 = vld [vmem:[%s9470_s16 + $0x38] sm:$0xff]  ;;  %v680_v45 = vld [vmem:[%s9470_s16 + $0x30] sm:$0xff]  ;;  %1065 = vmatprep.mubr.bf16.mxu0 %v739_v38  ;;  %v687_v48 = vld [vmem:[%s9470_s16 + $0x68] sm:$0xff] }
 0x136   : >> { %v741_v42 = vpack.c.bf16 %v681_v39, %v677_v37  ;;  %v740_v47 = vpack.c.bf16 %v680_v45, %v676_v44  ;;  %v685_v49 = vld [vmem:[%s9470_s16 + $0x58] sm:$0xff]  ;;  %v743_v51 = vpack.c.bf16 %v687_v48, %v683_v46  ;;  %v682_v53 = vld [vmem:[%s9470_s16 + $0x40] sm:$0xff]  ;;  %v684_v55 = vld [vmem:[%s9470_s16 + $0x50] sm:$0xff] }
 0x137   : >> { %6760 = vmatpush3.bf16.msra.mxu0 %v8324_v17  ;;  %v689_v50 = vld [vmem:[%s9470_s16 + $0x78] sm:$0xff]  ;;  %v686_v54 = vld [vmem:[%s9470_s16 + $0x60] sm:$0xff]  ;;  %v688_v56 = vld [vmem:[%s9470_s16 + $0x70] sm:$0xff] }
 0x138   : >> { %6824 = vmatpush3.bf16.msra.mxu1 %v8325_v18  ;;  %6761 = vmatprep.subr.bf16.mxu0 %v8326_v19  ;;  %v745_v52 = vpack.c.bf16 %v689_v50, %v685_v49  ;;  %v691_v57 = vld [vmem:[%s9470_s16 + $0x88] sm:$0xff]  ;;  %v693_v59 = vld [vmem:[%s9470_s16 + $0x98] sm:$0xff]  ;;  %v742_v62 = vpack.c.bf16 %v686_v54, %v682_v53  ;;  %v744_v63 = vpack.c.bf16 %v688_v56, %v684_v55  ;;  %v690_v3 = vld [vmem:[%s9470_s16 + $0x80] sm:$0xff] }
 0x139   : >> { %6825 = vmatprep.subr.bf16.mxu1 %v8327_v20  ;;  %1162 = vmatprep.mubr.bf16.mxu1 %v741_v42  ;;  %v695_v58 = vld [vmem:[%s9470_s16 + $0xa8] sm:$0xff]  ;;  %v697_v61 = vld [vmem:[%s9470_s16 + $0xb8] sm:$0xff]  ;;  %v694_v4 = vld [vmem:[%s9470_s16 + $0xa0] sm:$0xff] }
 0x13a   : >> { %v747_v0 = vpack.c.bf16 %v695_v58, %v691_v57  ;;  %v749_v2 = vpack.c.bf16 %v697_v61, %v693_v59  ;;  %v692_v5 = vld [vmem:[%s9470_s16 + $0x90] sm:$0xff]  ;;  %v699_v7 = vld [vmem:[%s9470_s16 + $0xc8] sm:$0xff]  ;;  %v701_v60 = vld [vmem:[%s9470_s16 + $0xd8] sm:$0xff]  ;;  %v746_v10 = vpack.c.bf16 %v694_v4, %v690_v3 }
 0x13b   : >> { %6762 = vmatpush3.bf16.msra.mxu0 %v8328_v21  ;;  %v696_v6 = vld [vmem:[%s9470_s16 + $0xb0] sm:$0xff]  ;;  %v703_v8 = vld [vmem:[%s9470_s16 + $0xe8] sm:$0xff]  ;;  %v705_v9 = vld [vmem:[%s9470_s16 + $0xf8] sm:$0xff] }
 0x13c   : >> { %6826 = vmatpush3.bf16.msra.mxu1 %v8329_v22  ;;  %6763 = vmatprep.subr.bf16.mxu0 %v8330_v23  ;;  %v748_v1 = vpack.c.bf16 %v696_v6, %v692_v5  ;;  %v751_v11 = vpack.c.bf16 %v703_v8, %v699_v7  ;;  %v753_v12 = vpack.c.bf16 %v705_v9, %v701_v60  ;;  %v698_v13 = vld [vmem:[%s9470_s16 + $0xc0] sm:$0xff]  ;;  %v700_v15 = vld [vmem:[%s9470_s16 + $0xd0] sm:$0xff]  ;;  %v707_v17 = vld [vmem:[%s9470_s16 + $0x108] sm:$0xff] }
 0x13d   : >> { %6827 = vmatprep.subr.bf16.mxu1 %v8331_v24  ;;  %v702_v14 = vld [vmem:[%s9470_s16 + $0xe0] sm:$0xff]  ;;  %v704_v16 = vld [vmem:[%s9470_s16 + $0xf0] sm:$0xff]  ;;  %v711_v18 = vld [vmem:[%s9470_s16 + $0x128] sm:$0xff] }
 0x13e   : >> { %v709_v19 = vld [vmem:[%s9470_s16 + $0x118] sm:$0xff]  ;;  %v750_v21 = vpack.c.bf16 %v702_v14, %v698_v13  ;;  %v752_v22 = vpack.c.bf16 %v704_v16, %v700_v15  ;;  %v755_v23 = vpack.c.bf16 %v711_v18, %v707_v17  ;;  %v714_v37 = vld [vmem:[%s9470_s16 + $0x140] sm:$0xff]  ;;  %v716_v39 = vld [vmem:[%s9470_s16 + $0x150] sm:$0xff] }
 0x13f   : >> { %6764 = vmatpush3.bf16.msra.mxu0 %v8332_v25  ;;  %v713_v20 = vld [vmem:[%s9470_s16 + $0x138] sm:$0xff]  ;;  %v706_v25 = vld [vmem:[%s9470_s16 + $0x100] sm:$0xff]  ;;  %v720_v40 = vld [vmem:[%s9470_s16 + $0x170] sm:$0xff] }
 0x140   : >> { %6828 = vmatpush3.bf16.msra.mxu1 %v8333_v26  ;;  %6765 = vmatprep.subr.bf16.mxu0 %v8334_v27  ;;  %v757_v24 = vpack.c.bf16 %v713_v20, %v709_v19  ;;  %v710_v26 = vld [vmem:[%s9470_s16 + $0x120] sm:$0xff]  ;;  %v708_v27 = vld [vmem:[%s9470_s16 + $0x110] sm:$0xff]  ;;  %v723_v41 = vld [vmem:[%s9470_s16 + $0x188] sm:$0xff]  ;;  %v760_v46 = vpack.c.bf16 %v720_v40, %v716_v39 }
 0x141   : >> { %6829 = vmatprep.subr.bf16.mxu1 %v8335_v28  ;;  %v712_v28 = vld [vmem:[%s9470_s16 + $0x130] sm:$0xff]  ;;  %v718_v38 = vld [vmem:[%s9470_s16 + $0x160] sm:$0xff]  ;;  %v727_v42 = vld [vmem:[%s9470_s16 + $0x1a8] sm:$0xff] }
 0x142   : >> { %v729_v44 = vld [vmem:[%s9470_s16 + $0x1b8] sm:$0xff]  ;;  %v758_v45 = vpack.c.bf16 %v718_v38, %v714_v37  ;;  %v722_v49 = vld [vmem:[%s9470_s16 + $0x180] sm:$0xff]  ;;  %v731_v53 = vld [vmem:[%s9470_s16 + $0x1c8] sm:$0xff] }
 0x143   : >> { %6766 = vmatpush3.bf16.msra.mxu0 %v8336_v29  ;;  %v715_v29 = vld [vmem:[%s9470_s16 + $0x148] sm:$0xff]  ;;  %v726_v50 = vld [vmem:[%s9470_s16 + $0x1a0] sm:$0xff]  ;;  %v733_v55 = vld [vmem:[%s9470_s16 + $0x1d8] sm:$0xff] }
 0x144   : >> { %6830 = vmatpush3.bf16.msra.mxu1 %v8337_v30  ;;  %6767 = vmatprep.subr.bf16.mxu0 %v8338_v31  ;;  %v719_v30 = vld [vmem:[%s9470_s16 + $0x168] sm:$0xff]  ;;  %v717_v31 = vld [vmem:[%s9470_s16 + $0x158] sm:$0xff]  ;;  %v762_v57 = vpack.c.bf16 %v726_v50, %v722_v49  ;;  %v9536_v7 = vld [vmem:[#allocation8] ss:$0 sm:$0xff] }
 0x145   : >> { %6831 = vmatprep.subr.bf16.mxu1 %v8339_v32  ;;  %v721_v32 = vld [vmem:[%s9470_s16 + $0x178] sm:$0xff]  ;;  %v759_v35 = vpack.c.bf16 %v719_v30, %v715_v29  ;;  %v735_v54 = vld [vmem:[%s9470_s16 + $0x1e8] sm:$0xff]  ;;  %vm9547_vm9 = vmand %vm1328_vm6, %vm1329_vm7 }
 0x146   : >> { %v761_v36 = vpack.c.bf16 %v721_v32, %v717_v31  ;;  %v737_v56 = vld [vmem:[%s9470_s16 + $0x1f8] sm:$0xff]  ;;  %v767_v59 = vpack.c.bf16 %v735_v54, %v731_v53  ;;  %vm9553_vm10 = vmand %vm1328_vm6, %vm1379_vm8 }
 0x147   : >> { %6768 = vmatpush3.bf16.msra.mxu0 %v8340_v33  ;;  %v754_v33 = vpack.c.bf16 %v710_v26, %v706_v25  ;;  %v769_v61 = vpack.c.bf16 %v737_v56, %v733_v55 }
 0x148   : >> { %6832 = vmatpush3.bf16.msra.mxu1 %v8341_v34  ;;  %v756_v34 = vpack.c.bf16 %v712_v28, %v708_v27 }
 0x14a   : >> { %1066 = vmatmul.mubr.bf16.vlgmr.msra.gmra.mrb[0].mxu0 %v738_v43  ;;  %v725_v43 = vld [vmem:[%s9470_s16 + $0x198] sm:$0xff] }
 0x14b   : >> { %1163 = vmatmul.mubr.bf16.vlgmr.msra.gmra.mrb[0].mxu1 %v740_v47  ;;  %1073 = vmatprep.mubr.bf16.mxu0 %v743_v51  ;;  %v763_v47 = vpack.c.bf16 %v727_v42, %v723_v41  ;;  %v765_v48 = vpack.c.bf16 %v729_v44, %v725_v43  ;;  %v724_v51 = vld [vmem:[%s9470_s16 + $0x190] sm:$0xff] }
 0x14c   : >> { %1170 = vmatprep.mubr.bf16.mxu1 %v745_v52  ;;  %v728_v52 = vld [vmem:[%s9470_s16 + $0x1b0] sm:$0xff] }
 0x14d   : >> { %v764_v58 = vpack.c.bf16 %v728_v52, %v724_v51 }
 0x152   : >> { %1074 = vmatmul.mubr.bf16.gmra.mrb[4].mxu0 %v742_v62  ;;  %v730_v62 = vld [vmem:[%s9470_s16 + $0x1c0] sm:$0xff] }
 0x153   : >> { %1171 = vmatmul.mubr.bf16.gmra.mrb[4].mxu1 %v744_v63  ;;  %1081 = vmatprep.mubr.bf16.mxu0 %v747_v0  ;;  %v734_v63 = vld [vmem:[%s9470_s16 + $0x1e0] sm:$0xff]  ;;  %v732_v0 = vld [vmem:[%s9470_s16 + $0x1d0] sm:$0xff] }
 0x154   : >> { %1178 = vmatprep.mubr.bf16.mxu1 %v749_v2  ;;  %v736_v2 = vld [vmem:[%s9470_s16 + $0x1f0] sm:$0xff]  ;;  %v766_v3 = vpack.c.bf16 %v734_v63, %v730_v62 }
 0x155   : >> { %v768_v4 = vpack.c.bf16 %v736_v2, %v732_v0 }
 0x15a   : >> { %1082 = vmatmul.mubr.bf16.gmra.mrb[8].mxu0 %v746_v10 }
 0x15b   : >> { %1179 = vmatmul.mubr.bf16.gmra.mrb[8].mxu1 %v748_v1  ;;  %1089 = vmatprep.mubr.bf16.mxu0 %v751_v11 }
 0x15c   : >> { %1186 = vmatprep.mubr.bf16.mxu1 %v753_v12 }
 0x162   : >> { %1090 = vmatmul.mubr.bf16.gmra.mrb[12].mxu0 %v750_v21 }
 0x163   : >> { %1187 = vmatmul.mubr.bf16.gmra.mrb[12].mxu1 %v752_v22  ;;  %1097 = vmatprep.mubr.bf16.mxu0 %v755_v23 }
 0x164   : >> { %1194 = vmatprep.mubr.bf16.mxu1 %v757_v24 }
 0x16a   : >> { %1098 = vmatmul.mubr.bf16.gmra.mrb[16].mxu0 %v754_v33 }
 0x16b   : >> { %1195 = vmatmul.mubr.bf16.gmra.mrb[16].mxu1 %v756_v34  ;;  %1105 = vmatprep.mubr.bf16.mxu0 %v759_v35 }
 0x16c   : >> { %1202 = vmatprep.mubr.bf16.mxu1 %v761_v36 }
 0x172   : >> { %1106 = vmatmul.mubr.bf16.gmra.mrb[20].mxu0 %v758_v45  ;;  %v6259_v45 = vld [vmem:[%s9542_s19 + $0x108] sm:$0xff] }
 0x173   : >> { %1203 = vmatmul.mubr.bf16.gmra.mrb[20].mxu1 %v760_v46  ;;  %1113 = vmatprep.mubr.bf16.mxu0 %v763_v47  ;;  %v6275_v47 = vld [vmem:[%s9542_s19 + $0x118] sm:$0xff] }
 0x174   : >> { %1210 = vmatprep.mubr.bf16.mxu1 %v765_v48 }
 0x17a   : >> { %1114 = vmatmul.mubr.bf16.gmra.mrb[24].mxu0 %v762_v57 }
 0x17b   : >> { %1211 = vmatmul.mubr.bf16.gmra.mrb[24].mxu1 %v764_v58  ;;  %1121 = vmatprep.mubr.bf16.mxu0 %v767_v59 }
 0x17c   : >> { %1218 = vmatprep.mubr.bf16.mxu1 %v769_v61 }
 0x182   : >> { %1122 = vmatmul.mubr.bf16.gmra.mrb[28].mxu0 %v766_v3 }
 0x183   : >> { %1219 = vmatmul.mubr.bf16.gmra.mrb[28].mxu1 %v768_v4 }
 0x21d   : >> { %v6769_v5 = vpop.f32.mrb[0].mxu0 }
 0x21e   : >> { %v6833_v6 = vpop.f32.mrb[0].mxu1  ;;  %v6770_v8 = vpop.f32.mrb[1].mxu0 }
 0x21f   : >> { %v6771_v60 = vadd.f32 %v6770_v8, %v6769_v5  ;;  %v6834_v9 = vpop.f32.mrb[1].mxu1  ;;  %v6772_v10 = vpop.f32.mrb[2].mxu0 }
 0x220   : >> { %v6835_v1 = vadd.f32 %v6834_v9, %v6833_v6  ;;  %v6836_v11 = vpop.f32.mrb[2].mxu1  ;;  %v6773_v12 = vpop.f32.mrb[3].mxu0 }
 0x221   : >> { %v1068_v13 = vadd.f32 %v6771_v60, %v9536_v7  ;;  %v6774_v14 = vadd.f32 %v6773_v12, %v6772_v10  ;;  %v6837_v15 = vpop.f32.mrb[3].mxu1  ;;  %v6277_v12 = vld [vmem:[%s9542_s19 + $0x130] sm:$0xff] }
 0x222   : >> { %v6838_v16 = vadd.f32 %v6837_v15, %v6836_v11  ;;  %v6261_v11 = vld [vmem:[%s9542_s19 + $0x120] sm:$0xff] }
 0x223   : >> { %v1165_v17 = vadd.f32 %v6835_v1, %v1068_v13  ;;  %v1071_v18 = vadd.f32 %v6774_v14, %v9536_v7 }
 0x225   : >> { %v1168_v19 = vadd.f32 %v6838_v16, %v1071_v18  ;;  %v6775_v20 = vpop.f32.mrb[4].mxu0  ;;  %v1227_v23 = vmax.f32 %v1165_v17, 0.0 }
 0x226   : >> { %v6839_v21 = vpop.f32.mrb[4].mxu1  ;;  %v6776_v22 = vpop.f32.mrb[5].mxu0 }
 0x227   : >> { %v1228_v24 = vmax.f32 %v1168_v19, 0.0  ;;  %v6777_v25 = vadd.f32 %v6776_v22, %v6775_v20  ;;  %v6840_v26 = vpop.f32.mrb[5].mxu1  ;;  %v6778_v27 = vpop.f32.mrb[6].mxu0 }
 0x228   : >> { %v6841_v28 = vadd.f32 %v6840_v26, %v6839_v21  ;;  %v6842_v29 = vpop.f32.mrb[6].mxu1  ;;  %v6779_v30 = vpop.f32.mrb[7].mxu0 }
 0x229   : >> { %v1243_v31 = vpack.c.bf16 %v1228_v24, %v1227_v23  ;;  %v1076_v32 = vadd.f32 %v6777_v25, %v9536_v7  ;;  %v6780_v33 = vadd.f32 %v6779_v30, %v6778_v27  ;;  %v6843_v34 = vpop.f32.mrb[7].mxu1 }
 0x22a   : >> { %v6844_v35 = vadd.f32 %v6843_v34, %v6842_v29 }
 0x22b   : >> { %6251 = vst [vmem:[%s9542_s19 + $0x110] sm:$0xff] %v1243_v31  ;;  %v1265_v36 = vshrl.u32 %v1243_v31, 16  ;;  %v1268_v37 = vshll.u32 %v1243_v31, 16  ;;  %v1173_v38 = vadd.f32 %v6841_v28, %v1076_v32  ;;  %v1079_v39 = vadd.f32 %v6780_v33, %v9536_v7 }
 0x22d   : >> { %v1267_v40 = vrot.slane %v1265_v36, 7  ;;  %v1355_v42 = vrot.slane %v1268_v37, 1  ;;  %v1176_v43 = vadd.f32 %v6844_v35, %v1079_v39  ;;  %v6781_v44 = vpop.f32.mrb[8].mxu0  ;;  %v1229_v48 = vmax.f32 %v1173_v38, 0.0 }
 0x22e   : >> { %v6845_v49 = vpop.f32.mrb[8].mxu1  ;;  %v6782_v50 = vpop.f32.mrb[9].mxu0 }
 0x22f   : >> { %v1270_v51 = vor.u32 %v1268_v37, %v1267_v40  ;;  %v1356_v52 = vor.u32 %v1355_v42, %v1265_v36  ;;  %v1230_v53 = vmax.f32 %v1176_v43, 0.0  ;;  %v6783_v54 = vadd.f32 %v6782_v50, %v6781_v44  ;;  %v6846_v55 = vpop.f32.mrb[9].mxu1  ;;  %v6784_v56 = vpop.f32.mrb[10].mxu0  ;;  %v6263_v44 = vld [vmem:[%s9542_s19 + $0x138] sm:$0xff] }
 0x230   : >> { %v6847_v57 = vadd.f32 %v6846_v55, %v6845_v49  ;;  %v6848_v58 = vpop.f32.mrb[10].mxu1  ;;  %v6785_v59 = vpop.f32.mrb[11].mxu0 }
 0x231   : >> { %v1332_v61 = vsel %vm9547_vm9, %v1270_v51, %v6259_v45  ;;  %v1382_v62 = vsel %vm9553_vm10, %v1356_v52, %v6275_v47  ;;  %v1244_v63 = vpack.c.bf16 %v1230_v53, %v1229_v48  ;;  %v1084_v0 = vadd.f32 %v6783_v54, %v9536_v7  ;;  %v6849_v2 = vpop.f32.mrb[11].mxu1  ;;  %v6279_v45 = vld [vmem:[%s9542_s19 + $0x148] sm:$0xff] }
 0x232   : >> { %6260 = vst [vmem:[%s9542_s19 + $0x108] sm:$0xff] %v1332_v61  ;;  %6276 = vst [vmem:[%s9542_s19 + $0x118] sm:$0xff] %v1382_v62  ;;  %v6786_v3 = vadd.f32 %v6785_v59, %v6784_v56  ;;  %v6850_v4 = vadd.f32 %v6849_v2, %v6848_v58 }
 0x233   : >> { %6252 = vst [vmem:[%s9542_s19 + $0x128] sm:$0xff] %v1244_v63  ;;  %v1272_v5 = vshrl.u32 %v1244_v63, 16  ;;  %v1275_v6 = vshll.u32 %v1244_v63, 16  ;;  %v1181_v8 = vadd.f32 %v6847_v57, %v1084_v0 }
 0x234   : >> { %v1087_v60 = vadd.f32 %v6786_v3, %v9536_v7 }
 0x235   : >> { %v1274_v9 = vrot.slane %v1272_v5, 7  ;;  %v1357_v10 = vrot.slane %v1275_v6, 1  ;;  %v6787_v1 = vpop.f32.mrb[12].mxu0  ;;  %v1231_v21 = vmax.f32 %v1181_v8, 0.0 }
 0x236   : >> { %v1184_v13 = vadd.f32 %v6850_v4, %v1087_v60  ;;  %v6851_v14 = vpop.f32.mrb[12].mxu1  ;;  %v6788_v15 = vpop.f32.mrb[13].mxu0 }
 0x237   : >> { %v1277_v16 = vor.u32 %v1275_v6, %v1274_v9  ;;  %v1358_v17 = vor.u32 %v1357_v10, %v1272_v5  ;;  %v6789_v18 = vadd.f32 %v6788_v15, %v6787_v1  ;;  %v6852_v19 = vpop.f32.mrb[13].mxu1  ;;  %v6790_v20 = vpop.f32.mrb[14].mxu0  ;;  %v6265_v10 = vld [vmem:[%s9542_s19 + $0x150] sm:$0xff]  ;;  %v6281_v1 = vld [vmem:[%s9542_s19 + $0x160] sm:$0xff] }
 0x238   : >> { %v1232_v22 = vmax.f32 %v1184_v13, 0.0  ;;  %v6853_v23 = vadd.f32 %v6852_v19, %v6851_v14  ;;  %v6854_v24 = vpop.f32.mrb[14].mxu1  ;;  %v6791_v25 = vpop.f32.mrb[15].mxu0 }
 0x239   : >> { %v1335_v26 = vsel %vm9547_vm9, %v1277_v16, %v6261_v11  ;;  %v1385_v27 = vsel %vm9553_vm10, %v1358_v17, %v6277_v12  ;;  %v1092_v28 = vadd.f32 %v6789_v18, %v9536_v7  ;;  %v6792_v29 = vadd.f32 %v6791_v25, %v6790_v20  ;;  %v6855_v30 = vpop.f32.mrb[15].mxu1 }
 0x23a   : >> { %6262 = vst [vmem:[%s9542_s19 + $0x120] sm:$0xff] %v1335_v26  ;;  %6278 = vst [vmem:[%s9542_s19 + $0x130] sm:$0xff] %v1385_v27  ;;  %v1245_v31 = vpack.c.bf16 %v1232_v22, %v1231_v21  ;;  %v6856_v32 = vadd.f32 %v6855_v30, %v6854_v24 }
 0x23b   : >> { %v1189_v33 = vadd.f32 %v6853_v23, %v1092_v28  ;;  %v1095_v34 = vadd.f32 %v6792_v29, %v9536_v7 }
 0x23c   : >> { %6253 = vst [vmem:[%s9542_s19 + $0x140] sm:$0xff] %v1245_v31  ;;  %v1279_v35 = vshrl.u32 %v1245_v31, 16  ;;  %v1282_v36 = vshll.u32 %v1245_v31, 16 }
 0x23d   : >> { %v1192_v37 = vadd.f32 %v6856_v32, %v1095_v34  ;;  %v6793_v38 = vpop.f32.mrb[16].mxu0  ;;  %v1233_v47 = vmax.f32 %v1189_v33, 0.0 }
 0x23e   : >> { %v1281_v39 = vrot.slane %v1279_v35, 7  ;;  %v1359_v40 = vrot.slane %v1282_v36, 1  ;;  %v6857_v42 = vpop.f32.mrb[16].mxu1  ;;  %v6794_v43 = vpop.f32.mrb[17].mxu0 }
 0x23f   : >> { %v1234_v48 = vmax.f32 %v1192_v37, 0.0  ;;  %v6795_v49 = vadd.f32 %v6794_v43, %v6793_v38  ;;  %v6858_v50 = vpop.f32.mrb[17].mxu1  ;;  %v6796_v51 = vpop.f32.mrb[18].mxu0  ;;  %v6267_v37 = vld [vmem:[%s9542_s19 + $0x168] sm:$0xff]  ;;  %v6283_v38 = vld [vmem:[%s9542_s19 + $0x178] sm:$0xff] }
 0x240   : >> { %v1284_v52 = vor.u32 %v1282_v36, %v1281_v39  ;;  %v1360_v53 = vor.u32 %v1359_v40, %v1279_v35  ;;  %v6859_v54 = vadd.f32 %v6858_v50, %v6857_v42  ;;  %v6860_v55 = vpop.f32.mrb[18].mxu1  ;;  %v6797_v56 = vpop.f32.mrb[19].mxu0 }
 0x241   : >> { %v1246_v57 = vpack.c.bf16 %v1234_v48, %v1233_v47  ;;  %v1100_v58 = vadd.f32 %v6795_v49, %v9536_v7  ;;  %v6798_v59 = vadd.f32 %v6797_v56, %v6796_v51  ;;  %v6861_v61 = vpop.f32.mrb[19].mxu1 }
 0x242   : >> { %v1338_v62 = vsel %vm9547_vm9, %v1284_v52, %v6263_v44  ;;  %v1388_v63 = vsel %vm9553_vm10, %v1360_v53, %v6279_v45  ;;  %v6862_v0 = vadd.f32 %v6861_v61, %v6860_v55 }
 0x243   : >> { %6264 = vst [vmem:[%s9542_s19 + $0x138] sm:$0xff] %v1338_v62  ;;  %6280 = vst [vmem:[%s9542_s19 + $0x148] sm:$0xff] %v1388_v63  ;;  %v1286_v2 = vshrl.u32 %v1246_v57, 16  ;;  %v1289_v3 = vshll.u32 %v1246_v57, 16  ;;  %v1197_v4 = vadd.f32 %v6859_v54, %v1100_v58  ;;  %v1103_v5 = vadd.f32 %v6798_v59, %v9536_v7 }
 0x244   : >> { %6254 = vst [vmem:[%s9542_s19 + $0x158] sm:$0xff] %v1246_v57 }
 0x245   : >> { %v1288_v6 = vrot.slane %v1286_v2, 7  ;;  %v1361_v8 = vrot.slane %v1289_v3, 1  ;;  %v1200_v60 = vadd.f32 %v6862_v0, %v1103_v5  ;;  %v6799_v9 = vpop.f32.mrb[20].mxu0  ;;  %v1235_v11 = vmax.f32 %v1197_v4, 0.0 }
 0x246   : >> { %v6863_v12 = vpop.f32.mrb[20].mxu1  ;;  %v6800_v13 = vpop.f32.mrb[21].mxu0 }
 0x247   : >> { %v1291_v14 = vor.u32 %v1289_v3, %v1288_v6  ;;  %v1362_v15 = vor.u32 %v1361_v8, %v1286_v2  ;;  %v1236_v16 = vmax.f32 %v1200_v60, 0.0  ;;  %v6801_v17 = vadd.f32 %v6800_v13, %v6799_v9  ;;  %v6864_v18 = vpop.f32.mrb[21].mxu1  ;;  %v6802_v19 = vpop.f32.mrb[22].mxu0  ;;  %v6269_v9 = vld [vmem:[%s9542_s19 + $0x180] sm:$0xff] }
 0x248   : >> { %v6865_v20 = vadd.f32 %v6864_v18, %v6863_v12  ;;  %v6866_v21 = vpop.f32.mrb[22].mxu1  ;;  %v6803_v22 = vpop.f32.mrb[23].mxu0 }
 0x249   : >> { %v1341_v23 = vsel %vm9547_vm9, %v1291_v14, %v6265_v10  ;;  %v1391_v24 = vsel %vm9553_vm10, %v1362_v15, %v6281_v1  ;;  %v1247_v25 = vpack.c.bf16 %v1236_v16, %v1235_v11  ;;  %v1108_v26 = vadd.f32 %v6801_v17, %v9536_v7  ;;  %v6867_v27 = vpop.f32.mrb[23].mxu1  ;;  %v6285_v10 = vld [vmem:[%s9542_s19 + $0x190] sm:$0xff] }
 0x24a   : >> { %6266 = vst [vmem:[%s9542_s19 + $0x150] sm:$0xff] %v1341_v23  ;;  %6282 = vst [vmem:[%s9542_s19 + $0x160] sm:$0xff] %v1391_v24  ;;  %v6804_v28 = vadd.f32 %v6803_v22, %v6802_v19  ;;  %v6868_v29 = vadd.f32 %v6867_v27, %v6866_v21 }
 0x24b   : >> { %6255 = vst [vmem:[%s9542_s19 + $0x170] sm:$0xff] %v1247_v25  ;;  %v1293_v30 = vshrl.u32 %v1247_v25, 16  ;;  %v1296_v31 = vshll.u32 %v1247_v25, 16  ;;  %v1205_v32 = vadd.f32 %v6865_v20, %v1108_v26 }
 0x24c   : >> { %v1111_v33 = vadd.f32 %v6804_v28, %v9536_v7 }
 0x24d   : >> { %v1295_v34 = vrot.slane %v1293_v30, 7  ;;  %v1363_v35 = vrot.slane %v1296_v31, 1  ;;  %v6805_v36 = vpop.f32.mrb[24].mxu0  ;;  %v1237_v49 = vmax.f32 %v1205_v32, 0.0 }
 0x24e   : >> { %v1208_v39 = vadd.f32 %v6868_v29, %v1111_v33  ;;  %v6869_v40 = vpop.f32.mrb[24].mxu1  ;;  %v6806_v42 = vpop.f32.mrb[25].mxu0 }
 0x24f   : >> { %v1298_v43 = vor.u32 %v1296_v31, %v1295_v34  ;;  %v1364_v44 = vor.u32 %v1363_v35, %v1293_v30  ;;  %v6807_v45 = vadd.f32 %v6806_v42, %v6805_v36  ;;  %v6870_v47 = vpop.f32.mrb[25].mxu1  ;;  %v6808_v48 = vpop.f32.mrb[26].mxu0  ;;  %v6271_v34 = vld [vmem:[%s9542_s19 + $0x198] sm:$0xff]  ;;  %v6287_v35 = vld [vmem:[%s9542_s19 + $0x1a8] sm:$0xff] }
 0x250   : >> { %v1238_v50 = vmax.f32 %v1208_v39, 0.0  ;;  %v6871_v51 = vadd.f32 %v6870_v47, %v6869_v40  ;;  %v6872_v52 = vpop.f32.mrb[26].mxu1  ;;  %v6809_v53 = vpop.f32.mrb[27].mxu0 }
 0x251   : >> { %v1344_v54 = vsel %vm9547_vm9, %v1298_v43, %v6267_v37  ;;  %v1394_v55 = vsel %vm9553_vm10, %v1364_v44, %v6283_v38  ;;  %v1116_v56 = vadd.f32 %v6807_v45, %v9536_v7  ;;  %v6810_v57 = vadd.f32 %v6809_v53, %v6808_v48  ;;  %v6873_v58 = vpop.f32.mrb[27].mxu1  ;;  %v6273_v48 = vld [vmem:[%s9542_s19 + $0x1b0] sm:$0xff] }
 0x252   : >> { %6268 = vst [vmem:[%s9542_s19 + $0x168] sm:$0xff] %v1344_v54  ;;  %6284 = vst [vmem:[%s9542_s19 + $0x178] sm:$0xff] %v1394_v55  ;;  %v1248_v59 = vpack.c.bf16 %v1238_v50, %v1237_v49  ;;  %v6874_v61 = vadd.f32 %v6873_v58, %v6872_v52  ;;  %v6289_v49 = vld [vmem:[%s9542_s19 + $0x1c0] sm:$0xff] }
 0x253   : >> { %v1213_v62 = vadd.f32 %v6871_v51, %v1116_v56  ;;  %v1119_v63 = vadd.f32 %v6810_v57, %v9536_v7 }
 0x254   : >> { %6256 = vst [vmem:[%s9542_s19 + $0x188] sm:$0xff] %v1248_v59  ;;  %v1300_v0 = vshrl.u32 %v1248_v59, 16  ;;  %v1303_v2 = vshll.u32 %v1248_v59, 16 }
 0x255   : >> { %v1216_v3 = vadd.f32 %v6874_v61, %v1119_v63  ;;  %v6811_v4 = vpop.f32.mrb[28].mxu0  ;;  %v1239_v1 = vmax.f32 %v1213_v62, 0.0 }
 0x256   : >> { %v1302_v5 = vrot.slane %v1300_v0, 7  ;;  %v1365_v6 = vrot.slane %v1303_v2, 1  ;;  %v6875_v8 = vpop.f32.mrb[28].mxu1  ;;  %v6812_v60 = vpop.f32.mrb[29].mxu0 }
 0x257   : >> { %v1240_v11 = vmax.f32 %v1216_v3, 0.0  ;;  %v6813_v12 = vadd.f32 %v6812_v60, %v6811_v4  ;;  %v6876_v13 = vpop.f32.mrb[29].mxu1  ;;  %v6814_v14 = vpop.f32.mrb[30].mxu0 }
 0x258   : >> { %v1305_v15 = vor.u32 %v1303_v2, %v1302_v5  ;;  %v1366_v16 = vor.u32 %v1365_v6, %v1300_v0  ;;  %v6877_v17 = vadd.f32 %v6876_v13, %v6875_v8  ;;  %v6878_v18 = vpop.f32.mrb[30].mxu1  ;;  %v6815_v19 = vpop.f32.mrb[31].mxu0 }
 0x259   : >> { %v1249_v20 = vpack.c.bf16 %v1240_v11, %v1239_v1  ;;  %v1124_v21 = vadd.f32 %v6813_v12, %v9536_v7  ;;  %v6816_v22 = vadd.f32 %v6815_v19, %v6814_v14  ;;  %v6879_v23 = vpop.f32.mrb[31].mxu1 }
 0x25a   : >> { %v1347_v24 = vsel %vm9547_vm9, %v1305_v15, %v6269_v9  ;;  %v1397_v25 = vsel %vm9553_vm10, %v1366_v16, %v6285_v10  ;;  %v6880_v26 = vadd.f32 %v6879_v23, %v6878_v18 }
 0x25b   : >> { %6270 = vst [vmem:[%s9542_s19 + $0x180] sm:$0xff] %v1347_v24  ;;  %6286 = vst [vmem:[%s9542_s19 + $0x190] sm:$0xff] %v1397_v25  ;;  %v1307_v27 = vshrl.u32 %v1249_v20, 16  ;;  %v1310_v28 = vshll.u32 %v1249_v20, 16  ;;  %v1221_v29 = vadd.f32 %v6877_v17, %v1124_v21  ;;  %v1127_v30 = vadd.f32 %v6816_v22, %v9536_v7 }
 0x25c   : >> { %6257 = vst [vmem:[%s9542_s19 + $0x1a0] sm:$0xff] %v1249_v20 }
 0x25d   : >> { %v1309_v31 = vrot.slane %v1307_v27, 7  ;;  %v1367_v32 = vrot.slane %v1310_v28, 1  ;;  %v1224_v33 = vadd.f32 %v6880_v26, %v1127_v30  ;;  %v1241_v38 = vmax.f32 %v1221_v29, 0.0 }
 0x25f   : >> { %v1312_v36 = vor.u32 %v1310_v28, %v1309_v31  ;;  %v1368_v37 = vor.u32 %v1367_v32, %v1307_v27  ;;  %v1242_v39 = vmax.f32 %v1224_v33, 0.0 }
 0x261   : >> { %v1350_v40 = vsel %vm9547_vm9, %v1312_v36, %v6271_v34  ;;  %v1400_v42 = vsel %vm9553_vm10, %v1368_v37, %v6287_v35  ;;  %v1250_v7 = vpack.c.bf16 %v1242_v39, %v1241_v38 }
 0x262   : >> { %6272 = vst [vmem:[%s9542_s19 + $0x198] sm:$0xff] %v1350_v40  ;;  %6288 = vst [vmem:[%s9542_s19 + $0x1a8] sm:$0xff] %v1400_v42 }
 0x263   : >> { %6258 = vst [vmem:[%s9542_s19 + $0x1b8] sm:$0xff] %v1250_v7  ;;  %v1314_v43 = vshrl.u32 %v1250_v7, 16  ;;  %v1317_v44 = vshll.u32 %v1250_v7, 16 }
 0x264   : > { %669 = sbr.rel (!%p667_p6) target bundleno = 296 (0x128), region = 156 }
 0x265   : >> { %v1316_v45 = vrot.slane %v1314_v43, 7  ;;  %v1369_v47 = vrot.slane %v1317_v44, 1 }
 0x267   : >> { %v1319_v50 = vor.u32 %v1317_v44, %v1316_v45  ;;  %v1370_v51 = vor.u32 %v1369_v47, %v1314_v43 }
 0x269   : >> { %v1353_v52 = vsel %vm9547_vm9, %v1319_v50, %v6273_v48  ;;  %v1403_v53 = vsel %vm9553_vm10, %v1370_v51, %v6289_v49 }
 0x26a   : >> { %6274 = vst [vmem:[%s9542_s19 + $0x1b0] sm:$0xff] %v1353_v52  ;;  %6290 = vst [vmem:[%s9542_s19 + $0x1c0] sm:$0xff] %v1403_v53 }
 0x26b LB: >> { %v8342_v41 = vld [vmem:[#allocation9 + $0x100] sm:$0xff]   ;;  %v8345_v55 = vld [vmem:[#allocation9 + $0x108] sm:$0xff]   ;;  %v8348_v58 = vld [vmem:[#allocation9 + $0x110] sm:$0xff]   ;;  %s6749_s14 = smul.u32 240, %s8898_s12  ;;  %s6750_s18 = sshll.u32 %s8898_s12, 9  ;;  %s8898_s12 = sphi %s9642_s12, %s1410_s12  }
 0x26c   : >> { %v8343_v54 = vld [vmem:[#allocation9 + $0x140] sm:$0xff]   ;;  %6881 = vmatprep.subr.bf16.mxu0 %v8342_v41  ;;  %v8346_v56 = vld [vmem:[#allocation9 + $0x148] sm:$0xff]   ;;  %v8349_v59 = vld [vmem:[#allocation9 + $0x150] sm:$0xff]   ;;  %s10557_s1 = scalar_lea.vmem %s9219_s23, %s6750_s18 [#allocation3]  ;;  %s10584_s29 = scalar_lea.vmem %s9461_s8, %s6750_s18 [#allocation15] }
 0x26d   : >> { %v8344_v46 = vld [vmem:[#allocation9 + $0xc0] sm:$0xff]   ;;  %7601 = vmatprep.subr.bf16.mxu1 %v8343_v54  ;;  %v8347_v57 = vld [vmem:[#allocation9 + $0xc8] sm:$0xff]   ;;  %v8350_v61 = vld [vmem:[#allocation9 + $0xd0] sm:$0xff]   ;;  %s9648_s9 = scalar_lea.vmem [#allocation2], %s6749_s14  ;;  %s1410_s12 = sadd.s32 1, %s8898_s12  }
 0x26e   : >> { %6882 = vmatpush3.bf16.msra.mxu0 %v8344_v46  ;;  %7602 = vmatpush3.bf16.msra.mxu1 %v8343_v54  ;;  %v8351_v62 = vld [vmem:[#allocation9 + $0x118] sm:$0xff]   ;;  %v8354_v2 = vld [vmem:[#allocation9 + $0x120] sm:$0xff]   ;;  %v8357_v5 = vld [vmem:[#allocation9 + $0x128] sm:$0xff]   ;;  %p1407_p9 = scmp.ge.s32.totalorder %s1410_s12, 4  }
 0x26f   : >> { %6883 = vmatprep.subr.bf16.mxu0 %v8345_v55  ;;  %7603 = vmatprep.subr.bf16.mxu1 %v8346_v56  ;;  %v8352_v63 = vld [vmem:[#allocation9 + $0x158] sm:$0xff]   ;;  %v8355_v3 = vld [vmem:[#allocation9 + $0x160] sm:$0xff]   ;;  %v8358_v6 = vld [vmem:[#allocation9 + $0x168] sm:$0xff]   ;;  %s6752_s22 = sshll.u32 (%p1407_p9), %s8979_s30, 15  ;;  %s6012_s17 = sshll.u32 (%p1407_p9), %s9461_s8, 4  ;;  %s10774_s17 = int_to_ptr.vmem [resolvable:$true] %s6012_s17 }
 0x270   : >> { %v8353_v0 = vld [vmem:[#allocation9 + $0xd8] sm:$0xff]   ;;  %v8356_v4 = vld [vmem:[#allocation9 + $0xe0] sm:$0xff]   ;;  %v8359_v8 = vld [vmem:[#allocation9 + $0xe8] sm:$0xff]   ;;  %s10771_s16 = scalar_lea.hbm (%p1407_p9), %s10825_s7, %s6752_s22  ;;  %s5999_s19 = scalar_lea.sflag (%p1407_p9), [#allocation5], %s9213_s10 }
 0x271   : >> { %v8360_v60 = vld [vmem:[#allocation9 + $0x130] sm:$0xff]   ;;  %v8363_v1 = vld [vmem:[#allocation9 + $0x138] sm:$0xff]   ;;  %v9654_v12 = vld [vmem:[%s9648_s9 + $0x28] sm:$0xff]  ;;  %s8804_s14 = scalar_lea.vmem (%p1407_p9), %s10774_s17, 32768  ;;  %p10855_p13 = scmp.ne.s32.totalorder (%p1407_p9), %s10837_s28, 0 }
 0x272   : >> { %6884 = vmatpush3.bf16.msra.mxu0 %v8347_v57  ;;  %7604 = vmatpush3.bf16.msra.mxu1 %v8346_v56  ;;  %v8361_v9 = vld [vmem:[#allocation9 + $0x170] sm:$0xff]   ;;  %v9651_v11 = vld [vmem:[%s9648_s9 + $0x20] sm:$0xff]  ;;  %v8370_v21 = vld [vmem:[#allocation9 + $0x48] sm:$0xff]   ;;  %p8805_p12 = scmp.ne.s32.totalorder (%p1407_p9), %s10774_s17, %s8804_s14  ;;  %s8915_s23 = smov (%p1407_p9), [#allocation15]  }
 0x273   : >> { %6885 = vmatprep.subr.bf16.mxu0 %v8348_v58  ;;  %7605 = vmatprep.subr.bf16.mxu1 %v8349_v59  ;;  %v8362_v10 = vld [vmem:[#allocation9 + $0xf0] sm:$0xff]   ;;  %v8364_v13 = vld [vmem:[#allocation9 + $0x178] sm:$0xff]   ;;  %v8366_v15 = vld [vmem:[#allocation9 + $0x40] sm:$0xff]   ;;  %s8808_s12 = sshll.u32 (%p1407_p9), %s8915_s23, 4  ;;  %s8809_s12 = int_to_ptr.vmem [resolvable:$false] %s8808_s12 }
 0x274   : >> { %1738 = vmatprep.mubr.bf16.mxu0 %v9651_v11  ;;  %7617 = vmatprep.mubr.bf16.mxu1 %v9654_v12  ;;  %v8365_v14 = vld [vmem:[#allocation9 + $0xf8] sm:$0xff]   ;;  %v8367_v16 = vld [vmem:[#allocation9 + $0x1c0] sm:$0xff]   ;;  %v8371_v23 = vld [vmem:[#allocation9 + $0x8] sm:$0xff]   ;;  %p8806_p1 = pnand (%p1407_p9), %p8805_p12, %p10855_p13  ;;  %s8810_s30 = scalar_lea.vmem (%p1407_p9), %s8809_s12, 65536 }
 0x275   : >> { %v9659_v17 = vld [vmem:[%s9648_s9 + $0x18] sm:$0xff]  ;;  %v9662_v18 = vld [vmem:[%s9648_s9 + $0x40] sm:$0xff]  ;;  %v8373_v24 = vld [vmem:[#allocation9 + $0x1c8] sm:$0xff]   ;;  %p8811_p2 = scmp.lt.s32.totalorder (%p1407_p9), %s10774_s17, %s8809_s12  ;;  %p8812_p8 = scmp.lt.s32.totalorder (%p1407_p9), %s8810_s30, %s8804_s14 }
 0x276   : >> { %6886 = vmatpush3.bf16.msra.mxu0 %v8350_v61  ;;  %7606 = vmatpush3.bf16.msra.mxu1 %v8349_v59  ;;  %v8368_v19 = vld [vmem:[#allocation9] sm:$0xff]   ;;  %v9665_v22 = vld [vmem:[%s9648_s9 + $0x38] sm:$0xff]  ;;  %v8375_v26 = vld [vmem:[#allocation9 + $0x188] sm:$0xff]   ;;  %p8807_p3 = pneg (%p1407_p9), %p8806_p1 }
 0x277   : >> { %6887 = vmatprep.subr.bf16.mxu0 %v8351_v62  ;;  %7607 = vmatprep.subr.bf16.mxu1 %v8352_v63  ;;  %v8369_v20 = vld [vmem:[#allocation9 + $0x180] sm:$0xff]   ;;  %v9670_v25 = vld [vmem:[%s9648_s9 + $0x58] sm:$0xff]  ;;  %v9675_v28 = vld [vmem:[%s9648_s9 + $0x30] sm:$0xff]  ;;  %p8813_p4 = por (%p1407_p9), %p8812_p8, %p8811_p2 }
 0x278   : >> { %v8372_v27 = vld [vmem:[#allocation9 + $0x50] sm:$0xff]   ;;  %v8376_v31 = vld [vmem:[#allocation9 + $0x58] sm:$0xff]   ;;  %v9684_v33 = vld [vmem:[%s9648_s9 + $0x88] sm:$0xff] }
 0x279   : >> { %v9678_v29 = vld [vmem:[%s9648_s9 + $0x70] sm:$0xff]  ;;  %v8377_v36 = vld [vmem:[#allocation9 + $0x18] sm:$0xff]   ;;  %v8378_v37 = vld [vmem:[#allocation9 + $0x60] sm:$0xff]   ;;  %p8814_p10 = pnand (%p1407_p9), %p8813_p4, %p8807_p3 }
 0x27a   : >> { %6888 = vmatpush3.bf16.msra.mxu0 %v8353_v0  ;;  %7608 = vmatpush3.bf16.msra.mxu1 %v8352_v63  ;;  %v8374_v30 = vld [vmem:[#allocation9 + $0x10] sm:$0xff]   ;;  %v9691_v38 = vld [vmem:[%s9648_s9 + $0x48] sm:$0xff]  ;;  %v9694_v39 = vld [vmem:[%s9648_s9 + $0xa0] sm:$0xff] }
 0x27b   : >> { %6889 = vmatprep.subr.bf16.mxu0 %v8354_v2  ;;  %7609 = vmatprep.subr.bf16.mxu1 %v8355_v3  ;;  %v9681_v32 = vld [vmem:[%s9648_s9 + $0x50] sm:$0xff]  ;;  %v8380_v40 = vld [vmem:[#allocation9 + $0x20] sm:$0xff]   ;;  %v9700_v43 = vld [vmem:[%s9648_s9 + $0xb8] sm:$0xff] }
 0x27c   : >> { %v8379_v34 = vld [vmem:[#allocation9 + $0x1d0] sm:$0xff]   ;;  %v8382_v42 = vld [vmem:[#allocation9 + $0x68] sm:$0xff]   ;;  %v8385_v44 = vld [vmem:[#allocation9 + $0x1d8] sm:$0xff]  }
 0x27d   : >> { %v8381_v35 = vld [vmem:[#allocation9 + $0x190] sm:$0xff]   ;;  %v9697_v7 = vld [vmem:[%s9648_s9 + $0x68] sm:$0xff]  ;;  %v8387_v45 = vld [vmem:[#allocation9 + $0x198] sm:$0xff]  }
 0x27e   : >> { %6890 = vmatpush3.bf16.msra.mxu0 %v8356_v4  ;;  %7610 = vmatpush3.bf16.msra.mxu1 %v8355_v3  ;;  %v8383_v47 = vld [vmem:[#allocation9 + $0x28] sm:$0xff]   ;;  %v8384_v48 = vld [vmem:[#allocation9 + $0x70] sm:$0xff]   ;;  %v9707_v49 = vld [vmem:[%s9648_s9 + $0x60] sm:$0xff] }
 0x27f   : >> { %6891 = vmatprep.subr.bf16.mxu0 %v8357_v5  ;;  %7611 = vmatprep.subr.bf16.mxu1 %v8358_v6  ;;  %v9710_v50 = vld [vmem:[%s9648_s9 + $0xd0] sm:$0xff]  ;;  %v8390_v52 = vld [vmem:[#allocation9 + $0x1e0] sm:$0xff]   ;;  %v8388_v53 = vld [vmem:[#allocation9 + $0x78] sm:$0xff]  }
 0x280   : >> { %v8386_v51 = vld [vmem:[#allocation9 + $0x30] sm:$0xff]   ;;  %v9713_v41 = vld [vmem:[%s9648_s9 + $0x80] sm:$0xff]  ;;  %v1415_v54 = vld [vmem:[%s9648_s9 + $0x8] sm:$0xff] }
 0x281   : >> { %v8391_v46 = vld [vmem:[#allocation9 + $0x1a0] sm:$0xff]   ;;  %v8393_v55 = vld [vmem:[#allocation9 + $0x1e8] sm:$0xff]   ;;  %v8389_v56 = vld [vmem:[#allocation9 + $0x38] sm:$0xff]  }
 0x282   : >> { %6892 = vmatpush3.bf16.msra.mxu0 %v8359_v8  ;;  %7612 = vmatpush3.bf16.msra.mxu1 %v8358_v6  ;;  %v8392_v57 = vld [vmem:[#allocation9 + $0x80] sm:$0xff]   ;;  %v8394_v58 = vld [vmem:[#allocation9 + $0x1a8] sm:$0xff]   ;;  %v9720_v59 = vld [vmem:[%s9648_s9 + $0x78] sm:$0xff] }
 0x283   : >> { %6893 = vmatprep.subr.bf16.mxu0 %v8360_v60  ;;  %7613 = vmatprep.subr.bf16.mxu1 %v8361_v9  ;;  %v1414_v61 = vld [vmem:[%s9648_s9] sm:$0xff]  ;;  %v9724_v62 = vld [vmem:[%s9648_s9 + $0x98] sm:$0xff]  ;;  %v8395_v63 = vld [vmem:[#allocation9 + $0x88] sm:$0xff]  }
 0x284   : >> { %v8396_v0 = vld [vmem:[#allocation9 + $0x1f0] sm:$0xff]   ;;  %v8399_v3 = vld [vmem:[#allocation9 + $0x1f8] sm:$0xff]  }
 0x285   : >> { %v8397_v2 = vld [vmem:[#allocation9 + $0x1b0] sm:$0xff]   ;;  %v8400_v8 = vld [vmem:[#allocation9 + $0x1b8] sm:$0xff]  }
 0x286   : >> { %6894 = vmatpush3.bf16.msra.mxu0 %v8362_v10  ;;  %7614 = vmatpush3.bf16.msra.mxu1 %v8361_v9  ;;  %v8398_v4 = vld [vmem:[#allocation9 + $0x90] sm:$0xff]   ;;  %v8401_v60 = vld [vmem:[#allocation9 + $0x98] sm:$0xff]   ;;  %v8402_v9 = vld [vmem:[#allocation9 + $0x280] sm:$0xff]  }
 0x287   : >> { %6895 = vmatprep.subr.bf16.mxu0 %v8363_v1  ;;  %7615 = vmatprep.subr.bf16.mxu1 %v8364_v13  ;;  %v9730_v5 = vld [vmem:[%s9648_s9 + $0x90] sm:$0xff]  ;;  %v8404_v10 = vld [vmem:[#allocation9 + $0xa0] sm:$0xff]  }
 0x288   : >> { %v9733_v6 = vld [vmem:[%s9648_s9 + $0xb0] sm:$0xff]  ;;  %v9740_v1 = vld [vmem:[%s9648_s9 + $0xa8] sm:$0xff] }
 0x28a   : >> { %6896 = vmatpush3.bf16.msra.mxu0 %v8365_v14  ;;  %7616 = vmatpush3.bf16.msra.mxu1 %v8364_v13  ;;  %v8407_v13 = vld [vmem:[#allocation9 + $0xa8] sm:$0xff]   ;;  %v8410_v14 = vld [vmem:[#allocation9 + $0xb0] sm:$0xff]  }
 0x28b   : >> { %6961 = vmatprep.subr.bf16.mxu1 %v8366_v15  ;;  %7041 = vmatprep.subr.bf16.mxu0 %v8367_v16  ;;  %v9750_v15 = vld [vmem:[%s9648_s9 + $0xc0] sm:$0xff] }
 0x28c   : >> { %v8413_v16 = vld [vmem:[#allocation9 + $0xb8] sm:$0xff]  }
 0x28d   : >> { %1739 = vmatmul.mubr.bf16.vlgmr.msra.gmra.mrb[0].mxu0 %v9659_v17  ;;  %7618 = vmatmul.mubr.bf16.vlgmr.msra.gmra.mrb[0].mxu1 %v9662_v18 }
 0x28e   : >> { %6962 = vmatpush3.bf16.msra.mxu1 %v8368_v19  ;;  %7042 = vmatpush3.bf16.msra.mxu0 %v8369_v20  ;;  %v8403_v19 = vld [vmem:[#allocation9 + $0x240] sm:$0xff]   ;;  %v8405_v20 = vld [vmem:[#allocation9 + $0x288] sm:$0xff]  }
 0x28f   : >> { %6963 = vmatprep.subr.bf16.mxu1 %v8370_v21  ;;  %1746 = vmatprep.mubr.bf16.mxu0 %v9665_v22  ;;  %v8406_v21 = vld [vmem:[#allocation9 + $0x248] sm:$0xff]  }
 0x290   : >> { %7621 = vmatprep.mubr.bf16.mxu1 %v9670_v25  ;;  %7043 = vmatprep.subr.bf16.mxu0 %v8373_v24  ;;  %v8411_v24 = vld [vmem:[#allocation9 + $0x298] sm:$0xff]  }
 0x292   : >> { %6964 = vmatpush3.bf16.msra.mxu1 %v8371_v23  ;;  %7044 = vmatpush3.bf16.msra.mxu0 %v8375_v26  ;;  %v8408_v23 = vld [vmem:[#allocation9 + $0x290] sm:$0xff]   ;;  %v8412_v26 = vld [vmem:[#allocation9 + $0x258] sm:$0xff]  }
 0x293   : >> { %6965 = vmatprep.subr.bf16.mxu1 %v8372_v27  ;;  %7045 = vmatprep.subr.bf16.mxu0 %v8379_v34  ;;  %v8415_v27 = vld [vmem:[#allocation9 + $0x2a0] sm:$0xff]   ;;  %v1416_v34 = vld [vmem:[%s9648_s9 + $0x10] sm:$0xff] }
 0x295   : >> { %1747 = vmatmul.mubr.bf16.gmra.mrb[4].mxu0 %v9675_v28  ;;  %7622 = vmatmul.mubr.bf16.gmra.mrb[4].mxu1 %v9678_v29 }
 0x296   : >> { %6966 = vmatpush3.bf16.msra.mxu1 %v8374_v30  ;;  %1754 = vmatprep.mubr.bf16.mxu0 %v9681_v32  ;;  %v8419_v30 = vld [vmem:[#allocation9 + $0x2a8] sm:$0xff]  }
 0x297   : >> { %6967 = vmatprep.subr.bf16.mxu1 %v8376_v31  ;;  %7625 = vmatprep.mubr.bf16.mxu1 %v9684_v33  ;;  %v8420_v31 = vld [vmem:[#allocation9 + $0x268] sm:$0xff]  }
 0x298   : >> { %7046 = vmatpush3.bf16.msra.mxu0 %v8381_v35  ;;  %v8424_v35 = vld [vmem:[#allocation9 + $0x270] sm:$0xff]  }
 0x299   : >> { %7047 = vmatprep.subr.bf16.mxu0 %v8385_v44  ;;  %v8425_v44 = vld [vmem:[#allocation9 + $0x228] sm:$0xff]  }
 0x29a   : >> { %6968 = vmatpush3.bf16.msra.mxu1 %v8377_v36  ;;  %v8427_v36 = vld [vmem:[#allocation9 + $0x2b8] sm:$0xff]  }
 0x29b   : >> { %6969 = vmatprep.subr.bf16.mxu1 %v8378_v37  ;;  %v8428_v37 = vld [vmem:[#allocation9 + $0x278] sm:$0xff]  }
 0x29c   : >> { %7048 = vmatpush3.bf16.msra.mxu0 %v8387_v45  ;;  %v6388_v45 = vld [vmem:[%s9648_s9 + $0xe0] sm:$0xff] }
 0x29d   : >> { %1755 = vmatmul.mubr.bf16.gmra.mrb[8].mxu0 %v9691_v38  ;;  %7626 = vmatmul.mubr.bf16.gmra.mrb[8].mxu1 %v9694_v39 }
 0x29e   : >> { %6970 = vmatpush3.bf16.msra.mxu1 %v8380_v40  ;;  %1762 = vmatprep.mubr.bf16.mxu0 %v9697_v7  ;;  %v8417_v40 = vld [vmem:[#allocation9 + $0x208] sm:$0xff]  }
 0x29f   : >> { %6971 = vmatprep.subr.bf16.mxu1 %v8382_v42  ;;  %7629 = vmatprep.mubr.bf16.mxu1 %v9700_v43  ;;  %v8418_v42 = vld [vmem:[#allocation9 + $0x210] sm:$0xff]  }
 0x2a0   : >> { %7049 = vmatprep.subr.bf16.mxu0 %v8390_v52  ;;  %v8430_v52 = vld [vmem:[#allocation9 + $0x2c0] sm:$0xff]  }
 0x2a1   : >> { %7050 = vmatpush3.bf16.msra.mxu0 %v8391_v46  ;;  %v9790_v46 = vld [vmem:[%s9648_s9 + $0x110] sm:$0xff] }
 0x2a2   : >> { %6972 = vmatpush3.bf16.msra.mxu1 %v8383_v47  ;;  %7051 = vmatprep.subr.bf16.mxu0 %v8393_v55  ;;  %v8426_v47 = vld [vmem:[#allocation9 + $0x230] sm:$0xff]   ;;  %v8435_v55 = vld [vmem:[#allocation9 + $0x348] sm:$0xff]  }
 0x2a3   : >> { %6973 = vmatprep.subr.bf16.mxu1 %v8384_v48  ;;  %v6387_v48 = vld [vmem:[%s9648_s9 + $0xd8] sm:$0xff] }
 0x2a5   : >> { %1763 = vmatmul.mubr.bf16.gmra.mrb[12].mxu0 %v9707_v49  ;;  %7630 = vmatmul.mubr.bf16.gmra.mrb[12].mxu1 %v9710_v50 }
 0x2a6   : >> { %6974 = vmatpush3.bf16.msra.mxu1 %v8386_v51  ;;  %1770 = vmatprep.mubr.bf16.mxu0 %v9713_v41  ;;  %v6415_v51 = vld [vmem:[%s9648_s9 + $0xf8] sm:$0xff] }
 0x2a7   : >> { %6975 = vmatprep.subr.bf16.mxu1 %v8388_v53  ;;  %2076 = vmatprep.mubr.bf16.mxu1 %v1415_v54  ;;  %v6414_v53 = vld [vmem:[%s9648_s9 + $0xf0] sm:$0xff] }
 0x2a8   : >> { %7052 = vmatpush3.bf16.msra.mxu0 %v8394_v58  ;;  %v8433_v54 = vld [vmem:[#allocation9 + $0x2c8] sm:$0xff]  }
 0x2a9   : >> { %7053 = vmatprep.subr.bf16.mxu0 %v8396_v0  ;;  %v9796_v58 = vld [vmem:[%s9648_s9 + $0x108] sm:$0xff]  ;;  %v9806_v0 = vld [vmem:[%s9648_s9 + $0x120] sm:$0xff] }
 0x2aa   : >> { %6976 = vmatpush3.bf16.msra.mxu1 %v8389_v56  ;;  %v8434_v56 = vld [vmem:[#allocation9 + $0x2d0] sm:$0xff]  }
 0x2ab   : >> { %7633 = vmatprep.subr.bf16.mxu1 %v8392_v57 }
 0x2ac   : >> { %7054 = vmatpush3.bf16.msra.mxu0 %v8397_v2  ;;  %v9809_v2 = vld [vmem:[%s9648_s9 + $0x140] sm:$0xff] }
 0x2ad   : >> { %1771 = vmatmul.mubr.bf16.gmra.mrb[16].mxu0 %v9720_v59  ;;  %2077 = vmatmul.mubr.bf16.vlgmr.msra.gmra.mrb[16].mxu1 %v1414_v61  ;;  %v8440_v61 = vld [vmem:[#allocation9 + $0x310] sm:$0xff]  }
 0x2ae   : >> { %7634 = vmatpush3.bf16.msra.mxu1 %v8392_v57  ;;  %1778 = vmatprep.mubr.bf16.mxu0 %v9724_v62  ;;  %v8439_v57 = vld [vmem:[#allocation9 + $0x350] sm:$0xff]  }
 0x2af   : >> { %2084 = vmatprep.mubr.bf16.mxu1 %v9651_v11  ;;  %7635 = vmatprep.subr.bf16.mxu1 %v8395_v63  ;;  %v9743_v11 = vld [vmem:[%s9648_s9 + $0xc8] sm:$0xff] }
 0x2b0   : >> { %7055 = vmatprep.subr.bf16.mxu0 %v8399_v3  ;;  %v8446_v3 = vld [vmem:[#allocation9 + $0x360] sm:$0xff]  }
 0x2b1   : >> { %7056 = vmatpush3.bf16.msra.mxu0 %v8400_v8  ;;  %v9817_v8 = vld [vmem:[%s9648_s9 + $0x138] sm:$0xff] }
 0x2b2   : >> { %7636 = vmatpush3.bf16.msra.mxu1 %v8395_v63  ;;  %7121 = vmatprep.subr.bf16.mxu0 %v8402_v9  ;;  %v8444_v63 = vld [vmem:[#allocation9 + $0x318] sm:$0xff]   ;;  %v8452_v9 = vld [vmem:[#allocation9 + $0x328] sm:$0xff]  }
 0x2b3   : >> { %7637 = vmatprep.subr.bf16.mxu1 %v8398_v4 }
 0x2b5   : >> { %1779 = vmatmul.mubr.bf16.gmra.mrb[20].mxu0 %v9730_v5  ;;  %2085 = vmatmul.mubr.bf16.gmra.mrb[20].mxu1 %v9659_v17  ;;  %v8414_v17 = vld [vmem:[#allocation9 + $0x200] sm:$0xff]  }
 0x2b6   : >> { %1786 = vmatprep.mubr.bf16.mxu0 %v9733_v6  ;;  %2092 = vmatprep.mubr.bf16.mxu1 %v9665_v22 }
 0x2b7   : >> { %7638 = vmatpush3.bf16.msra.mxu1 %v8398_v4  ;;  %v8450_v4 = vld [vmem:[#allocation9 + $0x368] sm:$0xff]  }
 0x2b8   : >> { %7639 = vmatprep.subr.bf16.mxu1 %v8401_v60 }
 0x2bb   : >> { %7640 = vmatpush3.bf16.msra.mxu1 %v8401_v60  ;;  %v9820_v60 = vld [vmem:[%s9648_s9 + $0x158] sm:$0xff] }
 0x2bc   : >> { %7641 = vmatprep.subr.bf16.mxu1 %v8404_v10 }
 0x2bd   : >> { %1787 = vmatmul.mubr.bf16.gmra.mrb[24].mxu0 %v9740_v1  ;;  %2093 = vmatmul.mubr.bf16.gmra.mrb[24].mxu1 %v9675_v28 }
 0x2be   : >> { %1794 = vmatprep.mubr.bf16.mxu0 %v9743_v11  ;;  %2100 = vmatprep.mubr.bf16.mxu1 %v9681_v32 }
 0x2bf   : >> { %7642 = vmatpush3.bf16.msra.mxu1 %v8404_v10  ;;  %v8454_v10 = vld [vmem:[#allocation9 + $0x370] sm:$0xff]  }
 0x2c0   : >> { %7643 = vmatprep.subr.bf16.mxu1 %v8407_v13 }
 0x2c3   : >> { %7644 = vmatpush3.bf16.msra.mxu1 %v8407_v13  ;;  %v6419_v13 = vld [vmem:[%s9648_s9 + $0x118] sm:$0xff] }
 0x2c4   : >> { %7645 = vmatprep.subr.bf16.mxu1 %v8410_v14 }
 0x2c5   : >> { %1795 = vmatmul.mubr.bf16.gmra.mrb[28].mxu0 %v9750_v15  ;;  %2101 = vmatmul.mubr.bf16.gmra.mrb[28].mxu1 %v9691_v38 }
 0x2c6   : >> { %2108 = vmatprep.mubr.bf16.mxu1 %v9697_v7  ;;  %2490 = vmatprep.mubr.bf16.mxu0 %v9665_v22  ;;  %v8409_v22 = vld [vmem:[#allocation9 + $0x250] sm:$0xff]  }
 0x2c7   : >> { %7646 = vmatpush3.bf16.msra.mxu1 %v8410_v14  ;;  %v8456_v14 = vld [vmem:[#allocation9 + $0x330] sm:$0xff]  }
 0x2c8   : >> { %7647 = vmatprep.subr.bf16.mxu1 %v8413_v16 }
 0x2cb   : >> { %7648 = vmatpush3.bf16.msra.mxu1 %v8413_v16  ;;  %v9830_v16 = vld [vmem:[%s9648_s9 + $0x170] sm:$0xff] }
 0x2cc   : >> { %7665 = vmatprep.subr.bf16.mxu1 %v8414_v17 }
 0x2cd   : >> { %2109 = vmatmul.mubr.bf16.gmra.mrb[32].mxu1 %v9707_v49  ;;  %2491 = vmatmul.mubr.bf16.vlgmr.msra.gmra.mrb[32].mxu0 %v9675_v28  ;;  %v8416_v28 = vld [vmem:[#allocation9 + $0x260] sm:$0xff]  }
 0x2ce   : >> { %7122 = vmatpush3.bf16.msra.mxu0 %v8403_v19  ;;  %2116 = vmatprep.mubr.bf16.mxu1 %v9713_v41  ;;  %v8458_v19 = vld [vmem:[#allocation9 + $0x378] sm:$0xff]  }
 0x2cf   : >> { %2498 = vmatprep.mubr.bf16.mxu0 %v9681_v32  ;;  %7123 = vmatprep.subr.bf16.mxu0 %v8405_v20  ;;  %v8423_v32 = vld [vmem:[#allocation9 + $0x2b0] sm:$0xff]   ;;  %v8460_v20 = vld [vmem:[#allocation9 + $0x338] sm:$0xff]  }
 0x2d2   : >> { %7124 = vmatpush3.bf16.msra.mxu0 %v8406_v21  ;;  %v8463_v21 = vld [vmem:[#allocation9 + $0x4c0] sm:$0xff]  }
 0x2d3   : >> { %7125 = vmatprep.subr.bf16.mxu0 %v8408_v23  ;;  %v8451_v23 = vld [vmem:[#allocation9 + $0x390] sm:$0xff]  }
 0x2d5   : >> { %2117 = vmatmul.mubr.bf16.gmra.mrb[36].mxu1 %v9720_v59  ;;  %2499 = vmatmul.mubr.bf16.gmra.mrb[36].mxu0 %v9691_v38  ;;  %v8431_v38 = vld [vmem:[#allocation9 + $0x340] sm:$0xff]  }
 0x2d6   : >> { %2124 = vmatprep.mubr.bf16.mxu1 %v9724_v62  ;;  %2506 = vmatprep.mubr.bf16.mxu0 %v9697_v7  ;;  %v8421_v7 = vld [vmem:[#allocation9 + $0x218] sm:$0xff]  }
 0x2d7   : >> { %7126 = vmatpush3.bf16.msra.mxu0 %v8409_v22  ;;  %v9839_v22 = vld [vmem:[%s9648_s9 + $0x168] sm:$0xff] }
 0x2d8   : >> { %7127 = vmatprep.subr.bf16.mxu0 %v8411_v24  ;;  %v9842_v24 = vld [vmem:[%s9648_s9 + $0x148] sm:$0xff] }
 0x2db   : >> { %7128 = vmatpush3.bf16.msra.mxu0 %v8412_v26  ;;  %v8453_v26 = vld [vmem:[#allocation9 + $0x398] sm:$0xff]  }
 0x2dc   : >> { %7129 = vmatprep.subr.bf16.mxu0 %v8415_v27  ;;  %v9845_v27 = vld [vmem:[%s9648_s9 + $0x188] sm:$0xff] }
 0x2dd   : >> { %2125 = vmatmul.mubr.bf16.gmra.mrb[40].mxu1 %v9730_v5  ;;  %2507 = vmatmul.mubr.bf16.gmra.mrb[40].mxu0 %v9707_v49  ;;  %v8429_v49 = vld [vmem:[#allocation9 + $0x238] sm:$0xff]  }
 0x2de   : >> { %2132 = vmatprep.mubr.bf16.mxu1 %v9733_v6  ;;  %2514 = vmatprep.mubr.bf16.mxu0 %v9713_v41  ;;  %v8432_v41 = vld [vmem:[#allocation9 + $0x300] sm:$0xff]  }
 0x2df   : >> { %7130 = vmatpush3.bf16.msra.mxu0 %v8416_v28  ;;  %v9848_v28 = vld [vmem:[%s9648_s9 + $0x160] sm:$0xff] }
 0x2e0   : >> { %7131 = vmatprep.subr.bf16.mxu0 %v8419_v30  ;;  %v8455_v30 = vld [vmem:[#allocation9 + $0x3a0] sm:$0xff]  }
 0x2e3   : >> { %7132 = vmatpush3.bf16.msra.mxu0 %v8420_v31  ;;  %v9855_v31 = vld [vmem:[%s9648_s9 + $0x180] sm:$0xff] }
 0x2e4   : >> { %7133 = vmatprep.subr.bf16.mxu0 %v8423_v32  ;;  %v9858_v32 = vld [vmem:[%s9648_s9 + $0x178] sm:$0xff] }
 0x2e5   : >> { %2133 = vmatmul.mubr.bf16.gmra.mrb[44].mxu1 %v9740_v1  ;;  %2515 = vmatmul.mubr.bf16.gmra.mrb[44].mxu0 %v9720_v59  ;;  %v8437_v59 = vld [vmem:[#allocation9 + $0x2d8] sm:$0xff]  }
 0x2e6   : >> { %7649 = vmatprep.mubr.bf16.mxu1 %v1416_v34  ;;  %2522 = vmatprep.mubr.bf16.mxu0 %v9724_v62  ;;  %v8438_v62 = vld [vmem:[#allocation9 + $0x2e0] sm:$0xff]   ;;  %v8457_v34 = vld [vmem:[#allocation9 + $0x3a8] sm:$0xff]  }
 0x2e7   : >> { %7134 = vmatpush3.bf16.msra.mxu0 %v8424_v35  ;;  %v9861_v35 = vld [vmem:[%s9648_s9 + $0x1a0] sm:$0xff] }
 0x2e8   : >> { %7135 = vmatprep.subr.bf16.mxu0 %v8427_v36  ;;  %v9864_v36 = vld [vmem:[%s9648_s9 + $0x190] sm:$0xff] }
 0x2eb   : >> { %7136 = vmatpush3.bf16.msra.mxu0 %v8428_v37  ;;  %v8459_v37 = vld [vmem:[#allocation9 + $0x3b0] sm:$0xff]  }
 0x2ec   : >> { %7201 = vmatprep.subr.bf16.mxu0 %v8431_v38  ;;  %v9871_v38 = vld [vmem:[%s9648_s9 + $0x198] sm:$0xff] }
 0x2ed   : >> { %7650 = vmatmul.mubr.bf16.vlgmr.msra.gmra.mrb[0].mxu1 %v9654_v12  ;;  %2523 = vmatmul.mubr.bf16.gmra.mrb[48].mxu0 %v9730_v5  ;;  %v8422_v12 = vld [vmem:[#allocation9 + $0x220] sm:$0xff]   ;;  %v8442_v5 = vld [vmem:[#allocation9 + $0x2f0] sm:$0xff]  }
 0x2ee   : >> { %7666 = vmatpush3.bf16.msra.mxu1 %v8414_v17  ;;  %7653 = vmatprep.mubr.bf16.mxu1 %v9662_v18  ;;  %v9833_v17 = vld [vmem:[%s9648_s9 + $0x130] sm:$0xff] }
 0x2ef   : >> { %7667 = vmatprep.subr.bf16.mxu1 %v8417_v40  ;;  %2530 = vmatprep.mubr.bf16.mxu0 %v9733_v6  ;;  %v6389_v6 = vld [vmem:[%s9648_s9 + $0xe8] sm:$0xff] }
 0x2f2   : >> { %7668 = vmatpush3.bf16.msra.mxu1 %v8417_v40  ;;  %v6437_v40 = vld [vmem:[%s9648_s9 + $0x1a8] sm:$0xff] }
 0x2f3   : >> { %7669 = vmatprep.subr.bf16.mxu1 %v8418_v42 }
 0x2f5   : >> { %7654 = vmatmul.mubr.bf16.gmra.mrb[4].mxu1 %v9670_v25  ;;  %2531 = vmatmul.mubr.bf16.gmra.mrb[52].mxu0 %v9740_v1  ;;  %v8447_v1 = vld [vmem:[#allocation9 + $0x380] sm:$0xff]  }
 0x2f6   : >> { %7670 = vmatpush3.bf16.msra.mxu1 %v8418_v42  ;;  %7657 = vmatprep.mubr.bf16.mxu1 %v9678_v29  ;;  %v8461_v42 = vld [vmem:[#allocation9 + $0x3b8] sm:$0xff]  }
 0x2f7   : >> { %7671 = vmatprep.subr.bf16.mxu1 %v8421_v7  ;;  %2538 = vmatprep.mubr.bf16.mxu0 %v9743_v11  ;;  %v9826_v11 = vld [vmem:[%s9648_s9 + $0x150] sm:$0xff] }
 0x2fa   : >> { %7672 = vmatpush3.bf16.msra.mxu1 %v8421_v7  ;;  %v8462_v7 = vld [vmem:[#allocation9 + $0x400] sm:$0xff]  }
 0x2fb   : >> { %7673 = vmatprep.subr.bf16.mxu1 %v8422_v12 }
 0x2fd   : >> { %7658 = vmatmul.mubr.bf16.gmra.mrb[8].mxu1 %v9684_v33  ;;  %2539 = vmatmul.mubr.bf16.gmra.mrb[56].mxu0 %v9750_v15  ;;  %v8449_v15 = vld [vmem:[#allocation9 + $0x388] sm:$0xff]  }
 0x2fe   : >> { %7674 = vmatpush3.bf16.msra.mxu1 %v8422_v12  ;;  %7661 = vmatprep.mubr.bf16.mxu1 %v9694_v39  ;;  %v8464_v12 = vld [vmem:[#allocation9 + $0x3c0] sm:$0xff]  }
 0x2ff   : >> { %7675 = vmatprep.subr.bf16.mxu1 %v8425_v44  ;;  %2546 = vmatprep.mubr.bf16.mxu0 %v6388_v45  ;;  %v8466_v45 = vld [vmem:[#allocation9 + $0x408] sm:$0xff]  }
 0x302   : >> { %7676 = vmatpush3.bf16.msra.mxu1 %v8425_v44  ;;  %v8465_v44 = vld [vmem:[#allocation9 + $0x480] sm:$0xff]  }
 0x303   : >> { %7677 = vmatprep.subr.bf16.mxu1 %v8426_v47 }
 0x305   : >> { %7662 = vmatmul.mubr.bf16.gmra.mrb[12].mxu1 %v9700_v43  ;;  %2547 = vmatmul.mubr.bf16.gmra.mrb[60].mxu0 %v6387_v48  ;;  %v8469_v48 = vld [vmem:[#allocation9 + $0x4c8] sm:$0xff]  }
 0x306   : >> { %7678 = vmatpush3.bf16.msra.mxu1 %v8426_v47  ;;  %7681 = vmatprep.mubr.bf16.mxu1 %v9662_v18  ;;  %v8436_v18 = vld [vmem:[#allocation9 + $0x308] sm:$0xff]  }
 0x307   : >> { %7679 = vmatprep.subr.bf16.mxu1 %v8429_v49  ;;  %2921 = vmatprep.mubr.bf16.mxu0 %v6415_v51  ;;  %v8467_v47 = vld [vmem:[#allocation9 + $0x3c8] sm:$0xff]  }
 0x308   : >> { %v8471_v51 = vld [vmem:[#allocation9 + $0x488] sm:$0xff]  }
 0x30a   : >> { %7680 = vmatpush3.bf16.msra.mxu1 %v8429_v49  ;;  %v8468_v49 = vld [vmem:[#allocation9 + $0x410] sm:$0xff]  }
 0x30b   : >> { %7697 = vmatprep.subr.bf16.mxu1 %v8430_v52 }
 0x30d   : >> { %7682 = vmatmul.mubr.bf16.vlgmr.msra.gmra.mrb[0].mxu1 %v9670_v25  ;;  %2922 = vmatmul.mubr.bf16.vlgmr.msra.gmra.mrb[64].mxu0 %v6414_v53  ;;  %v9799_v25 = vld [vmem:[%s9648_s9 + $0x128] sm:$0xff]  ;;  %v8470_v53 = vld [vmem:[#allocation9 + $0x3d0] sm:$0xff]  }
 0x30e   : >> { %7698 = vmatpush3.bf16.msra.mxu1 %v8430_v52  ;;  %7202 = vmatpush3.bf16.msra.mxu0 %v8432_v41  ;;  %v8475_v52 = vld [vmem:[#allocation9 + $0x4d0] sm:$0xff]   ;;  %v8472_v41 = vld [vmem:[#allocation9 + $0x418] sm:$0xff]  }
 0x30f   : >> { %7699 = vmatprep.subr.bf16.mxu1 %v8433_v54  ;;  %7685 = vmatprep.mubr.bf16.mxu1 %v9678_v29  ;;  %v8443_v29 = vld [vmem:[#allocation9 + $0x358] sm:$0xff]  }
 0x310   : >> { %2929 = vmatprep.mubr.bf16.mxu0 %v9790_v46  ;;  %7203 = vmatprep.subr.bf16.mxu0 %v8435_v55  ;;  %v8473_v55 = vld [vmem:[#allocation9 + $0x3d8] sm:$0xff]  }
 0x312   : >> { %7700 = vmatpush3.bf16.msra.mxu1 %v8433_v54  ;;  %7204 = vmatpush3.bf16.msra.mxu0 %v8436_v18  ;;  %v8477_v54 = vld [vmem:[#allocation9 + $0x490] sm:$0xff]   ;;  %v8483_v18 = vld [vmem:[#allocation9 + $0x498] sm:$0xff]  }
 0x313   : >> { %7701 = vmatprep.subr.bf16.mxu1 %v8434_v56  ;;  %7205 = vmatprep.subr.bf16.mxu0 %v8439_v57  ;;  %v8476_v57 = vld [vmem:[#allocation9 + $0x3e0] sm:$0xff]  }
 0x315   : >> { %7686 = vmatmul.mubr.bf16.gmra.mrb[4].mxu1 %v9684_v33  ;;  %2930 = vmatmul.mubr.bf16.gmra.mrb[68].mxu0 %v9796_v58  ;;  %v8441_v33 = vld [vmem:[#allocation9 + $0x2e8] sm:$0xff]  }
 0x316   : >> { %7702 = vmatpush3.bf16.msra.mxu1 %v8434_v56  ;;  %7689 = vmatprep.mubr.bf16.mxu1 %v9694_v39  ;;  %v8448_v39 = vld [vmem:[#allocation9 + $0x320] sm:$0xff]  }
 0x317   : >> { %7703 = vmatprep.subr.bf16.mxu1 %v8437_v59  ;;  %2937 = vmatprep.mubr.bf16.mxu0 %v9799_v25  ;;  %v8474_v56 = vld [vmem:[#allocation9 + $0x420] sm:$0xff]  }
 0x318   : >> { %7206 = vmatpush3.bf16.msra.mxu0 %v8440_v61  ;;  %v8487_v61 = vld [vmem:[#allocation9 + $0x4a0] sm:$0xff]  }
 0x319   : >> { %7207 = vmatprep.subr.bf16.mxu0 %v8443_v29  ;;  %v8479_v29 = vld [vmem:[#allocation9 + $0x3e8] sm:$0xff]  }
 0x31a   : >> { %7704 = vmatpush3.bf16.msra.mxu1 %v8437_v59  ;;  %v8486_v59 = vld [vmem:[#allocation9 + $0x4e0] sm:$0xff]  }
 0x31b   : >> { %7705 = vmatprep.subr.bf16.mxu1 %v8438_v62 }
 0x31c   : >> { %7208 = vmatpush3.bf16.msra.mxu0 %v8444_v63  ;;  %v8480_v63 = vld [vmem:[#allocation9 + $0x430] sm:$0xff]  }
 0x31d   : >> { %7690 = vmatmul.mubr.bf16.gmra.mrb[8].mxu1 %v9700_v43  ;;  %2938 = vmatmul.mubr.bf16.gmra.mrb[72].mxu0 %v9806_v0  ;;  %v8445_v43 = vld [vmem:[#allocation9 + $0x2f8] sm:$0xff]  }
 0x31e   : >> { %7706 = vmatpush3.bf16.msra.mxu1 %v8438_v62  ;;  %7693 = vmatprep.mubr.bf16.mxu1 %v9710_v50  ;;  %v6416_v50 = vld [vmem:[%s9648_s9 + $0x100] sm:$0xff]  ;;  %v8489_v62 = vld [vmem:[#allocation9 + $0x4e8] sm:$0xff]  }
 0x31f   : >> { %7707 = vmatprep.subr.bf16.mxu1 %v8441_v33  ;;  %2945 = vmatprep.mubr.bf16.mxu0 %v9809_v2 }
 0x320   : >> { %7209 = vmatprep.subr.bf16.mxu0 %v8446_v3 }
 0x321   : >> { %7210 = vmatpush3.bf16.msra.mxu0 %v8448_v39 }
 0x322   : >> { %7708 = vmatpush3.bf16.msra.mxu1 %v8441_v33  ;;  %7211 = vmatprep.subr.bf16.mxu0 %v8450_v4 }
 0x323   : >> { %7709 = vmatprep.subr.bf16.mxu1 %v8442_v5 }
 0x325   : >> { %7694 = vmatmul.mubr.bf16.gmra.mrb[12].mxu1 %v6389_v6  ;;  %2946 = vmatmul.mubr.bf16.gmra.mrb[76].mxu0 %v9817_v8  ;;  %v8482_v6 = vld [vmem:[#allocation9 + $0x3f0] sm:$0xff]  }
 0x326   : >> { %7710 = vmatpush3.bf16.msra.mxu1 %v8442_v5  ;;  %2953 = vmatprep.mubr.bf16.mxu0 %v9820_v60  ;;  %v9890_v5 = vld [vmem:[%s9648_s9 + $0x1c0] sm:$0xff] }
 0x327   : >> { %7711 = vmatprep.subr.bf16.mxu1 %v8445_v43  ;;  %7713 = vmatprep.mubr.bf16.mxu1 %v6416_v50  ;;  %v8484_v50 = vld [vmem:[#allocation9 + $0x438] sm:$0xff]  }
 0x328   : >> { %7212 = vmatpush3.bf16.msra.mxu0 %v8452_v9 }
 0x329   : >> { %7213 = vmatprep.subr.bf16.mxu0 %v8454_v10  ;;  %v8490_v10 = vld [vmem:[#allocation9 + $0x4a8] sm:$0xff]  }
 0x32a   : >> { %7712 = vmatpush3.bf16.msra.mxu1 %v8445_v43 }
 0x32b   : >> { %7729 = vmatprep.subr.bf16.mxu1 %v8447_v1 }
 0x32c   : >> { %7214 = vmatpush3.bf16.msra.mxu0 %v8456_v14  ;;  %v8488_v14 = vld [vmem:[#allocation9 + $0x440] sm:$0xff]  }
 0x32d   : >> { %2954 = vmatmul.mubr.bf16.gmra.mrb[80].mxu0 %v9826_v11  ;;  %7714 = vmatmul.mubr.bf16.vlgmr.msra.gmra.mrb[0].mxu1 %v6419_v13 }
 0x32e   : >> { %7730 = vmatpush3.bf16.msra.mxu1 %v8447_v1  ;;  %2961 = vmatprep.mubr.bf16.mxu0 %v9830_v16  ;;  %v8492_v1 = vld [vmem:[#allocation9 + $0x4f0] sm:$0xff]  }
 0x32f   : >> { %7731 = vmatprep.subr.bf16.mxu1 %v8449_v15  ;;  %7717 = vmatprep.mubr.bf16.mxu1 %v9833_v17 }
 0x330   : >> { %7215 = vmatprep.subr.bf16.mxu0 %v8458_v19  ;;  %v8493_v19 = vld [vmem:[#allocation9 + $0x4b0] sm:$0xff]  }
 0x331   : >> { %7216 = vmatpush3.bf16.msra.mxu0 %v8460_v20 }
 0x332   : >> { %7732 = vmatpush3.bf16.msra.mxu1 %v8449_v15  ;;  %7361 = vmatprep.subr.bf16.mxu0 %v8463_v21 }
 0x333   : >> { %7733 = vmatprep.subr.bf16.mxu1 %v8451_v23 }
 0x335   : >> { %2962 = vmatmul.mubr.bf16.gmra.mrb[84].mxu0 %v9839_v22  ;;  %7718 = vmatmul.mubr.bf16.gmra.mrb[4].mxu1 %v9842_v24 }
 0x336   : >> { %7734 = vmatpush3.bf16.msra.mxu1 %v8451_v23  ;;  %2969 = vmatprep.mubr.bf16.mxu0 %v9845_v27 }
 0x337   : >> { %7735 = vmatprep.subr.bf16.mxu1 %v8453_v26  ;;  %7721 = vmatprep.mubr.bf16.mxu1 %v9848_v28 }
 0x33a   : >> { %7736 = vmatpush3.bf16.msra.mxu1 %v8453_v26 }
 0x33b   : >> { %7737 = vmatprep.subr.bf16.mxu1 %v8455_v30 }
 0x33d   : >> { %2970 = vmatmul.mubr.bf16.gmra.mrb[88].mxu0 %v9855_v31  ;;  %7722 = vmatmul.mubr.bf16.gmra.mrb[8].mxu1 %v9858_v32 }
 0x33e   : >> { %7738 = vmatpush3.bf16.msra.mxu1 %v8455_v30  ;;  %2977 = vmatprep.mubr.bf16.mxu0 %v9861_v35  ;;  %v8491_v30 = vld [vmem:[#allocation9 + $0x448] sm:$0xff]  }
 0x33f   : >> { %7739 = vmatprep.subr.bf16.mxu1 %v8457_v34  ;;  %7725 = vmatprep.mubr.bf16.mxu1 %v9864_v36 }
 0x342   : >> { %7740 = vmatpush3.bf16.msra.mxu1 %v8457_v34 }
 0x343   : >> { %7741 = vmatprep.subr.bf16.mxu1 %v8459_v37 }
 0x345   : >> { %2978 = vmatmul.mubr.bf16.gmra.mrb[92].mxu0 %v9871_v38  ;;  %7726 = vmatmul.mubr.bf16.gmra.mrb[12].mxu1 %v6437_v40 }
 0x346   : >> { %7742 = vmatpush3.bf16.msra.mxu1 %v8459_v37  ;;  %3351 = vmatprep.mubr.bf16.mxu0 %v9790_v46  ;;  %v8481_v46 = vld [vmem:[#allocation9 + $0x4d8] sm:$0xff]   ;;  %v8498_v37 = vld [vmem:[#allocation9 + $0x580] sm:$0xff]  }
 0x347   : >> { %7743 = vmatprep.subr.bf16.mxu1 %v8461_v42  ;;  %7745 = vmatprep.mubr.bf16.mxu1 %v6419_v13  ;;  %v8485_v13 = vld [vmem:[#allocation9 + $0x3f8] sm:$0xff]  }
 0x34a   : >> { %7744 = vmatpush3.bf16.msra.mxu1 %v8461_v42 }
 0x34b   : >> { %7281 = vmatprep.subr.bf16.mxu1 %v8462_v7 }
 0x34d   : >> { %3352 = vmatmul.mubr.bf16.vlgmr.msra.gmra.mrb[96].mxu0 %v9796_v58  ;;  %7746 = vmatmul.mubr.bf16.vlgmr.msra.gmra.mrb[0].mxu1 %v9833_v17  ;;  %v8478_v58 = vld [vmem:[#allocation9 + $0x428] sm:$0xff]  }
 0x34e   : >> { %7282 = vmatpush3.bf16.msra.mxu1 %v8464_v12  ;;  %7362 = vmatpush3.bf16.msra.mxu0 %v8465_v44 }
 0x34f   : >> { %7283 = vmatprep.subr.bf16.mxu1 %v8466_v45  ;;  %3359 = vmatprep.mubr.bf16.mxu0 %v9799_v25 }
 0x350   : >> { %7749 = vmatprep.mubr.bf16.mxu1 %v9842_v24  ;;  %7363 = vmatprep.subr.bf16.mxu0 %v8469_v48  ;;  %v8500_v48 = vld [vmem:[#allocation9 + $0x460] sm:$0xff]  }
 0x352   : >> { %7284 = vmatpush3.bf16.msra.mxu1 %v8467_v47  ;;  %7364 = vmatpush3.bf16.msra.mxu0 %v8471_v51  ;;  %v8497_v47 = vld [vmem:[#allocation9 + $0x458] sm:$0xff]  }
 0x353   : >> { %7285 = vmatprep.subr.bf16.mxu1 %v8468_v49  ;;  %7365 = vmatprep.subr.bf16.mxu0 %v8475_v52 }
 0x355   : >> { %3360 = vmatmul.mubr.bf16.gmra.mrb[100].mxu0 %v9806_v0  ;;  %7750 = vmatmul.mubr.bf16.gmra.mrb[4].mxu1 %v9848_v28 }
 0x356   : >> { %7286 = vmatpush3.bf16.msra.mxu1 %v8470_v53  ;;  %3367 = vmatprep.mubr.bf16.mxu0 %v9809_v2 }
 0x357   : >> { %7287 = vmatprep.subr.bf16.mxu1 %v8472_v41  ;;  %7753 = vmatprep.mubr.bf16.mxu1 %v9858_v32  ;;  %v9917_v41 = vld [vmem:[%s9648_s9 + $0x1b8] sm:$0xff] }
 0x358   : >> { %7366 = vmatpush3.bf16.msra.mxu0 %v8477_v54 }
 0x359   : >> { %7367 = vmatprep.subr.bf16.mxu0 %v8481_v46 }
 0x35a   : >> { %7288 = vmatpush3.bf16.msra.mxu1 %v8473_v55  ;;  %v8506_v55 = vld [vmem:[#allocation9 + $0x470] sm:$0xff]  }
 0x35b   : >> { %7289 = vmatprep.subr.bf16.mxu1 %v8474_v56 }
 0x35c   : >> { %7368 = vmatpush3.bf16.msra.mxu0 %v8483_v18 }
 0x35d   : >> { %3368 = vmatmul.mubr.bf16.gmra.mrb[104].mxu0 %v9817_v8  ;;  %7754 = vmatmul.mubr.bf16.gmra.mrb[8].mxu1 %v9864_v36  ;;  %v8495_v36 = vld [vmem:[#allocation9 + $0x4f8] sm:$0xff]  }
 0x35e   : >> { %7290 = vmatpush3.bf16.msra.mxu1 %v8476_v57  ;;  %3375 = vmatprep.mubr.bf16.mxu0 %v9820_v60 }
 0x35f   : >> { %7291 = vmatprep.subr.bf16.mxu1 %v8478_v58  ;;  %7757 = vmatprep.mubr.bf16.mxu1 %v6437_v40  ;;  %v8494_v40 = vld [vmem:[#allocation9 + $0x450] sm:$0xff]  }
 0x360   : >> { %v6897_v33 = vpop.f32.mrb[0].mxu0  ;;  %7369 = vmatprep.subr.bf16.mxu0 %v8486_v59 }
 0x361   : >> { %v6898_v3 = vpop.f32.mrb[1].mxu0  ;;  %7370 = vmatpush3.bf16.msra.mxu0 %v8487_v61 }
 0x362   : >> { %v9887_v39 = vadd.f32 %v6898_v3, %v6897_v33  ;;  %v6900_v4 = vpop.f32.mrb[2].mxu0  ;;  %7292 = vmatpush3.bf16.msra.mxu1 %v8479_v29  ;;  %7371 = vmatprep.subr.bf16.mxu0 %v8489_v62  ;;  %v9928_v29 = vld [vmem:[%s9648_s9 + $0x1b0] sm:$0xff] }
 0x363   : >> { %v6901_v43 = vpop.f32.mrb[3].mxu0  ;;  %7293 = vmatprep.subr.bf16.mxu1 %v8480_v63  ;;  %v6561_v63 = vld [vmem:[%s9648_s9 + $0x1e8] sm:$0xff] }
 0x364   : >> { %v9892_v9 = vadd.f32 %v6901_v43, %v6900_v4  ;;  %v8509_v4 = vld [vmem:[#allocation9 + $0x478] sm:$0xff]  }
 0x365   : >> { %3376 = vmatmul.mubr.bf16.gmra.mrb[108].mxu0 %v9826_v11  ;;  %7758 = vmatmul.mubr.bf16.gmra.mrb[12].mxu1 %v9890_v5 }
 0x366   : >> { %7294 = vmatpush3.bf16.msra.mxu1 %v8482_v6  ;;  %3383 = vmatprep.mubr.bf16.mxu0 %v9830_v16 }
 0x367   : >> { %7295 = vmatprep.subr.bf16.mxu1 %v8484_v50  ;;  %3781 = vmatprep.mubr.bf16.mxu1 %v9799_v25  ;;  %v8496_v25 = vld [vmem:[#allocation9 + $0x4b8] sm:$0xff]   ;;  %v9942_v50 = vld [vmem:[#allocation9 + $0x500] sm:$0xff]  }
 0x368   : >> { %v6903_v15 = vpop.f32.mrb[4].mxu0  ;;  %7372 = vmatpush3.bf16.msra.mxu0 %v8490_v10 }
 0x369   : >> { %v6904_v20 = vpop.f32.mrb[5].mxu0  ;;  %7373 = vmatprep.subr.bf16.mxu0 %v8492_v1 }
 0x36a   : >> { %v9898_v21 = vadd.f32 %v6904_v20, %v6903_v15  ;;  %v6906_v23 = vpop.f32.mrb[6].mxu0  ;;  %7296 = vmatpush3.bf16.msra.mxu1 %v8485_v13 }
 0x36b   : >> { %v6907_v26 = vpop.f32.mrb[7].mxu0  ;;  %7761 = vmatprep.subr.bf16.mxu1 %v8488_v14 }
 0x36c   : >> { %v9900_v34 = vadd.f32 %v6907_v26, %v6906_v23  ;;  %7374 = vmatpush3.bf16.msra.mxu0 %v8493_v19  ;;  %v6560_v19 = vld [vmem:[%s9648_s9 + $0x1e0] sm:$0xff] }
 0x36d   : >> { %3384 = vmatmul.mubr.bf16.gmra.mrb[112].mxu0 %v9839_v22  ;;  %3782 = vmatmul.mubr.bf16.vlgmr.msra.gmra.mrb[48].mxu1 %v9806_v0 }
 0x36e   : >> { %7762 = vmatpush3.bf16.msra.mxu1 %v8488_v14  ;;  %3391 = vmatprep.mubr.bf16.mxu0 %v9845_v27 }
 0x36f   : >> { %3789 = vmatprep.mubr.bf16.mxu1 %v9809_v2  ;;  %7763 = vmatprep.subr.bf16.mxu1 %v8491_v30 }
 0x370   : >> { %v6909_v42 = vpop.f32.mrb[8].mxu0  ;;  %7375 = vmatprep.subr.bf16.mxu0 %v8495_v36 }
 0x371   : >> { %v6910_v7 = vpop.f32.mrb[9].mxu0  ;;  %7376 = vmatpush3.bf16.msra.mxu0 %v8496_v25  ;;  %v9953_v25 = vld [vmem:[%s9648_s9 + $0x200] sm:$0xff] }
 0x372   : >> { %v9906_v12 = vadd.f32 %v6910_v7, %v6909_v42  ;;  %v6912_v44 = vpop.f32.mrb[10].mxu0  ;;  %7764 = vmatpush3.bf16.msra.mxu1 %v8491_v30  ;;  %7441 = vmatprep.subr.bf16.mxu0 %v8498_v37 }
 0x373   : >> { %v6913_v45 = vpop.f32.mrb[11].mxu0  ;;  %7765 = vmatprep.subr.bf16.mxu1 %v8494_v40 }
 0x374   : >> { %v9908_v0 = vadd.f32 %v6913_v45, %v6912_v44 }
 0x375   : >> { %3392 = vmatmul.mubr.bf16.gmra.mrb[116].mxu0 %v9855_v31  ;;  %3790 = vmatmul.mubr.bf16.gmra.mrb[52].mxu1 %v9817_v8  ;;  %v8503_v8 = vld [vmem:[#allocation9 + $0x468] sm:$0xff]  }
 0x376   : >> { %3399 = vmatprep.mubr.bf16.mxu0 %v9861_v35  ;;  %3797 = vmatprep.mubr.bf16.mxu1 %v9820_v60 }
 0x377   : >> { %7766 = vmatpush3.bf16.msra.mxu1 %v8494_v40  ;;  %v8502_v40 = vld [vmem:[#allocation9 + $0x548] sm:$0xff]  }
 0x378   : >> { %v6915_v2 = vpop.f32.mrb[12].mxu0  ;;  %7767 = vmatprep.subr.bf16.mxu1 %v8497_v47 }
 0x379   : >> { %v6916_v49 = vpop.f32.mrb[13].mxu0 }
 0x37a   : >> { %v9914_v51 = vadd.f32 %v6916_v49, %v6915_v2  ;;  %v6918_v52 = vpop.f32.mrb[14].mxu0 }
 0x37b   : >> { %v6919_v53 = vpop.f32.mrb[15].mxu0  ;;  %7768 = vmatpush3.bf16.msra.mxu1 %v8497_v47 }
 0x37c   : >> { %v9919_v54 = vadd.f32 %v6919_v53, %v6918_v52  ;;  %7769 = vmatprep.subr.bf16.mxu1 %v8500_v48  ;;  %v9968_v52 = vld [vmem:[%s9648_s9 + $0x218] sm:$0xff] }
 0x37d   : >> { %3400 = vmatmul.mubr.bf16.gmra.mrb[120].mxu0 %v9871_v38  ;;  %3798 = vmatmul.mubr.bf16.gmra.mrb[56].mxu1 %v9826_v11  ;;  %v8505_v53 = vld [vmem:[#allocation9 + $0x550] sm:$0xff]  }
 0x37e   : >> { %3407 = vmatprep.mubr.bf16.mxu0 %v9917_v41  ;;  %3805 = vmatprep.mubr.bf16.mxu1 %v9830_v16 }
 0x37f   : >> { %7770 = vmatpush3.bf16.msra.mxu1 %v8500_v48 }
 0x380   : >> { %v6921_v60 = vpop.f32.mrb[16].mxu0  ;;  %v6977_v46 = vpop.f32.mrb[16].mxu1  ;;  %7771 = vmatprep.subr.bf16.mxu1 %v8503_v8 }
 0x381   : >> { %v6922_v56 = vpop.f32.mrb[17].mxu0  ;;  %v6978_v18 = vpop.f32.mrb[17].mxu1 }
 0x382   : >> { %v9925_v57 = vadd.f32 %v6922_v56, %v6921_v60  ;;  %v6979_v58 = vadd.f32 %v6978_v18, %v6977_v46  ;;  %v6924_v59 = vpop.f32.mrb[18].mxu0  ;;  %v6980_v61 = vpop.f32.mrb[18].mxu1 }
 0x383   : >> { %v6925_v11 = vpop.f32.mrb[19].mxu0  ;;  %v6981_v62 = vpop.f32.mrb[19].mxu1  ;;  %7772 = vmatpush3.bf16.msra.mxu1 %v8503_v8 }
 0x384   : >> { %v9932_v16 = vadd.f32 %v6979_v58, %v9887_v39  ;;  %v9934_v33 = vadd.f32 %v6925_v11, %v6924_v59  ;;  %v6982_v3 = vadd.f32 %v6981_v62, %v6980_v61  ;;  %7773 = vmatprep.subr.bf16.mxu1 %v8506_v55  ;;  %v8511_v59 = vld [vmem:[#allocation9 + $0x5a0] sm:$0xff]  }
 0x385   : >> { %3408 = vmatmul.mubr.bf16.gmra.mrb[124].mxu0 %v9928_v29  ;;  %3806 = vmatmul.mubr.bf16.gmra.mrb[60].mxu1 %v9839_v22 }
 0x386   : >> { %v9939_v6 = vadd.f32 %v6982_v3, %v9892_v9  ;;  %3813 = vmatprep.mubr.bf16.mxu1 %v9845_v27  ;;  %4212 = vmatprep.mubr.bf16.mxu0 %v6561_v63  ;;  %v8499_v9 = vld [vmem:[#allocation9 + $0x540] sm:$0xff]   ;;  %v8501_v27 = vld [vmem:[#allocation9 + $0x588] sm:$0xff]  }
 0x387   : >> { %7774 = vmatpush3.bf16.msra.mxu1 %v8506_v55  ;;  %v8507_v55 = vld [vmem:[#allocation9 + $0x598] sm:$0xff]   ;;  %v9985_v3 = vld [vmem:[%s9648_s9 + $0x210] sm:$0xff] }
 0x388   : >> { %v6927_v43 = vpop.f32.mrb[20].mxu0  ;;  %v6983_v39 = vpop.f32.mrb[20].mxu1  ;;  %7775 = vmatprep.subr.bf16.mxu1 %v8509_v4 }
 0x389   : >> { %v6928_v10 = vpop.f32.mrb[21].mxu0  ;;  %v6984_v1 = vpop.f32.mrb[21].mxu1 }
 0x38a   : >> { %v9944_v13 = vadd.f32 %v6928_v10, %v6927_v43  ;;  %v6985_v14 = vadd.f32 %v6984_v1, %v6983_v39  ;;  %v6930_v15 = vpop.f32.mrb[22].mxu0  ;;  %v6986_v22 = vpop.f32.mrb[22].mxu1  ;;  %v6534_v43 = vld [vmem:[%s9648_s9 + $0x1d0] sm:$0xff]  ;;  %v8512_v10 = vld [vmem:[#allocation9 + $0x560] sm:$0xff]  }
 0x38b   : >> { %v6931_v20 = vpop.f32.mrb[23].mxu0  ;;  %v6987_v23 = vpop.f32.mrb[23].mxu1  ;;  %7776 = vmatpush3.bf16.msra.mxu1 %v8509_v4  ;;  %v9989_v39 = vld [vmem:[%s9648_s9 + $0x230] sm:$0xff] }
 0x38c   : >> { %v9948_v26 = vadd.f32 %v6985_v14, %v9898_v21  ;;  %v9950_v30 = vadd.f32 %v6931_v20, %v6930_v15  ;;  %v6988_v36 = vadd.f32 %v6987_v23, %v6986_v22  ;;  %7793 = vmatprep.subr.bf16.mxu1 %v9942_v50  ;;  %v8504_v21 = vld [vmem:[#allocation9 + $0x590] sm:$0xff]   ;;  %v8515_v22 = vld [vmem:[#allocation9 + $0x5a8] sm:$0xff]  }
 0x38d   : >> { %3814 = vmatmul.mubr.bf16.gmra.mrb[64].mxu1 %v9855_v31  ;;  %4213 = vmatmul.mubr.bf16.vlgmr.msra.gmra.mrb[128].mxu0 %v6560_v19  ;;  %v8519_v23 = vld [vmem:[#allocation9 + $0x5b0] sm:$0xff]  }
 0x38e   : >> { %v9958_v37 = vadd.f32 %v6988_v36, %v9900_v34  ;;  %7442 = vmatpush3.bf16.msra.mxu0 %v8499_v9  ;;  %3821 = vmatprep.mubr.bf16.mxu1 %v9861_v35  ;;  %v9965_v34 = vld [vmem:[%s9648_s9 + $0x1f8] sm:$0xff] }
 0x38f   : >> { %4220 = vmatprep.mubr.bf16.mxu0 %v9953_v25  ;;  %7443 = vmatprep.subr.bf16.mxu0 %v8501_v27 }
 0x390   : >> { %v6933_v42 = vpop.f32.mrb[24].mxu0  ;;  %v6989_v7 = vpop.f32.mrb[24].mxu1 }
 0x391   : >> { %v6934_v44 = vpop.f32.mrb[25].mxu0  ;;  %v6990_v45 = vpop.f32.mrb[25].mxu1 }
 0x392   : >> { %v9962_v47 = vadd.f32 %v6934_v44, %v6933_v42  ;;  %v6991_v31 = vadd.f32 %v6990_v45, %v6989_v7  ;;  %v6936_v2 = vpop.f32.mrb[26].mxu0  ;;  %v6992_v48 = vpop.f32.mrb[26].mxu1  ;;  %7444 = vmatpush3.bf16.msra.mxu0 %v8502_v40  ;;  %v6533_v7 = vld [vmem:[%s9648_s9 + $0x1c8] sm:$0xff] }
 0x393   : >> { %v6937_v49 = vpop.f32.mrb[27].mxu0  ;;  %v6993_v35 = vpop.f32.mrb[27].mxu1  ;;  %7445 = vmatprep.subr.bf16.mxu0 %v8504_v21 }
 0x394   : >> { %v9971_v8 = vadd.f32 %v6991_v31, %v9906_v12  ;;  %v9973_v60 = vadd.f32 %v6937_v49, %v6936_v2  ;;  %v6994_v46 = vadd.f32 %v6993_v35, %v6992_v48  ;;  %v8508_v12 = vld [vmem:[#allocation9 + $0x558] sm:$0xff]   ;;  %v10007_v31 = vld [vmem:[%s9648_s9 + $0x248] sm:$0xff]  ;;  %v8520_v2 = vld [vmem:[#allocation9 + $0x570] sm:$0xff]  }
 0x395   : >> { %3822 = vmatmul.mubr.bf16.gmra.mrb[68].mxu1 %v9871_v38  ;;  %4221 = vmatmul.mubr.bf16.gmra.mrb[132].mxu0 %v9965_v34 }
 0x396   : >> { %v9978_v56 = vadd.f32 %v6994_v46, %v9908_v0  ;;  %3829 = vmatprep.mubr.bf16.mxu1 %v9917_v41  ;;  %4228 = vmatprep.mubr.bf16.mxu0 %v9968_v52  ;;  %v8523_v46 = vld [vmem:[#allocation9 + $0x5b8] sm:$0xff]  }
 0x397   : >> { %7446 = vmatpush3.bf16.msra.mxu0 %v8505_v53 }
 0x398   : >> { %v6939_v18 = vpop.f32.mrb[28].mxu0  ;;  %v6995_v58 = vpop.f32.mrb[28].mxu1  ;;  %7447 = vmatprep.subr.bf16.mxu0 %v8507_v55 }
 0x399   : >> { %v6940_v61 = vpop.f32.mrb[29].mxu0  ;;  %v6996_v38 = vpop.f32.mrb[29].mxu1 }
 0x39a   : >> { %v9982_v11 = vadd.f32 %v6940_v61, %v6939_v18  ;;  %v6997_v62 = vadd.f32 %v6996_v38, %v6995_v58  ;;  %v6942_v63 = vpop.f32.mrb[30].mxu0  ;;  %v6998_v0 = vpop.f32.mrb[30].mxu1  ;;  %v8527_v58 = vld [vmem:[#allocation9 + $0x640] sm:$0xff]  }
 0x39b   : >> { %v6943_v41 = vpop.f32.mrb[31].mxu0  ;;  %v6999_v4 = vpop.f32.mrb[31].mxu1  ;;  %7448 = vmatpush3.bf16.msra.mxu0 %v8508_v12 }
 0x39c   : >> { %v9992_v1 = vadd.f32 %v6997_v62, %v9914_v51  ;;  %v9994_v14 = vadd.f32 %v6943_v41, %v6942_v63  ;;  %v7000_v15 = vadd.f32 %v6999_v4, %v6998_v0  ;;  %7449 = vmatprep.subr.bf16.mxu0 %v8511_v59  ;;  %v8516_v51 = vld [vmem:[#allocation9 + $0x568] sm:$0xff]   ;;  %v10025_v0 = vld [vmem:[%s9648_s9 + $0x240] sm:$0xff] }
 0x39d   : >> { %3830 = vmatmul.mubr.bf16.gmra.mrb[72].mxu1 %v9928_v29  ;;  %4229 = vmatmul.mubr.bf16.gmra.mrb[136].mxu0 %v9985_v3 }
 0x39e   : >> { %v9999_v19 = vadd.f32 %v7000_v15, %v9919_v54  ;;  %3837 = vmatprep.mubr.bf16.mxu1 %v6534_v43  ;;  %4236 = vmatprep.mubr.bf16.mxu0 %v9989_v39  ;;  %v10004_v54 = vld [vmem:[%s9648_s9 + $0x228] sm:$0xff] }
 0x39f   : >> { %7450 = vmatpush3.bf16.msra.mxu0 %v8512_v10 }
 0x3a0   : >> { %v7001_v9 = vpop.f32.mrb[32].mxu1  ;;  %v7057_v20 = vpop.f32.mrb[32].mxu0  ;;  %7451 = vmatprep.subr.bf16.mxu0 %v8515_v22  ;;  %v10034_v22 = vld [vmem:[%s9648_s9 + $0x260] sm:$0xff] }
 0x3a1   : >> { %v7002_v27 = vpop.f32.mrb[33].mxu1  ;;  %v7058_v36 = vpop.f32.mrb[33].mxu0 }
 0x3a2   : >> { %v7003_v29 = vadd.f32 %v7002_v27, %v7001_v9  ;;  %v7059_v40 = vadd.f32 %v7058_v36, %v7057_v20  ;;  %v7004_v21 = vpop.f32.mrb[34].mxu1  ;;  %v7060_v42 = vpop.f32.mrb[34].mxu0 }
 0x3a3   : >> { %v7005_v44 = vpop.f32.mrb[35].mxu1  ;;  %v7061_v45 = vpop.f32.mrb[35].mxu0  ;;  %7452 = vmatpush3.bf16.msra.mxu0 %v8516_v51 }
 0x3a4   : >> { %v10010_v48 = vadd.f32 %v7003_v29, %v9925_v57  ;;  %v10013_v49 = vadd.f32 %v9932_v16, %v7059_v40  ;;  %v7006_v35 = vadd.f32 %v7005_v44, %v7004_v21  ;;  %v7062_v53 = vadd.f32 %v7061_v45, %v7060_v42  ;;  %7453 = vmatprep.subr.bf16.mxu0 %v8519_v23  ;;  %v8524_v57 = vld [vmem:[#allocation9 + $0x578] sm:$0xff]   ;;  %v6526_v21 = vld [vmem:[%s9648_s9 + $0x190] sm:$0xff] }
 0x3a5   : >> { %3838 = vmatmul.mubr.bf16.gmra.mrb[76].mxu1 %v6533_v7  ;;  %4237 = vmatmul.mubr.bf16.gmra.mrb[140].mxu0 %v10004_v54 }
 0x3a6   : >> { %v10017_v55 = vadd.f32 %v7006_v35, %v9934_v33  ;;  %v10020_v12 = vadd.f32 %v9939_v6, %v7062_v53  ;;  %7777 = vmatprep.mubr.bf16.mxu1 %v9833_v17  ;;  %4244 = vmatprep.mubr.bf16.mxu0 %v10007_v31  ;;  %v8513_v17 = vld [vmem:[#allocation9 + $0x508] sm:$0xff]  }
 0x3a7   : >> { %7454 = vmatpush3.bf16.msra.mxu0 %v8520_v2  ;;  %v10058_v2 = vld [vmem:[%s9648_s9 + $0x278] sm:$0xff] }
 0x3a8   : >> { %v7007_v16 = vpop.f32.mrb[36].mxu1  ;;  %v7063_v18 = vpop.f32.mrb[36].mxu0  ;;  %7455 = vmatprep.subr.bf16.mxu0 %v8523_v46 }
 0x3a9   : >> { %v7008_v59 = vpop.f32.mrb[37].mxu1  ;;  %v7064_v61 = vpop.f32.mrb[37].mxu0 }
 0x3aa   : >> { %v7009_v38 = vadd.f32 %v7008_v59, %v7007_v16  ;;  %v7065_v33 = vadd.f32 %v7064_v61, %v7063_v18  ;;  %v7010_v62 = vpop.f32.mrb[38].mxu1  ;;  %v7066_v63 = vpop.f32.mrb[38].mxu0  ;;  %v6529_v59 = vld [vmem:[%s9648_s9 + $0x1a8] sm:$0xff] }
 0x3ab   : >> { %v7011_v6 = vpop.f32.mrb[39].mxu1  ;;  %v7067_v41 = vpop.f32.mrb[39].mxu0  ;;  %7456 = vmatpush3.bf16.msra.mxu0 %v8524_v57 }
 0x3ac   : >> { %v10028_v4 = vadd.f32 %v7009_v38, %v9944_v13  ;;  %v10031_v43 = vadd.f32 %v9948_v26, %v7065_v33  ;;  %v7012_v10 = vadd.f32 %v7011_v6, %v7010_v62  ;;  %v7068_v15 = vadd.f32 %v7067_v41, %v7066_v63  ;;  %7521 = vmatprep.subr.bf16.mxu0 %v8527_v58  ;;  %v8514_v13 = vld [vmem:[#allocation9 + $0x510] sm:$0xff]   ;;  %v8521_v33 = vld [vmem:[#allocation9 + $0x528] sm:$0xff]  }
 0x3ad   : >> { %7778 = vmatmul.mubr.bf16.vlgmr.msra.gmra.mrb[0].mxu1 %v9842_v24  ;;  %4245 = vmatmul.mubr.bf16.gmra.mrb[144].mxu0 %v10025_v0 }
 0x3ae   : >> { %v10039_v51 = vadd.f32 %v7012_v10, %v9950_v30  ;;  %v10042_v9 = vadd.f32 %v9958_v37, %v7068_v15  ;;  %7794 = vmatpush3.bf16.msra.mxu1 %v9942_v50  ;;  %7781 = vmatprep.mubr.bf16.mxu1 %v9848_v28  ;;  %v10048_v37 = vld [vmem:[%s9648_s9 + $0x258] sm:$0xff] }
 0x3af   : >> { %7795 = vmatprep.subr.bf16.mxu1 %v8513_v17  ;;  %4252 = vmatprep.mubr.bf16.mxu0 %v10034_v22  ;;  %v8517_v28 = vld [vmem:[#allocation9 + $0x518] sm:$0xff]  }
 0x3b0   : >> { %v7013_v26 = vpop.f32.mrb[40].mxu1  ;;  %v7069_v24 = vpop.f32.mrb[40].mxu0 }
 0x3b1   : >> { %v7014_v20 = vpop.f32.mrb[41].mxu1  ;;  %v7070_v23 = vpop.f32.mrb[41].mxu0 }
 0x3b2   : >> { %v7015_v30 = vadd.f32 %v7014_v20, %v7013_v26  ;;  %v7071_v27 = vadd.f32 %v7070_v23, %v7069_v24  ;;  %v7016_v36 = vpop.f32.mrb[42].mxu1  ;;  %v7072_v29 = vpop.f32.mrb[42].mxu0  ;;  %7796 = vmatpush3.bf16.msra.mxu1 %v8513_v17  ;;  %v10080_v17 = vld [vmem:[%s9648_s9 + $0x290] sm:$0xff]  ;;  %v6535_v20 = vld [vmem:[%s9648_s9 + $0x1d8] sm:$0xff]  ;;  %v10093_v23 = vld [vmem:[%s9648_s9 + $0x288] sm:$0xff] }
 0x3b3   : >> { %v7017_v50 = vpop.f32.mrb[43].mxu1  ;;  %v7073_v40 = vpop.f32.mrb[43].mxu0  ;;  %7797 = vmatprep.subr.bf16.mxu1 %v8514_v13 }
 0x3b4   : >> { %v10052_v42 = vadd.f32 %v7015_v30, %v9962_v47  ;;  %v10055_v7 = vadd.f32 %v9971_v8, %v7071_v27  ;;  %v7018_v44 = vadd.f32 %v7017_v50, %v7016_v36  ;;  %v7074_v45 = vadd.f32 %v7073_v40, %v7072_v29  ;;  %v8518_v47 = vld [vmem:[#allocation9 + $0x520] sm:$0xff]   ;;  %v6562_v30 = vld [vmem:[%s9648_s9 + $0x1f0] sm:$0xff] }
 0x3b5   : >> { %7782 = vmatmul.mubr.bf16.gmra.mrb[4].mxu1 %v9858_v32  ;;  %4253 = vmatmul.mubr.bf16.gmra.mrb[148].mxu0 %v10048_v37  ;;  %v8526_v29 = vld [vmem:[#allocation9 + $0x5c0] sm:$0xff]  }
 0x3b6   : >> { %v10063_v35 = vadd.f32 %v7018_v44, %v9973_v60  ;;  %v10066_v53 = vadd.f32 %v9978_v56, %v7074_v45  ;;  %7798 = vmatpush3.bf16.msra.mxu1 %v8514_v13  ;;  %7785 = vmatprep.mubr.bf16.mxu1 %v6526_v21  ;;  %v10071_v56 = vld [vmem:[%s9648_s9 + $0x270] sm:$0xff]  ;;  %v8528_v44 = vld [vmem:[#allocation9 + $0x600] sm:$0xff]  }
 0x3b7   : >> { %7799 = vmatprep.subr.bf16.mxu1 %v8517_v28  ;;  %4260 = vmatprep.mubr.bf16.mxu0 %v10058_v2 }
 0x3b8   : >> { %v7019_v8 = vpop.f32.mrb[44].mxu1  ;;  %v7075_v46 = vpop.f32.mrb[44].mxu0 }
 0x3b9   : >> { %v7020_v57 = vpop.f32.mrb[45].mxu1  ;;  %v7076_v32 = vpop.f32.mrb[45].mxu0 }
 0x3ba   : >> { %v7021_v16 = vadd.f32 %v7020_v57, %v7019_v8  ;;  %v7077_v18 = vadd.f32 %v7076_v32, %v7075_v46  ;;  %v7022_v60 = vpop.f32.mrb[46].mxu1  ;;  %v7078_v58 = vpop.f32.mrb[46].mxu0  ;;  %7800 = vmatpush3.bf16.msra.mxu1 %v8517_v28  ;;  %v10111_v46 = vld [vmem:[%s9648_s9 + $0x220] sm:$0xff]  ;;  %v8531_v57 = vld [vmem:[#allocation9 + $0x648] sm:$0xff]  }
 0x3bb   : >> { %v7023_v61 = vpop.f32.mrb[47].mxu1  ;;  %v7079_v38 = vpop.f32.mrb[47].mxu0  ;;  %7801 = vmatprep.subr.bf16.mxu1 %v8518_v47  ;;  %v8532_v32 = vld [vmem:[#allocation9 + $0x608] sm:$0xff]  }
 0x3bc   : >> { %v10074_v62 = vadd.f32 %v7021_v16, %v9982_v11  ;;  %v10077_v63 = vadd.f32 %v9992_v1, %v7077_v18  ;;  %v7024_v6 = vadd.f32 %v7023_v61, %v7022_v60  ;;  %v7080_v41 = vadd.f32 %v7079_v38, %v7078_v58  ;;  %v8522_v11 = vld [vmem:[#allocation9 + $0x530] sm:$0xff]   ;;  %v8533_v61 = vld [vmem:[#allocation9 + $0x5d8] sm:$0xff]  }
 0x3bd   : >> { %7786 = vmatmul.mubr.bf16.gmra.mrb[8].mxu1 %v6529_v59  ;;  %4261 = vmatmul.mubr.bf16.gmra.mrb[152].mxu0 %v10071_v56  ;;  %v8535_v16 = vld [vmem:[#allocation9 + $0x650] sm:$0xff]  }
 0x3be   : >> { %v10084_v10 = vadd.f32 %v7024_v6, %v9994_v14  ;;  %v10087_v15 = vadd.f32 %v9999_v19, %v7080_v41  ;;  %7802 = vmatpush3.bf16.msra.mxu1 %v8518_v47  ;;  %7789 = vmatprep.mubr.bf16.mxu1 %v9890_v5  ;;  %v8525_v19 = vld [vmem:[#allocation9 + $0x538] sm:$0xff]   ;;  %v8529_v47 = vld [vmem:[#allocation9 + $0x5c8] sm:$0xff]   ;;  %v8536_v41 = vld [vmem:[#allocation9 + $0x610] sm:$0xff]  }
 0x3bf   : >> { %7803 = vmatprep.subr.bf16.mxu1 %v8521_v33  ;;  %4268 = vmatprep.mubr.bf16.mxu0 %v10080_v17  ;;  %v10121_v59 = vld [vmem:[%s9648_s9 + $0x238] sm:$0xff]  ;;  %v10124_v38 = vld [vmem:[%s9648_s9 + $0x250] sm:$0xff] }
 0x3c0   : >> { %v7081_v1 = vpop.f32.mrb[48].mxu0 }
 0x3c1   : >> { %v7082_v13 = vpop.f32.mrb[49].mxu0 }
 0x3c2   : >> { %v7083_v26 = vadd.f32 %v7082_v13, %v7081_v1  ;;  %v7084_v24 = vpop.f32.mrb[50].mxu0  ;;  %7804 = vmatpush3.bf16.msra.mxu1 %v8521_v33 }
 0x3c3   : >> { %v7085_v14 = vpop.f32.mrb[51].mxu0  ;;  %7805 = vmatprep.subr.bf16.mxu1 %v8522_v11 }
 0x3c4   : >> { %v10097_v27 = vadd.f32 %v10010_v48, %v7083_v26  ;;  %v7086_v5 = vadd.f32 %v7085_v14, %v7084_v24  ;;  %v10105_v48 = vld [vmem:[%s9648_s9 + $0x208] sm:$0xff]  ;;  %v8540_v26 = vld [vmem:[#allocation9 + $0x618] sm:$0xff]  }
 0x3c5   : >> { %7790 = vmatmul.mubr.bf16.gmra.mrb[12].mxu1 %v6535_v20  ;;  %4269 = vmatmul.mubr.bf16.gmra.mrb[156].mxu0 %v10093_v23 }
 0x3c6   : >> { %v10101_v36 = vadd.f32 %v10017_v55, %v7086_v5  ;;  %7806 = vmatpush3.bf16.msra.mxu1 %v8522_v11  ;;  %7809 = vmatprep.mubr.bf16.mxu1 %v6562_v30  ;;  %v8539_v11 = vld [vmem:[#allocation9 + $0x658] sm:$0xff]   ;;  %v8537_v30 = vld [vmem:[#allocation9 + $0x5e8] sm:$0xff]  }
 0x3c7   : >> { %7807 = vmatprep.subr.bf16.mxu1 %v8525_v19  ;;  %4642 = vmatprep.mubr.bf16.mxu0 %v9953_v25  ;;  %v10140_v5 = vld [vmem:[%s9648_s9 + $0x280] sm:$0xff] }
 0x3c8   : >> { %v7087_v50 = vpop.f32.mrb[52].mxu0 }
 0x3c9   : >> { %v7088_v40 = vpop.f32.mrb[53].mxu0 }
 0x3ca   : >> { %v7089_v28 = vadd.f32 %v7088_v40, %v7087_v50  ;;  %v7090_v21 = vpop.f32.mrb[54].mxu0  ;;  %7808 = vmatpush3.bf16.msra.mxu1 %v8525_v19  ;;  %v10137_v19 = vld [vmem:[%s9648_s9 + $0x268] sm:$0xff] }
 0x3cb   : >> { %v7091_v45 = vpop.f32.mrb[55].mxu0  ;;  %7825 = vmatprep.subr.bf16.mxu1 %v8526_v29  ;;  %v8542_v40 = vld [vmem:[#allocation9 + $0x660] sm:$0xff]  }
 0x3cc   : >> { %v10108_v55 = vadd.f32 %v10028_v4, %v7089_v28  ;;  %v7092_v8 = vadd.f32 %v7091_v45, %v7090_v21  ;;  %v8530_v4 = vld [vmem:[#allocation9 + $0x5d0] sm:$0xff]   ;;  %v8544_v28 = vld [vmem:[#allocation9 + $0x620] sm:$0xff]  }
 0x3cd   : >> { %7810 = vmatmul.mubr.bf16.vlgmr.msra.gmra.mrb[0].mxu1 %v10105_v48  ;;  %4643 = vmatmul.mubr.bf16.vlgmr.msra.gmra.mrb[160].mxu0 %v9965_v34 }
 0x3ce   : >> { %v10116_v25 = vadd.f32 %v10039_v51, %v7092_v8  ;;  %7826 = vmatpush3.bf16.msra.mxu1 %v8526_v29  ;;  %7522 = vmatpush3.bf16.msra.mxu0 %v8528_v44  ;;  %v8546_v44 = vld [vmem:[#allocation9 + $0x668] sm:$0xff]  }
 0x3cf   : >> { %7827 = vmatprep.subr.bf16.mxu1 %v8529_v47  ;;  %7813 = vmatprep.mubr.bf16.mxu1 %v10111_v46 }
 0x3d0   : >> { %v7093_v18 = vpop.f32.mrb[56].mxu0  ;;  %4650 = vmatprep.mubr.bf16.mxu0 %v9968_v52  ;;  %7523 = vmatprep.subr.bf16.mxu0 %v8531_v57 }
 0x3d1   : >> { %v7094_v60 = vpop.f32.mrb[57].mxu0 }
 0x3d2   : >> { %v7095_v58 = vadd.f32 %v7094_v60, %v7093_v18  ;;  %v7096_v34 = vpop.f32.mrb[58].mxu0  ;;  %7828 = vmatpush3.bf16.msra.mxu1 %v8529_v47  ;;  %7524 = vmatpush3.bf16.msra.mxu0 %v8532_v32  ;;  %v10153_v32 = vld [vmem:[%s9648_s9 + $0x298] sm:$0xff]  ;;  %v8548_v60 = vld [vmem:[#allocation9 + $0x628] sm:$0xff]  }
 0x3d3   : >> { %v7097_v51 = vpop.f32.mrb[59].mxu0  ;;  %7829 = vmatprep.subr.bf16.mxu1 %v8530_v4  ;;  %7525 = vmatprep.subr.bf16.mxu0 %v8535_v16 }
 0x3d4   : >> { %v10127_v33 = vadd.f32 %v10052_v42, %v7095_v58  ;;  %v7098_v6 = vadd.f32 %v7097_v51, %v7096_v34  ;;  %v8534_v42 = vld [vmem:[#allocation9 + $0x5e0] sm:$0xff]   ;;  %v8550_v58 = vld [vmem:[#allocation9 + $0x670] sm:$0xff]  }
 0x3d5   : >> { %7814 = vmatmul.mubr.bf16.gmra.mrb[4].mxu1 %v10121_v59  ;;  %4651 = vmatmul.mubr.bf16.gmra.mrb[164].mxu0 %v9985_v3  ;;  %v8543_v51 = vld [vmem:[#allocation9 + $0x680] sm:$0xff]  }
 0x3d6   : >> { %v10132_v1 = vadd.f32 %v10063_v35, %v7098_v6  ;;  %7830 = vmatpush3.bf16.msra.mxu1 %v8530_v4  ;;  %7817 = vmatprep.mubr.bf16.mxu1 %v10124_v38  ;;  %v8541_v4 = vld [vmem:[#allocation9 + $0x5f8] sm:$0xff]  }
 0x3d7   : >> { %7831 = vmatprep.subr.bf16.mxu1 %v8533_v61  ;;  %4658 = vmatprep.mubr.bf16.mxu0 %v9989_v39 }
 0x3d8   : >> { %v7099_v13 = vpop.f32.mrb[60].mxu0  ;;  %7526 = vmatpush3.bf16.msra.mxu0 %v8536_v41 }
 0x3d9   : >> { %v7100_v24 = vpop.f32.mrb[61].mxu0  ;;  %7527 = vmatprep.subr.bf16.mxu0 %v8539_v11 }
 0x3da   : >> { %v7101_v20 = vadd.f32 %v7100_v24, %v7099_v13  ;;  %v7102_v14 = vpop.f32.mrb[62].mxu0  ;;  %7832 = vmatpush3.bf16.msra.mxu1 %v8533_v61  ;;  %v8545_v13 = vld [vmem:[#allocation9 + $0x688] sm:$0xff]   ;;  %v8554_v24 = vld [vmem:[#allocation9 + $0x678] sm:$0xff]  }
 0x3db   : >> { %v7103_v35 = vpop.f32.mrb[63].mxu0  ;;  %7833 = vmatprep.subr.bf16.mxu1 %v8534_v42 }
 0x3dc   : >> { %v10143_v29 = vadd.f32 %v10074_v62, %v7101_v20  ;;  %v7104_v50 = vadd.f32 %v7103_v35, %v7102_v14  ;;  %7528 = vmatpush3.bf16.msra.mxu0 %v8540_v26  ;;  %v8538_v62 = vld [vmem:[#allocation9 + $0x5f0] sm:$0xff]  }
 0x3dd   : >> { %7818 = vmatmul.mubr.bf16.gmra.mrb[8].mxu1 %v10137_v19  ;;  %4659 = vmatmul.mubr.bf16.gmra.mrb[168].mxu0 %v10004_v54  ;;  %v8547_v14 = vld [vmem:[#allocation9 + $0x690] sm:$0xff]  }
 0x3de   : >> { %v10148_v21 = vadd.f32 %v10084_v10, %v7104_v50  ;;  %7834 = vmatpush3.bf16.msra.mxu1 %v8534_v42  ;;  %7821 = vmatprep.mubr.bf16.mxu1 %v10140_v5 }
 0x3df   : >> { %7835 = vmatprep.subr.bf16.mxu1 %v8537_v30  ;;  %4666 = vmatprep.mubr.bf16.mxu0 %v10007_v31 }
 0x3e0   : >> { %v7137_v45 = vpop.f32.mrb[64].mxu0  ;;  %7529 = vmatprep.subr.bf16.mxu0 %v8542_v40 }
 0x3e1   : >> { %v7138_v47 = vpop.f32.mrb[65].mxu0  ;;  %7530 = vmatpush3.bf16.msra.mxu0 %v8544_v28  ;;  %v8549_v28 = vld [vmem:[#allocation9 + $0x698] sm:$0xff]  }
 0x3e2   : >> { %v7139_v8 = vadd.f32 %v7138_v47, %v7137_v45  ;;  %v7140_v57 = vpop.f32.mrb[66].mxu0  ;;  %7836 = vmatpush3.bf16.msra.mxu1 %v8537_v30  ;;  %7531 = vmatprep.subr.bf16.mxu0 %v8546_v44  ;;  %v8551_v45 = vld [vmem:[#allocation9 + $0x6a0] sm:$0xff]  }
 0x3e3   : >> { %v7141_v10 = vpop.f32.mrb[67].mxu0  ;;  %7837 = vmatprep.subr.bf16.mxu1 %v8538_v62 }
 0x3e4   : >> { %v10156_v16 = vadd.f32 %v10013_v49, %v7139_v8  ;;  %v7142_v18 = vadd.f32 %v7141_v10, %v7140_v57  ;;  %v8552_v49 = vld [vmem:[#allocation9 + $0x630] sm:$0xff]  }
 0x3e5   : >> { %7822 = vmatmul.mubr.bf16.gmra.mrb[12].mxu1 %v10153_v32  ;;  %4667 = vmatmul.mubr.bf16.gmra.mrb[172].mxu0 %v10025_v0 }
 0x3e6   : >> { %v10161_v34 = vadd.f32 %v10020_v12, %v7142_v18  ;;  %7838 = vmatpush3.bf16.msra.mxu1 %v8538_v62  ;;  %4674 = vmatprep.mubr.bf16.mxu0 %v10034_v22  ;;  %v10186_v18 = vld [vmem:[%s9648_s9 + $0x2a8] sm:$0xff] }
 0x3e7   : >> { %7839 = vmatprep.subr.bf16.mxu1 %v8541_v4  ;;  %7841 = vmatprep.mubr.bf16.mxu1 %v10105_v48  ;;  %v8556_v48 = vld [vmem:[#allocation9 + $0x638] sm:$0xff]  }
 0x3e8   : >> { %v7143_v61 = vpop.f32.mrb[68].mxu0  ;;  %7532 = vmatpush3.bf16.msra.mxu0 %v8548_v60 }
 0x3e9   : >> { %v7144_v6 = vpop.f32.mrb[69].mxu0  ;;  %7533 = vmatprep.subr.bf16.mxu0 %v8550_v58 }
 0x3ea   : >> { %v7145_v41 = vadd.f32 %v7144_v6, %v7143_v61  ;;  %v7146_v11 = vpop.f32.mrb[70].mxu0  ;;  %7840 = vmatpush3.bf16.msra.mxu1 %v8541_v4  ;;  %v8553_v4 = vld [vmem:[#allocation9 + $0x6a8] sm:$0xff]  }
 0x3eb   : >> { %v7147_v42 = vpop.f32.mrb[71].mxu0  ;;  %7857 = vmatprep.subr.bf16.mxu1 %v8543_v51 }
 0x3ec   : >> { %v10166_v12 = vadd.f32 %v10031_v43, %v7145_v41  ;;  %v7148_v26 = vadd.f32 %v7147_v42, %v7146_v11  ;;  %7534 = vmatpush3.bf16.msra.mxu0 %v8552_v49  ;;  %v10199_v41 = vld [vmem:[%s9648_s9 + $0x2a0] sm:$0xff]  ;;  %v6632_v11 = vld [vmem:[%s9648_s9 + $0x2b0] sm:$0xff] }
 0x3ed   : >> { %4675 = vmatmul.mubr.bf16.gmra.mrb[176].mxu0 %v10048_v37  ;;  %7842 = vmatmul.mubr.bf16.vlgmr.msra.gmra.mrb[0].mxu1 %v10111_v46 }
 0x3ee   : >> { %v10171_v20 = vadd.f32 %v10042_v9, %v7148_v26  ;;  %7858 = vmatpush3.bf16.msra.mxu1 %v8543_v51  ;;  %4682 = vmatprep.mubr.bf16.mxu0 %v10058_v2  ;;  %v8555_v51 = vld [vmem:[#allocation9 + $0x6b0] sm:$0xff]  }
 0x3ef   : >> { %7859 = vmatprep.subr.bf16.mxu1 %v8545_v13  ;;  %7845 = vmatprep.mubr.bf16.mxu1 %v10121_v59 }
 0x3f0   : >> { %v7149_v43 = vpop.f32.mrb[72].mxu0  ;;  %7535 = vmatprep.subr.bf16.mxu0 %v8554_v24 }
 0x3f1   : >> { %v7150_v35 = vpop.f32.mrb[73].mxu0  ;;  %7536 = vmatpush3.bf16.msra.mxu0 %v8556_v48 }
 0x3f2   : >> { %v7151_v30 = vadd.f32 %v7150_v35, %v7149_v43  ;;  %v7152_v50 = vpop.f32.mrb[74].mxu0  ;;  %7860 = vmatpush3.bf16.msra.mxu1 %v8545_v13  ;;  %v8557_v13 = vld [vmem:[#allocation9 + $0x6b8] sm:$0xff]  }
 0x3f3   : >> { %v7153_v40 = vpop.f32.mrb[75].mxu0  ;;  %7861 = vmatprep.subr.bf16.mxu1 %v8547_v14 }
 0x3f4   : >> { %v10176_v9 = vadd.f32 %v10055_v7, %v7151_v30  ;;  %v7154_v44 = vadd.f32 %v7153_v40, %v7152_v50 }
 0x3f5   : >> { %4683 = vmatmul.mubr.bf16.gmra.mrb[180].mxu0 %v10071_v56  ;;  %7846 = vmatmul.mubr.bf16.gmra.mrb[4].mxu1 %v10124_v38 }
 0x3f6   : >> { %v10181_v62 = vadd.f32 %v10066_v53, %v7154_v44  ;;  %7862 = vmatpush3.bf16.msra.mxu1 %v8547_v14  ;;  %4690 = vmatprep.mubr.bf16.mxu0 %v10080_v17 }
 0x3f7   : >> { %7863 = vmatprep.subr.bf16.mxu1 %v8549_v28  ;;  %7849 = vmatprep.mubr.bf16.mxu1 %v10137_v19 }
 0x3f8   : >> { %v7155_v47 = vpop.f32.mrb[76].mxu0 }
 0x3f9   : >> { %v7156_v8 = vpop.f32.mrb[77].mxu0 }
 0x3fa   : >> { %v7157_v7 = vadd.f32 %v7156_v8, %v7155_v47  ;;  %v7158_v57 = vpop.f32.mrb[78].mxu0  ;;  %7864 = vmatpush3.bf16.msra.mxu1 %v8549_v28 }
 0x3fb   : >> { %v7159_v10 = vpop.f32.mrb[79].mxu0  ;;  %7865 = vmatprep.subr.bf16.mxu1 %v8551_v45 }
 0x3fc   : >> { %v10189_v53 = vadd.f32 %v10077_v63, %v7157_v7  ;;  %v7160_v60 = vadd.f32 %v7159_v10, %v7158_v57  ;;  %v6681_v7 = vld [vmem:[%s9648_s9 + $0x2c8] sm:$0xff] }
 0x3fd   : >> { %4691 = vmatmul.mubr.bf16.gmra.mrb[184].mxu0 %v10093_v23  ;;  %7850 = vmatmul.mubr.bf16.gmra.mrb[8].mxu1 %v10140_v5 }
 0x3fe   : >> { %v10194_v58 = vadd.f32 %v10087_v15, %v7160_v60  ;;  %7866 = vmatpush3.bf16.msra.mxu1 %v8551_v45  ;;  %4698 = vmatprep.mubr.bf16.mxu0 %v10186_v18 }
 0x3ff   : >> { %7867 = vmatprep.subr.bf16.mxu1 %v8553_v4  ;;  %7853 = vmatprep.mubr.bf16.mxu1 %v10153_v32 }
 0x400   : >> { %v7161_v61 = vpop.f32.mrb[80].mxu0 }
 0x401   : >> { %v7162_v49 = vpop.f32.mrb[81].mxu0 }
 0x402   : >> { %v7163_v63 = vadd.f32 %v7162_v49, %v7161_v61  ;;  %v7164_v6 = vpop.f32.mrb[82].mxu0  ;;  %7868 = vmatpush3.bf16.msra.mxu1 %v8553_v4 }
 0x403   : >> { %v7165_v42 = vpop.f32.mrb[83].mxu0  ;;  %7869 = vmatprep.subr.bf16.mxu1 %v8555_v51 }
 0x404   : >> { %v10203_v15 = vadd.f32 %v10097_v27, %v7163_v63  ;;  %v7166_v26 = vadd.f32 %v7165_v42, %v7164_v6 }
 0x405   : >> { %4699 = vmatmul.mubr.bf16.gmra.mrb[188].mxu0 %v10199_v41  ;;  %7854 = vmatmul.mubr.bf16.gmra.mrb[12].mxu1 %v6632_v11 }
 0x406   : >> { %v10207_v24 = vadd.f32 %v10101_v36, %v7166_v26  ;;  %7870 = vmatpush3.bf16.msra.mxu1 %v8555_v51  ;;  %5072 = vmatprep.mubr.bf16.mxu0 %v9968_v52  ;;  %v6680_v26 = vld [vmem:[%s9648_s9 + $0x2c0] sm:$0xff] }
 0x407   : >> { %7871 = vmatprep.subr.bf16.mxu1 %v8557_v13  ;;  %7873 = vmatprep.mubr.bf16.mxu1 %v10111_v46 }
 0x408   : >> { %v7167_v48 = vpop.f32.mrb[84].mxu0 }
 0x409   : >> { %v7168_v14 = vpop.f32.mrb[85].mxu0 }
 0x40a   : >> { %v7169_v43 = vadd.f32 %v7168_v14, %v7167_v48  ;;  %v7170_v35 = vpop.f32.mrb[86].mxu0  ;;  %7872 = vmatpush3.bf16.msra.mxu1 %v8557_v13 }
 0x40b   : >> { %v7171_v27 = vpop.f32.mrb[87].mxu0 }
 0x40c   : >> { %v10212_v30 = vadd.f32 %v10108_v55, %v7169_v43  ;;  %v7172_v50 = vadd.f32 %v7171_v27, %v7170_v35 }
 0x40d   : >> { %5073 = vmatmul.mubr.bf16.vlgmr.msra.gmra.mrb[192].mxu0 %v9985_v3  ;;  %7874 = vmatmul.mubr.bf16.vlgmr.msra.gmra.mrb[0].mxu1 %v10121_v59 }
 0x40e   : >> { %v10217_v36 = vadd.f32 %v10116_v25, %v7172_v50  ;;  %5080 = vmatprep.mubr.bf16.mxu0 %v9989_v39  ;;  %7877 = vmatprep.mubr.bf16.mxu1 %v10124_v38 }
 0x410   : >> { %v7173_v52 = vpop.f32.mrb[88].mxu0 }
 0x411   : >> { %v7174_v46 = vpop.f32.mrb[89].mxu0 }
 0x412   : >> { %v7175_v40 = vadd.f32 %v7174_v46, %v7173_v52  ;;  %v7176_v28 = vpop.f32.mrb[90].mxu0  ;;  %v6679_v46 = vld [vmem:[%s9648_s9 + $0x2b8] sm:$0xff] }
 0x413   : >> { %v7177_v44 = vpop.f32.mrb[91].mxu0 }
 0x414   : >> { %v10222_v55 = vadd.f32 %v10127_v33, %v7175_v40  ;;  %v7178_v45 = vadd.f32 %v7177_v44, %v7176_v28 }
 0x415   : >> { %5081 = vmatmul.mubr.bf16.gmra.mrb[196].mxu0 %v10004_v54  ;;  %7878 = vmatmul.mubr.bf16.gmra.mrb[4].mxu1 %v10137_v19 }
 0x416   : >> { %v10227_v3 = vadd.f32 %v10132_v1, %v7178_v45  ;;  %5088 = vmatprep.mubr.bf16.mxu0 %v10007_v31  ;;  %7881 = vmatprep.mubr.bf16.mxu1 %v10140_v5 }
 0x418   : >> { %v7179_v39 = vpop.f32.mrb[92].mxu0 }
 0x419   : >> { %v7180_v25 = vpop.f32.mrb[93].mxu0 }
 0x41a   : >> { %v7181_v59 = vadd.f32 %v7180_v25, %v7179_v39  ;;  %v7182_v38 = vpop.f32.mrb[94].mxu0 }
 0x41b   : >> { %v7183_v47 = vpop.f32.mrb[95].mxu0 }
 0x41c   : >> { %v10232_v33 = vadd.f32 %v10143_v29, %v7181_v59  ;;  %v7184_v8 = vadd.f32 %v7183_v47, %v7182_v38 }
 0x41d   : >> { %5089 = vmatmul.mubr.bf16.gmra.mrb[200].mxu0 %v10025_v0  ;;  %7882 = vmatmul.mubr.bf16.gmra.mrb[8].mxu1 %v10153_v32 }
 0x41e   : >> { %v10237_v54 = vadd.f32 %v10148_v21, %v7184_v8  ;;  %5096 = vmatprep.mubr.bf16.mxu0 %v10034_v22  ;;  %7885 = vmatprep.mubr.bf16.mxu1 %v6632_v11 }
 0x420   : >> { %v7217_v31 = vpop.f32.mrb[96].mxu0 }
 0x421   : >> { %v7218_v1 = vpop.f32.mrb[97].mxu0 }
 0x422   : >> { %v7219_v19 = vadd.f32 %v7218_v1, %v7217_v31  ;;  %v7220_v5 = vpop.f32.mrb[98].mxu0 }
 0x423   : >> { %v7221_v57 = vpop.f32.mrb[99].mxu0 }
 0x424   : >> { %v7917_v29 = vadd.f32 %v10156_v16, %v7219_v19  ;;  %v7222_v10 = vadd.f32 %v7221_v57, %v7220_v5 }
 0x425   : >> { %5097 = vmatmul.mubr.bf16.gmra.mrb[204].mxu0 %v10048_v37  ;;  %7886 = vmatmul.mubr.bf16.gmra.mrb[12].mxu1 %v6681_v7 }
 0x426   : >> { %v7935_v0 = vadd.f32 %v10161_v34, %v7222_v10  ;;  %5104 = vmatprep.mubr.bf16.mxu0 %v10058_v2 }
 0x428   : >> { %v7223_v21 = vpop.f32.mrb[100].mxu0 }
 0x429   : >> { %v7224_v32 = vpop.f32.mrb[101].mxu0 }
 0x42a   : >> { %v7225_v22 = vadd.f32 %v7224_v32, %v7223_v21  ;;  %v7226_v4 = vpop.f32.mrb[102].mxu0  ;;  %v8560_v21 = vld [vmem:[#allocation12 + $0x4] ss:$16 sps:$4 sm:$0xff]   ;;  %v10286_v32 = vld [vmem:[#allocation12 + $0xc] ss:$16 sps:$4 sm:$0xff]  }
 0x42b   : >> { %v7227_v60 = vpop.f32.mrb[103].mxu0  ;;  %5578 = vmatprep.subr.bf16.mxu1 %v8560_v21  ;;  %5691 = vmatprep.subr.bf16.mxu0 %v10286_v32 }
 0x42c   : >> { %v7908_v51 = vadd.f32 %v10166_v12, %v7225_v22  ;;  %v7228_v61 = vadd.f32 %v7227_v60, %v7226_v4  ;;  %v8558_v22 = vld [vmem:[#allocation12] ss:$16 sps:$4 sm:$0xff]   ;;  %v10288_v4 = vld [vmem:[#allocation12 + $0x8] ss:$16 sps:$4 sm:$0xff]  }
 0x42d   : >> { %5105 = vmatmul.mubr.bf16.gmra.mrb[208].mxu0 %v10071_v56  ;;  %5579 = vmatpush1.bf16.msra.mxu1 %v8558_v22 }
 0x42e   : >> { %v7926_v16 = vadd.f32 %v10171_v20, %v7228_v61  ;;  %5112 = vmatprep.mubr.bf16.mxu0 %v10080_v17  ;;  %5692 = vmatpush1.bf16.msra.mxu0 %v10288_v4 }
 0x430   : >> { %v7229_v37 = vpop.f32.mrb[104].mxu0 }
 0x431   : >> { %v7230_v49 = vpop.f32.mrb[105].mxu0 }
 0x432   : >> { %v7231_v34 = vadd.f32 %v7230_v49, %v7229_v37  ;;  %v7232_v63 = vpop.f32.mrb[106].mxu0 }
 0x433   : >> { %v7233_v2 = vpop.f32.mrb[107].mxu0 }
 0x434   : >> { %v10250_v6 = vadd.f32 %v10176_v9, %v7231_v34  ;;  %v7234_v11 = vadd.f32 %v7233_v2, %v7232_v63  ;;  %v8566_v34 = vld [vmem:[#allocation12 + $0x24] ss:$16 sps:$4 sm:$0xff]   ;;  %v10292_v63 = vld [vmem:[#allocation12 + $0x2c] ss:$16 sps:$4 sm:$0xff]  }
 0x435   : >> { %5113 = vmatmul.mubr.bf16.gmra.mrb[212].mxu0 %v10093_v23  ;;  %5580 = vmatprep.subr.bf16.mxu1 %v8566_v34 }
 0x436   : >> { %v10254_v12 = vadd.f32 %v10181_v62, %v7234_v11  ;;  %5120 = vmatprep.mubr.bf16.mxu0 %v10186_v18  ;;  %5693 = vmatprep.subr.bf16.mxu0 %v10292_v63 }
 0x438   : >> { %v7235_v56 = vpop.f32.mrb[108].mxu0 }
 0x439   : >> { %v7236_v20 = vpop.f32.mrb[109].mxu0 }
 0x43a   : >> { %v7237_v17 = vadd.f32 %v7236_v20, %v7235_v56  ;;  %v7238_v42 = vpop.f32.mrb[110].mxu0  ;;  %v8564_v56 = vld [vmem:[#allocation12 + $0x20] ss:$16 sps:$4 sm:$0xff]   ;;  %v10294_v20 = vld [vmem:[#allocation12 + $0x28] ss:$16 sps:$4 sm:$0xff]  }
 0x43b   : >> { %v7239_v13 = vpop.f32.mrb[111].mxu0  ;;  %5581 = vmatpush1.bf16.msra.mxu1 %v8564_v56  ;;  %5694 = vmatpush1.bf16.msra.mxu0 %v10294_v20 }
 0x43c   : >> { %v10259_v48 = vadd.f32 %v10189_v53, %v7237_v17  ;;  %v7240_v9 = vadd.f32 %v7239_v13, %v7238_v42 }
 0x43d   : >> { %5121 = vmatmul.mubr.bf16.gmra.mrb[216].mxu0 %v10199_v41 }
 0x43e   : >> { %v10263_v23 = vadd.f32 %v10194_v58, %v7240_v9  ;;  %5128 = vmatprep.mubr.bf16.mxu0 %v6680_v26 }
 0x440   : >> { %v7241_v62 = vpop.f32.mrb[112].mxu0  ;;  %v7297_v14 = vpop.f32.mrb[48].mxu1 }
 0x441   : >> { %v7242_v18 = vpop.f32.mrb[113].mxu0  ;;  %v7298_v43 = vpop.f32.mrb[49].mxu1 }
 0x442   : >> { %v7243_v35 = vadd.f32 %v7242_v18, %v7241_v62  ;;  %v7299_v27 = vadd.f32 %v7298_v43, %v7297_v14  ;;  %v7244_v50 = vpop.f32.mrb[114].mxu0  ;;  %v7300_v52 = vpop.f32.mrb[50].mxu1  ;;  %v8572_v14 = vld [vmem:[#allocation12 + $0x44] ss:$16 sps:$4 sm:$0xff]   ;;  %v8570_v18 = vld [vmem:[#allocation12 + $0x40] ss:$16 sps:$4 sm:$0xff]  }
 0x443   : >> { %v7245_v40 = vpop.f32.mrb[115].mxu0  ;;  %v7301_v28 = vpop.f32.mrb[51].mxu1  ;;  %5582 = vmatprep.subr.bf16.mxu1 %v8572_v14  ;;  %v8596_v14 = vld [vmem:[#allocation12 + $0xc4] ss:$16 sps:$4 sm:$0xff]  }
 0x444   : >> { %v10267_v53 = vadd.f32 %v10203_v15, %v7243_v35  ;;  %v10269_v44 = vadd.f32 %v7917_v29, %v7299_v27  ;;  %v7246_v41 = vadd.f32 %v7245_v40, %v7244_v50  ;;  %v7302_v58 = vadd.f32 %v7301_v28, %v7300_v52  ;;  %5583 = vmatpush1.bf16.msra.mxu1 %v8570_v18  ;;  %v8578_v40 = vld [vmem:[#allocation12 + $0x64] ss:$16 sps:$4 sm:$0xff]   ;;  %v10316_v28 = vld [vmem:[#allocation12 + $0x6c] ss:$16 sps:$4 sm:$0xff]   ;;  %v8594_v18 = vld [vmem:[#allocation12 + $0xc0] ss:$16 sps:$4 sm:$0xff]  }
 0x445   : >> { %5129 = vmatmul.mubr.bf16.gmra.mrb[220].mxu0 %v6679_v46  ;;  %5584 = vmatprep.subr.bf16.mxu1 %v8578_v40 }
 0x446   : >> { %v10272_v45 = vadd.f32 %v10207_v24, %v7246_v41  ;;  %v10274_v39 = vadd.f32 %v7935_v0, %v7302_v58 }
 0x448   : >> { %v7247_v25 = vpop.f32.mrb[116].mxu0  ;;  %v7303_v59 = vpop.f32.mrb[52].mxu1 }
 0x449   : >> { %v7248_v38 = vpop.f32.mrb[117].mxu0  ;;  %v7304_v47 = vpop.f32.mrb[53].mxu1 }
 0x44a   : >> { %v7249_v8 = vadd.f32 %v7248_v38, %v7247_v25  ;;  %v7305_v31 = vadd.f32 %v7304_v47, %v7303_v59  ;;  %v7250_v1 = vpop.f32.mrb[118].mxu0  ;;  %v7306_v19 = vpop.f32.mrb[54].mxu1  ;;  %v8576_v25 = vld [vmem:[#allocation12 + $0x60] ss:$16 sps:$4 sm:$0xff]   ;;  %v10318_v59 = vld [vmem:[#allocation12 + $0x68] ss:$16 sps:$4 sm:$0xff]  }
 0x44b   : >> { %v7251_v15 = vpop.f32.mrb[119].mxu0  ;;  %v7307_v5 = vpop.f32.mrb[55].mxu1  ;;  %5585 = vmatpush1.bf16.msra.mxu1 %v8576_v25  ;;  %v10366_v25 = vld [vmem:[#allocation12 + $0xe8] ss:$16 sps:$4 sm:$0xff]  }
 0x44c   : >> { %v10277_v7 = vadd.f32 %v10212_v30, %v7249_v8  ;;  %v10279_v57 = vadd.f32 %v7908_v51, %v7305_v31  ;;  %v7252_v29 = vadd.f32 %v7251_v15, %v7250_v1  ;;  %v7308_v24 = vadd.f32 %v7307_v5, %v7306_v19  ;;  %v8584_v15 = vld [vmem:[#allocation12 + $0x84] ss:$16 sps:$4 sm:$0xff]   ;;  %v8582_v5 = vld [vmem:[#allocation12 + $0x80] ss:$16 sps:$4 sm:$0xff]  }
 0x44d   : >> { %5586 = vmatprep.subr.bf16.mxu1 %v8584_v15 }
 0x44e   : >> { %v10282_v10 = vadd.f32 %v10217_v36, %v7252_v29  ;;  %v10284_v0 = vadd.f32 %v7926_v16, %v7308_v24 }
 0x44f   : >> { %5587 = vmatpush1.bf16.msra.mxu1 %v8582_v5 }
 0x450   : >> { %v7253_v60 = vpop.f32.mrb[120].mxu0  ;;  %v7309_v61 = vpop.f32.mrb[56].mxu1 }
 0x451   : >> { %v7254_v30 = vpop.f32.mrb[121].mxu0  ;;  %v7310_v51 = vpop.f32.mrb[57].mxu1 }
 0x452   : >> { %v7255_v36 = vadd.f32 %v7254_v30, %v7253_v60  ;;  %v7311_v37 = vadd.f32 %v7310_v51, %v7309_v61  ;;  %v7256_v16 = vpop.f32.mrb[122].mxu0  ;;  %v7312_v49 = vpop.f32.mrb[58].mxu1  ;;  %v8590_v30 = vld [vmem:[#allocation12 + $0xa4] ss:$16 sps:$4 sm:$0xff]   ;;  %v10340_v51 = vld [vmem:[#allocation12 + $0xac] ss:$16 sps:$4 sm:$0xff]  }
 0x453   : >> { %v7257_v2 = vpop.f32.mrb[123].mxu0  ;;  %v7313_v11 = vpop.f32.mrb[59].mxu1  ;;  %5588 = vmatprep.subr.bf16.mxu1 %v8590_v30 }
 0x454   : >> { %v10297_v17 = vadd.f32 %v10222_v55, %v7255_v36  ;;  %v10300_v42 = vadd.f32 %v10250_v6, %v7311_v37  ;;  %v7258_v13 = vadd.f32 %v7257_v2, %v7256_v16  ;;  %v7314_v26 = vadd.f32 %v7313_v11, %v7312_v49  ;;  %v10310_v55 = vld [vmem:[#allocation12 + $0x4c] ss:$16 sps:$4 sm:$0xff]   ;;  %v10312_v6 = vld [vmem:[#allocation12 + $0x48] ss:$16 sps:$4 sm:$0xff]   ;;  %v8588_v16 = vld [vmem:[#allocation12 + $0xa0] ss:$16 sps:$4 sm:$0xff]  }
 0x455   : >> { %5695 = vmatprep.subr.bf16.mxu0 %v10310_v55  ;;  %v10342_v49 = vld [vmem:[#allocation12 + $0xa8] ss:$16 sps:$4 sm:$0xff]   ;;  %5589 = vmatpush1.bf16.msra.mxu1 %v8588_v16 }
 0x456   : >> { %v10304_v9 = vadd.f32 %v10227_v3, %v7258_v13  ;;  %v10307_v62 = vadd.f32 %v10254_v12, %v7314_v26  ;;  %5696 = vmatpush1.bf16.msra.mxu0 %v10312_v6  ;;  %5590 = vmatprep.subr.bf16.mxu1 %v8596_v14 }
 0x457   : >> { %5697 = vmatprep.subr.bf16.mxu0 %v10316_v28 }
 0x458   : >> { %v7259_v43 = vpop.f32.mrb[124].mxu0  ;;  %v7315_v35 = vpop.f32.mrb[60].mxu1 }
 0x459   : >> { %v7260_v27 = vpop.f32.mrb[125].mxu0  ;;  %v7316_v50 = vpop.f32.mrb[61].mxu1  ;;  %5591 = vmatpush1.bf16.msra.mxu1 %v8594_v18 }
 0x45a   : >> { %v7261_v3 = vadd.f32 %v7260_v27, %v7259_v43  ;;  %v7317_v52 = vadd.f32 %v7316_v50, %v7315_v35  ;;  %v7262_v12 = vpop.f32.mrb[126].mxu0  ;;  %v7318_v46 = vpop.f32.mrb[62].mxu1  ;;  %5698 = vmatpush1.bf16.msra.mxu0 %v10318_v59 }
 0x45b   : >> { %v7263_v41 = vpop.f32.mrb[127].mxu0  ;;  %v7319_v58 = vpop.f32.mrb[63].mxu1 }
 0x45c   : >> { %v10321_v38 = vadd.f32 %v10232_v33, %v7261_v3  ;;  %v10324_v47 = vadd.f32 %v10259_v48, %v7317_v52  ;;  %v7264_v8 = vadd.f32 %v7263_v41, %v7262_v12  ;;  %v7320_v31 = vadd.f32 %v7319_v58, %v7318_v46  ;;  %v10334_v33 = vld [vmem:[#allocation12 + $0x8c] ss:$16 sps:$4 sm:$0xff]   ;;  %v10336_v48 = vld [vmem:[#allocation12 + $0x88] ss:$16 sps:$4 sm:$0xff]   ;;  %v8602_v12 = vld [vmem:[#allocation12 + $0xe4] ss:$16 sps:$4 sm:$0xff]  }
 0x45d   : >> { %5699 = vmatprep.subr.bf16.mxu0 %v10334_v33  ;;  %v10364_v46 = vld [vmem:[#allocation12 + $0xec] ss:$16 sps:$4 sm:$0xff]   ;;  %v8600_v58 = vld [vmem:[#allocation12 + $0xe0] ss:$16 sps:$4 sm:$0xff]   ;;  %5592 = vmatprep.subr.bf16.mxu1 %v8602_v12 }
 0x45e   : >> { %v10328_v1 = vadd.f32 %v10237_v54, %v7264_v8  ;;  %v10331_v19 = vadd.f32 %v10263_v23, %v7320_v31  ;;  %5700 = vmatpush1.bf16.msra.mxu0 %v10336_v48  ;;  %5593 = vmatpush1.bf16.msra.mxu1 %v8600_v58 }
 0x45f   : >> { %5701 = vmatprep.subr.bf16.mxu0 %v10340_v51  ;;  %7889 = vmatprep.subr.bf16.mxu1 %v10286_v32 }
 0x460   : >> { %v7321_v29 = vpop.f32.mrb[64].mxu1  ;;  %v7377_v24 = vpop.f32.mrb[128].mxu0 }
 0x461   : >> { %v7322_v21 = vpop.f32.mrb[65].mxu1  ;;  %v7378_v22 = vpop.f32.mrb[129].mxu0 }
 0x462   : >> { %v7323_v54 = vadd.f32 %v7322_v21, %v7321_v29  ;;  %v7379_v60 = vadd.f32 %v7378_v22, %v7377_v24  ;;  %v7324_v23 = vpop.f32.mrb[66].mxu1  ;;  %v7380_v61 = vpop.f32.mrb[130].mxu0  ;;  %5702 = vmatpush1.bf16.msra.mxu0 %v10342_v49  ;;  %v8914_v21 = vmov 0  }
 0x463   : >> { %v7325_v36 = vpop.f32.mrb[67].mxu1  ;;  %v7381_v37 = vpop.f32.mrb[131].mxu0  ;;  %5610 = vmatprep.mubr.bf16.mxu1 %v8914_v21  ;;  %5723 = vmatprep.mubr.bf16.mxu0 %v8914_v21 }
 0x464   : >> { %v10345_v34 = vadd.f32 %v10267_v53, %v7323_v54  ;;  %v10348_v2 = vadd.f32 %v10269_v44, %v7379_v60  ;;  %v7326_v11 = vadd.f32 %v7325_v36, %v7324_v23  ;;  %v7382_v56 = vadd.f32 %v7381_v37, %v7380_v61  ;;  %v10358_v53 = vld [vmem:[#allocation12 + $0xcc] ss:$16 sps:$4 sm:$0xff]   ;;  %v10360_v44 = vld [vmem:[#allocation12 + $0xc8] ss:$16 sps:$4 sm:$0xff]  }
 0x465   : >> { %5703 = vmatprep.subr.bf16.mxu0 %v10358_v53 }
 0x466   : >> { %v10352_v13 = vadd.f32 %v10272_v45, %v7326_v11  ;;  %v10355_v26 = vadd.f32 %v10274_v39, %v7382_v56  ;;  %5704 = vmatpush1.bf16.msra.mxu0 %v10360_v44 }
 0x467   : >> { %5705 = vmatprep.subr.bf16.mxu0 %v10364_v46 }
 0x468   : >> { %v7327_v43 = vpop.f32.mrb[68].mxu1  ;;  %v7383_v35 = vpop.f32.mrb[132].mxu0 }
 0x469   : >> { %v7328_v27 = vpop.f32.mrb[69].mxu1  ;;  %v7384_v50 = vpop.f32.mrb[133].mxu0 }
 0x46a   : >> { %v7329_v45 = vadd.f32 %v7328_v27, %v7327_v43  ;;  %v7385_v3 = vadd.f32 %v7384_v50, %v7383_v35  ;;  %v7330_v39 = vpop.f32.mrb[70].mxu1  ;;  %v7386_v52 = vpop.f32.mrb[134].mxu0  ;;  %5706 = vmatpush1.bf16.msra.mxu0 %v10366_v25 }
 0x46b   : >> { %v7331_v40 = vpop.f32.mrb[71].mxu1  ;;  %v7387_v41 = vpop.f32.mrb[135].mxu0 }
 0x46c   : >> { %v7981_v8 = vadd.f32 %v10277_v7, %v7329_v45  ;;  %v10370_v31 = vadd.f32 %v10279_v57, %v7385_v3  ;;  %v7332_v15 = vadd.f32 %v7331_v40, %v7330_v39  ;;  %v7388_v5 = vadd.f32 %v7387_v41, %v7386_v52 }
 0x46e   : >> { %v7999_v29 = vadd.f32 %v10282_v10, %v7332_v15  ;;  %v10375_v24 = vadd.f32 %v10284_v0, %v7388_v5 }
 0x470   : >> { %v7333_v7 = vpop.f32.mrb[72].mxu1  ;;  %v7389_v57 = vpop.f32.mrb[136].mxu0 }
 0x471   : >> { %v7334_v22 = vpop.f32.mrb[73].mxu1  ;;  %v7390_v54 = vpop.f32.mrb[137].mxu0 }
 0x472   : >> { %v7335_v60 = vadd.f32 %v7334_v22, %v7333_v7  ;;  %v7391_v23 = vadd.f32 %v7390_v54, %v7389_v57  ;;  %v7336_v61 = vpop.f32.mrb[74].mxu1  ;;  %v7392_v10 = vpop.f32.mrb[138].mxu0 }
 0x473   : >> { %v7337_v30 = vpop.f32.mrb[75].mxu1  ;;  %v7393_v0 = vpop.f32.mrb[139].mxu0 }
 0x474   : >> { %v8026_v36 = vadd.f32 %v10297_v17, %v7335_v60  ;;  %v10383_v37 = vadd.f32 %v10300_v42, %v7391_v23  ;;  %v7338_v32 = vadd.f32 %v7337_v30, %v7336_v61  ;;  %v7394_v16 = vadd.f32 %v7393_v0, %v7392_v10 }
 0x476   : >> { %v8044_v11 = vadd.f32 %v10304_v9, %v7338_v32  ;;  %v10387_v56 = vadd.f32 %v10307_v62, %v7394_v16 }
 0x478   : >> { %v7339_v14 = vpop.f32.mrb[76].mxu1  ;;  %v7395_v18 = vpop.f32.mrb[140].mxu0 }
 0x479   : >> { %v7340_v43 = vpop.f32.mrb[77].mxu1  ;;  %v7396_v35 = vpop.f32.mrb[141].mxu0 }
 0x47a   : >> { %v7341_v27 = vadd.f32 %v7340_v43, %v7339_v14  ;;  %v7397_v50 = vadd.f32 %v7396_v35, %v7395_v18  ;;  %v7342_v45 = vpop.f32.mrb[78].mxu1  ;;  %v7398_v3 = vpop.f32.mrb[142].mxu0 }
 0x47b   : >> { %v7343_v39 = vpop.f32.mrb[79].mxu1  ;;  %v7399_v17 = vpop.f32.mrb[143].mxu0 }
 0x47c   : >> { %v8017_v42 = vadd.f32 %v10321_v38, %v7341_v27  ;;  %v10391_v52 = vadd.f32 %v10324_v47, %v7397_v50  ;;  %v7344_v12 = vadd.f32 %v7343_v39, %v7342_v45  ;;  %v7400_v9 = vadd.f32 %v7399_v17, %v7398_v3 }
 0x47e   : >> { %v8035_v62 = vadd.f32 %v10328_v1, %v7344_v12  ;;  %v10395_v40 = vadd.f32 %v10331_v19, %v7400_v9 }
 0x480   : >> { %v7401_v41 = vpop.f32.mrb[144].mxu0 }
 0x481   : >> { %v7402_v58 = vpop.f32.mrb[145].mxu0 }
 0x482   : >> { %v7403_v15 = vadd.f32 %v7402_v58, %v7401_v41  ;;  %v7404_v5 = vpop.f32.mrb[146].mxu0 }
 0x483   : >> { %v7405_v7 = vpop.f32.mrb[147].mxu0 }
 0x484   : >> { %v10398_v57 = vadd.f32 %v10345_v34, %v7403_v15  ;;  %v7406_v22 = vadd.f32 %v7405_v7, %v7404_v5 }
 0x486   : >> { %v10401_v38 = vadd.f32 %v10352_v13, %v7406_v22 }
 0x488   : >> { %v7407_v47 = vpop.f32.mrb[148].mxu0 }
 0x489   : >> { %v7408_v54 = vpop.f32.mrb[149].mxu0 }
 0x48a   : >> { %v7409_v60 = vadd.f32 %v7408_v54, %v7407_v47  ;;  %v7410_v23 = vpop.f32.mrb[150].mxu0 }
 0x48b   : >> { %v7411_v1 = vpop.f32.mrb[151].mxu0 }
 0x48c   : >> { %v10403_v61 = vadd.f32 %v7981_v8, %v7409_v60  ;;  %v7412_v19 = vadd.f32 %v7411_v1, %v7410_v23 }
 0x48e   : >> { %v10405_v10 = vadd.f32 %v7999_v29, %v7412_v19 }
 0x490   : >> { %v7413_v30 = vpop.f32.mrb[152].mxu0 }
 0x491   : >> { %v7414_v0 = vpop.f32.mrb[153].mxu0 }
 0x492   : >> { %v7415_v32 = vadd.f32 %v7414_v0, %v7413_v30  ;;  %v7416_v16 = vpop.f32.mrb[154].mxu0 }
 0x493   : >> { %v7417_v34 = vpop.f32.mrb[155].mxu0 }
 0x494   : >> { %v10407_v14 = vadd.f32 %v8026_v36, %v7415_v32  ;;  %v7418_v18 = vadd.f32 %v7417_v34, %v7416_v16 }
 0x496   : >> { %v10409_v13 = vadd.f32 %v8044_v11, %v7418_v18 }
 0x498   : >> { %v7419_v43 = vpop.f32.mrb[156].mxu0 }
 0x499   : >> { %v7420_v35 = vpop.f32.mrb[157].mxu0 }
 0x49a   : >> { %v7421_v27 = vadd.f32 %v7420_v35, %v7419_v43  ;;  %v7422_v50 = vpop.f32.mrb[158].mxu0 }
 0x49b   : >> { %v7423_v45 = vpop.f32.mrb[159].mxu0 }
 0x49c   : >> { %v10411_v8 = vadd.f32 %v8017_v42, %v7421_v27  ;;  %v7424_v3 = vadd.f32 %v7423_v45, %v7422_v50 }
 0x49e   : >> { %v10413_v29 = vadd.f32 %v8035_v62, %v7424_v3 }
 0x4a0   : >> { %v7457_v39 = vpop.f32.mrb[160].mxu0 }
 0x4a1   : >> { %v7458_v17 = vpop.f32.mrb[161].mxu0 }
 0x4a2   : >> { %v7459_v12 = vadd.f32 %v7458_v17, %v7457_v39  ;;  %v7460_v9 = vpop.f32.mrb[162].mxu0 }
 0x4a3   : >> { %v7461_v41 = vpop.f32.mrb[163].mxu0 }
 0x4a4   : >> { %v10416_v36 = vadd.f32 %v10348_v2, %v7459_v12  ;;  %v7462_v11 = vadd.f32 %v7461_v41, %v7460_v9 }
 0x4a6   : >> { %v10419_v58 = vadd.f32 %v10355_v26, %v7462_v11 }
 0x4a8   : >> { %v7463_v15 = vpop.f32.mrb[164].mxu0 }
 0x4a9   : >> { %v7464_v5 = vpop.f32.mrb[165].mxu0 }
 0x4aa   : >> { %v7465_v7 = vadd.f32 %v7464_v5, %v7463_v15  ;;  %v7466_v42 = vpop.f32.mrb[166].mxu0 }
 0x4ab   : >> { %v7467_v22 = vpop.f32.mrb[167].mxu0 }
 0x4ac   : >> { %v10422_v62 = vadd.f32 %v10370_v31, %v7465_v7  ;;  %v7468_v47 = vadd.f32 %v7467_v22, %v7466_v42 }
 0x4ae   : >> { %v10425_v54 = vadd.f32 %v10375_v24, %v7468_v47 }
 0x4b0   : >> { %v7469_v60 = vpop.f32.mrb[168].mxu0 }
 0x4b1   : >> { %v7470_v23 = vpop.f32.mrb[169].mxu0 }
 0x4b2   : >> { %v7471_v2 = vadd.f32 %v7470_v23, %v7469_v60  ;;  %v7472_v1 = vpop.f32.mrb[170].mxu0 }
 0x4b3   : >> { %v7473_v19 = vpop.f32.mrb[171].mxu0 }
 0x4b4   : >> { %v10428_v26 = vadd.f32 %v10383_v37, %v7471_v2  ;;  %v7474_v30 = vadd.f32 %v7473_v19, %v7472_v1 }
 0x4b6   : >> { %v10431_v0 = vadd.f32 %v10387_v56, %v7474_v30 }
 0x4b8   : >> { %v7475_v32 = vpop.f32.mrb[172].mxu0 }
 0x4b9   : >> { %v7476_v16 = vpop.f32.mrb[173].mxu0 }
 0x4ba   : >> { %v7477_v31 = vadd.f32 %v7476_v16, %v7475_v32  ;;  %v7478_v34 = vpop.f32.mrb[174].mxu0 }
 0x4bb   : >> { %v7479_v18 = vpop.f32.mrb[175].mxu0 }
 0x4bc   : >> { %v10434_v24 = vadd.f32 %v10391_v52, %v7477_v31  ;;  %v7480_v43 = vadd.f32 %v7479_v18, %v7478_v34 }
 0x4be   : >> { %v10437_v35 = vadd.f32 %v10395_v40, %v7480_v43 }
 0x4c0   : >> { %v7481_v27 = vpop.f32.mrb[176].mxu0 }
 0x4c1   : >> { %v7482_v50 = vpop.f32.mrb[177].mxu0 }
 0x4c2   : >> { %v7483_v37 = vadd.f32 %v7482_v50, %v7481_v27  ;;  %v7484_v45 = vpop.f32.mrb[178].mxu0 }
 0x4c3   : >> { %v7485_v3 = vpop.f32.mrb[179].mxu0 }
 0x4c4   : >> { %v10440_v56 = vadd.f32 %v10398_v57, %v7483_v37  ;;  %v7486_v39 = vadd.f32 %v7485_v3, %v7484_v45 }
 0x4c6   : >> { %v10443_v17 = vadd.f32 %v10401_v38, %v7486_v39  ;;  %v10464_v39 = vld [vmem:[#allocation11] ss:$0 sm:$0xff] }
 0x4c8   : >> { %v7487_v12 = vpop.f32.mrb[180].mxu0 }
 0x4c9   : >> { %v7488_v9 = vpop.f32.mrb[181].mxu0 }
 0x4ca   : >> { %v7489_v52 = vadd.f32 %v7488_v9, %v7487_v12  ;;  %v7490_v41 = vpop.f32.mrb[182].mxu0 }
 0x4cb   : >> { %v7491_v11 = vpop.f32.mrb[183].mxu0 }
 0x4cc   : >> { %v10446_v40 = vadd.f32 %v10403_v61, %v7489_v52  ;;  %v7492_v15 = vadd.f32 %v7491_v11, %v7490_v41 }
 0x4ce   : >> { %v10449_v5 = vadd.f32 %v10405_v10, %v7492_v15 }
 0x4d0   : >> { %v7493_v7 = vpop.f32.mrb[184].mxu0 }
 0x4d1   : >> { %v7494_v42 = vpop.f32.mrb[185].mxu0 }
 0x4d2   : >> { %v7495_v57 = vadd.f32 %v7494_v42, %v7493_v7  ;;  %v7496_v22 = vpop.f32.mrb[186].mxu0 }
 0x4d3   : >> { %v7497_v47 = vpop.f32.mrb[187].mxu0 }
 0x4d4   : >> { %v10452_v38 = vadd.f32 %v10407_v14, %v7495_v57  ;;  %v7498_v60 = vadd.f32 %v7497_v47, %v7496_v22 }
 0x4d6   : >> { %v10455_v23 = vadd.f32 %v10409_v13, %v7498_v60 }
 0x4d8   : >> { %v7499_v2 = vpop.f32.mrb[188].mxu0 }
 0x4d9   : >> { %v7500_v1 = vpop.f32.mrb[189].mxu0 }
 0x4da   : >> { %v7501_v61 = vadd.f32 %v7500_v1, %v7499_v2  ;;  %v7502_v19 = vpop.f32.mrb[190].mxu0 }
 0x4db   : >> { %v7503_v30 = vpop.f32.mrb[191].mxu0 }
 0x4dc   : >> { %v10458_v10 = vadd.f32 %v10411_v8, %v7501_v61  ;;  %v7504_v32 = vadd.f32 %v7503_v30, %v7502_v19 }
 0x4de   : >> { %v10461_v16 = vadd.f32 %v10413_v29, %v7504_v32 }
 0x4e0   : >> { %v7537_v31 = vpop.f32.mrb[192].mxu0  ;;  %v7875_v34 = vpop.f32.mrb[0].mxu1 }
 0x4e1   : >> { %v7538_v14 = vpop.f32.mrb[193].mxu0  ;;  %v5171_v18 = vpop.f32.mrb[1].mxu1 }
 0x4e2   : >> { %v7539_v43 = vadd.f32 %v7538_v14, %v7537_v31  ;;  %v7540_v27 = vpop.f32.mrb[194].mxu0  ;;  %v7876_v13 = vpop.f32.mrb[2].mxu1 }
 0x4e3   : >> { %v7541_v50 = vpop.f32.mrb[195].mxu0  ;;  %v5174_v37 = vpop.f32.mrb[3].mxu1 }
 0x4e4   : >> { %v7921_v45 = vadd.f32 %v10416_v36, %v7539_v43  ;;  %v7542_v3 = vadd.f32 %v7541_v50, %v7540_v27 }
 0x4e6   : >> { %v7922_v8 = vadd.f32 %v7921_v45, %v5171_v18  ;;  %v7939_v12 = vadd.f32 %v10419_v58, %v7542_v3 }
 0x4e8   : >> { %v5257_v29 = vadd.f32 %v7922_v8, %v10464_v39  ;;  %v7940_v9 = vadd.f32 %v7939_v12, %v5174_v37  ;;  %v7543_v52 = vpop.f32.mrb[196].mxu0  ;;  %v10468_v41 = vpop.f32.mrb[4].mxu1 }
 0x4e9   : >> { %v7544_v11 = vpop.f32.mrb[197].mxu0  ;;  %v5187_v15 = vpop.f32.mrb[5].mxu1 }
 0x4ea   : >> { %v5258_v7 = vadd.f32 %v7940_v9, %v10464_v39  ;;  %v7545_v42 = vadd.f32 %v7544_v11, %v7543_v52  ;;  %v7546_v57 = vpop.f32.mrb[198].mxu0  ;;  %v10471_v22 = vpop.f32.mrb[6].mxu1  ;;  %v5273_v60 = vmax.f32 %v5257_v29, 0.0 }
 0x4eb   : >> { %v7547_v36 = vpop.f32.mrb[199].mxu0  ;;  %v5190_v47 = vpop.f32.mrb[7].mxu1 }
 0x4ec   : >> { %v5274_v2 = vmax.f32 %v5258_v7, 0.0  ;;  %v7912_v58 = vadd.f32 %v10422_v62, %v7545_v42  ;;  %v7548_v1 = vadd.f32 %v7547_v36, %v7546_v57 }
 0x4ee   : >> { %v5289_v61 = vpack.c.bf16 %v5274_v2, %v5273_v60  ;;  %v7913_v19 = vadd.f32 %v7912_v58, %v7875_v34  ;;  %v7930_v30 = vadd.f32 %v10425_v54, %v7548_v1 }
 0x4f0   : >> { %v7931_v32 = vadd.f32 %v7930_v30, %v7876_v13  ;;  %v7549_v31 = vpop.f32.mrb[200].mxu0  ;;  %v10475_v14 = vpop.f32.mrb[8].mxu1  ;;  %5611 = vmatmul.mubr.bf16.vlgmr.msra.gmra.mrb[80].mxu1 %v5289_v61  ;;  %5724 = vmatmul.mubr.bf16.vlgmr.msra.gmra.mrb[224].mxu0 %v5289_v61  ;;  %v5259_v18 = vadd.f32 %v7913_v19, %v10464_v39 }
 0x4f1   : >> { %v7550_v43 = vpop.f32.mrb[201].mxu0  ;;  %v10478_v27 = vpop.f32.mrb[9].mxu1  ;;  %7897 = vmatpush1.bf16.msra.mxu1 %v10288_v4  ;;  %5620 = vmatprep.mubr.bf16.mxu1 %v8914_v21 }
 0x4f2   : >> { %v7551_v62 = vadd.f32 %v7550_v43, %v7549_v31  ;;  %v7552_v50 = vpop.f32.mrb[202].mxu0  ;;  %v10482_v34 = vpop.f32.mrb[10].mxu1  ;;  %5733 = vmatprep.mubr.bf16.mxu0 %v8914_v21  ;;  %v5260_v54 = vadd.f32 %v7931_v32, %v10464_v39  ;;  %7890 = vmatprep.subr.bf16.mxu1 %v10292_v63  ;;  %v5275_v8 = vmax.f32 %v5259_v18, 0.0 }
 0x4f3   : >> { %v7553_v13 = vpop.f32.mrb[203].mxu0  ;;  %v5206_v37 = vpop.f32.mrb[11].mxu1 }
 0x4f4   : >> { %v7957_v45 = vadd.f32 %v10428_v26, %v7551_v62  ;;  %v7554_v3 = vadd.f32 %v7553_v13, %v7552_v50  ;;  %v5276_v12 = vmax.f32 %v5260_v54, 0.0 }
 0x4f5   : >> { %7898 = vmatpush1.bf16.msra.mxu1 %v10294_v20 }
 0x4f6   : >> { %v7958_v4 = vadd.f32 %v7957_v45, %v5187_v15  ;;  %v7975_v29 = vadd.f32 %v10431_v0, %v7554_v3  ;;  %v5290_v9 = vpack.c.bf16 %v5276_v12, %v5275_v8  ;;  %7891 = vmatprep.subr.bf16.mxu1 %v10310_v55 }
 0x4f8   : >> { %v7976_v52 = vadd.f32 %v7975_v29, %v5190_v47  ;;  %v7555_v11 = vpop.f32.mrb[204].mxu0  ;;  %v10491_v7 = vpop.f32.mrb[12].mxu1  ;;  %5621 = vmatmul.mubr.bf16.gmra.mrb[84].mxu1 %v5290_v9  ;;  %5734 = vmatmul.mubr.bf16.gmra.mrb[228].mxu0 %v5290_v9  ;;  %v5261_v63 = vadd.f32 %v7958_v4, %v10464_v39 }
 0x4f9   : >> { %v7556_v26 = vpop.f32.mrb[205].mxu0  ;;  %v10494_v42 = vpop.f32.mrb[13].mxu1  ;;  %5630 = vmatprep.mubr.bf16.mxu1 %v8914_v21  ;;  %5743 = vmatprep.mubr.bf16.mxu0 %v8914_v21 }
 0x4fa   : >> { %v7557_v20 = vadd.f32 %v7556_v26, %v7555_v11  ;;  %v7558_v0 = vpop.f32.mrb[206].mxu0  ;;  %v10498_v15 = vpop.f32.mrb[14].mxu1  ;;  %v5262_v55 = vadd.f32 %v7976_v52, %v10464_v39  ;;  %7899 = vmatpush1.bf16.msra.mxu1 %v10312_v6  ;;  %v5277_v2 = vmax.f32 %v5261_v63, 0.0 }
 0x4fb   : >> { %v7559_v57 = vpop.f32.mrb[207].mxu0  ;;  %v10502_v36 = vpop.f32.mrb[15].mxu1  ;;  %7892 = vmatprep.subr.bf16.mxu1 %v10316_v28 }
 0x4fc   : >> { %v7948_v47 = vadd.f32 %v10434_v24, %v7557_v20  ;;  %v7560_v60 = vadd.f32 %v7559_v57, %v7558_v0  ;;  %v5278_v58 = vmax.f32 %v5262_v55, 0.0 }
 0x4fe   : >> { %v7949_v1 = vadd.f32 %v7948_v47, %v10468_v41  ;;  %v7966_v61 = vadd.f32 %v10437_v35, %v7560_v60  ;;  %v5291_v19 = vpack.c.bf16 %v5278_v58, %v5277_v2  ;;  %7900 = vmatpush1.bf16.msra.mxu1 %v10318_v59 }
 0x4ff   : >> { %7893 = vmatprep.subr.bf16.mxu1 %v10334_v33 }
 0x500   : >> { %v7967_v6 = vadd.f32 %v7966_v61, %v10471_v22  ;;  %v7561_v30 = vpop.f32.mrb[208].mxu0  ;;  %5631 = vmatmul.mubr.bf16.gmra.mrb[88].mxu1 %v5291_v19  ;;  %5744 = vmatmul.mubr.bf16.gmra.mrb[232].mxu0 %v5291_v19  ;;  %v5263_v28 = vadd.f32 %v7949_v1, %v10464_v39 }
 0x501   : >> { %v7562_v24 = vpop.f32.mrb[209].mxu0  ;;  %5640 = vmatprep.mubr.bf16.mxu1 %v8914_v21  ;;  %5753 = vmatprep.mubr.bf16.mxu0 %v8914_v21 }
 0x502   : >> { %v7563_v41 = vadd.f32 %v7562_v24, %v7561_v30  ;;  %v7564_v32 = vpop.f32.mrb[210].mxu0  ;;  %v5264_v35 = vadd.f32 %v7967_v6, %v10464_v39  ;;  %7901 = vmatpush1.bf16.msra.mxu1 %v10336_v48  ;;  %v5279_v31 = vmax.f32 %v5263_v28, 0.0 }
 0x503   : >> { %v7565_v59 = vpop.f32.mrb[211].mxu0  ;;  %7894 = vmatprep.subr.bf16.mxu1 %v10340_v51 }
 0x504   : >> { %v7993_v33 = vadd.f32 %v10440_v56, %v7563_v41  ;;  %v7566_v22 = vadd.f32 %v7565_v59, %v7564_v32  ;;  %v5280_v18 = vmax.f32 %v5264_v35, 0.0 }
 0x506   : >> { %v7994_v43 = vadd.f32 %v7993_v33, %v10478_v27  ;;  %v8011_v62 = vadd.f32 %v10443_v17, %v7566_v22  ;;  %v5292_v50 = vpack.c.bf16 %v5280_v18, %v5279_v31  ;;  %7902 = vmatpush1.bf16.msra.mxu1 %v10342_v49  ;;  %v5396_v33 = vld [vmem:[#allocation14] sm:$0xf] }
 0x507   : >> { %7895 = vmatprep.subr.bf16.mxu1 %v10358_v53 }
 0x508   : >> { %v8012_v54 = vadd.f32 %v8011_v62, %v5206_v37  ;;  %v7567_v13 = vpop.f32.mrb[212].mxu0  ;;  %5641 = vmatmul.mubr.bf16.gmra.mrb[92].mxu1 %v5292_v50  ;;  %5754 = vmatmul.mubr.bf16.gmra.mrb[236].mxu0 %v5292_v50  ;;  %v5265_v48 = vadd.f32 %v7994_v43, %v10464_v39  ;;  %v5332_v62 = vld [vmem:[%s10557_s1] sm:$0xff] }
 0x509   : >> { %v7568_v51 = vpop.f32.mrb[213].mxu0  ;;  %5650 = vmatprep.mubr.bf16.mxu1 %v8914_v21  ;;  %5763 = vmatprep.mubr.bf16.mxu0 %v8914_v21 }
 0x50a   : >> { %v7569_v56 = vadd.f32 %v7568_v51, %v7567_v13  ;;  %v7570_v27 = vpop.f32.mrb[214].mxu0  ;;  %v5266_v17 = vadd.f32 %v8012_v54, %v10464_v39  ;;  %7903 = vmatpush1.bf16.msra.mxu1 %v10360_v44  ;;  %v5281_v45 = vmax.f32 %v5265_v48, 0.0  ;;  %v5334_v54 = vld [vmem:[%s10557_s1 + $0x10] sm:$0xff] }
 0x50b   : >> { %v7571_v49 = vpop.f32.mrb[215].mxu0  ;;  %7896 = vmatprep.subr.bf16.mxu1 %v10364_v46 }
 0x50c   : >> { %v7984_v53 = vadd.f32 %v10446_v40, %v7569_v56  ;;  %v7572_v37 = vadd.f32 %v7571_v49, %v7570_v27  ;;  %v5282_v3 = vmax.f32 %v5266_v17, 0.0  ;;  %v5333_v56 = vld [vmem:[%s10557_s1 + $0x8] sm:$0xff]  ;;  %v5335_v17 = vld [vmem:[%s10557_s1 + $0x18] sm:$0xff] }
 0x50e   : >> { %v7985_v8 = vadd.f32 %v7984_v53, %v10475_v14  ;;  %v8002_v12 = vadd.f32 %v10449_v5, %v7572_v37  ;;  %v5293_v4 = vpack.c.bf16 %v5282_v3, %v5281_v45  ;;  %7904 = vmatpush1.bf16.msra.mxu1 %v10366_v25  ;;  %v5336_v45 = vld [vmem:[%s10557_s1 + $0x20] sm:$0xff] }
 0x510   : >> { %v8003_v29 = vadd.f32 %v8002_v12, %v10482_v34  ;;  %v7573_v9 = vpop.f32.mrb[216].mxu0  ;;  %5651 = vmatmul.mubr.bf16.gmra.mrb[96].mxu1 %v5293_v4  ;;  %5764 = vmatmul.mubr.bf16.gmra.mrb[240].mxu0 %v5293_v4  ;;  %v5267_v44 = vadd.f32 %v7985_v8, %v10464_v39  ;;  %v5338_v8 = vld [vmem:[%s10557_s1 + $0x30] sm:$0xff] }
 0x511   : >> { %v7574_v46 = vpop.f32.mrb[217].mxu0  ;;  %5660 = vmatprep.mubr.bf16.mxu1 %v8914_v21  ;;  %5773 = vmatprep.mubr.bf16.mxu0 %v8914_v21 }
 0x512   : >> { %v7575_v40 = vadd.f32 %v7574_v46, %v7573_v9  ;;  %v7576_v52 = vpop.f32.mrb[218].mxu0  ;;  %v5268_v14 = vadd.f32 %v8003_v29, %v10464_v39  ;;  %v5283_v63 = vmax.f32 %v5267_v44, 0.0  ;;  %v5337_v46 = vld [vmem:[%s10557_s1 + $0x28] sm:$0xff] }
 0x513   : >> { %v7577_v5 = vpop.f32.mrb[219].mxu0 }
 0x514   : >> { %v8029_v11 = vadd.f32 %v10452_v38, %v7575_v40  ;;  %v7578_v25 = vadd.f32 %v7577_v5, %v7576_v52  ;;  %v5284_v34 = vmax.f32 %v5268_v14, 0.0  ;;  %v5339_v52 = vld [vmem:[%s10557_s1 + $0x38] sm:$0xff] }
 0x516   : >> { %v8030_v26 = vadd.f32 %v8029_v11, %v10494_v42  ;;  %v8047_v20 = vadd.f32 %v10455_v23, %v7578_v25  ;;  %v5294_v0 = vpack.c.bf16 %v5284_v34, %v5283_v63 }
 0x518   : >> { %v8048_v55 = vadd.f32 %v8047_v20, %v10502_v36  ;;  %v7579_v57 = vpop.f32.mrb[220].mxu0  ;;  %5661 = vmatmul.mubr.bf16.gmra.mrb[100].mxu1 %v5294_v0  ;;  %5774 = vmatmul.mubr.bf16.gmra.mrb[244].mxu0 %v5294_v0  ;;  %v5269_v47 = vadd.f32 %v8030_v26, %v10464_v39 }
 0x519   : >> { %v7580_v60 = vpop.f32.mrb[221].mxu0  ;;  %5670 = vmatprep.mubr.bf16.mxu1 %v8914_v21 }
 0x51a   : >> { %v7581_v2 = vadd.f32 %v7580_v60, %v7579_v57  ;;  %v7582_v38 = vpop.f32.mrb[222].mxu0  ;;  %v5270_v58 = vadd.f32 %v8048_v55, %v10464_v39  ;;  %v5285_v23 = vmax.f32 %v5269_v47, 0.0 }
 0x51b   : >> { %v7583_v1 = vpop.f32.mrb[223].mxu0 }
 0x51c   : >> { %v8020_v42 = vadd.f32 %v10458_v10, %v7581_v2  ;;  %v7584_v61 = vadd.f32 %v7583_v1, %v7582_v38  ;;  %v5286_v19 = vmax.f32 %v5270_v58, 0.0 }
 0x51e   : >> { %v8021_v36 = vadd.f32 %v8020_v42, %v10491_v7  ;;  %v8038_v6 = vadd.f32 %v10461_v16, %v7584_v61  ;;  %v5295_v30 = vpack.c.bf16 %v5286_v19, %v5285_v23  ;;  %v5398_v16 = vlaneseq  ;;  %v5340_v42 = vld [vmem:[%s10557_s1 + $0x40] sm:$0xff]  ;;  %v5342_v23 = vld [vmem:[%s10557_s1 + $0x50] sm:$0xff] }
 0x520   : >> { %v8039_v28 = vadd.f32 %v8038_v6, %v10498_v15  ;;  %5671 = vmatmul.mubr.bf16.gmra.mrb[104].mxu1 %v5295_v30  ;;  %v5271_v24 = vadd.f32 %v8021_v36, %v10464_v39  ;;  %v5399_v7 = vshrl.u32 %v5398_v16, 7 }
 0x521   : >> { %5680 = vmatprep.mubr.bf16.mxu1 %v8914_v21 }
 0x522   : >> { %v5272_v41 = vadd.f32 %v8039_v28, %v10464_v39  ;;  %v5287_v32 = vmax.f32 %v5271_v24, 0.0  ;;  %v5400_v15 = vsub.s32 0, %v5399_v7  ;;  %v5408_v59 = vsub.s32 2, %v5399_v7  ;;  %v5343_v24 = vld [vmem:[%s10557_s1 + $0x58] sm:$0xff] }
 0x523   : >> { %v5404_v22 = vsub.s32 1, %v5399_v7  ;;  %v5412_v39 = vsub.s32 3, %v5399_v7  ;;  %v5346_v7 = vld [vmem:[%s10557_s1 + $0x70] sm:$0xff] }
 0x524   : >> { %v5288_v10 = vmax.f32 %v5272_v41, 0.0  ;;  %v10559_v31 = vrot.slane %v5396_v33, %v5400_v15 }
 0x525   : >> { %v10563_v18 = vrot.slane %v5396_v33, %v5404_v22  ;;  %v10565_v43 = vrot.slane %v5396_v33, %v5412_v39 }
 0x526   : >> { %v5296_v35 = vpack.c.bf16 %v5288_v10, %v5287_v32 }
 0x528   : >> { %5681 = vmatmul.mubr.bf16.gmra.mrb[108].mxu1 %v5296_v35 }
 0x529   : >> { %5783 = vmatprep.mubr.bf16.mxu1 %v8914_v21 }
 0x530   : >> { %5784 = vmatmul.mubr.bf16.vlgmr.msra.gmra.mrb[112].mxu1 %v5295_v30  ;;  %v5341_v30 = vld [vmem:[%s10557_s1 + $0x48] sm:$0xff] }
 0x531   : >> { %5793 = vmatprep.mubr.bf16.mxu1 %v8914_v21  ;;  %v10561_v21 = vrot.slane %v5396_v33, %v5408_v59 }
 0x538   : >> { %5794 = vmatmul.mubr.bf16.gmra.mrb[116].mxu1 %v5296_v35  ;;  %v5344_v35 = vld [vmem:[%s10557_s1 + $0x60] sm:$0xff] }
 0x5c3   : >> { %v5612_v50 = vpop.f32.mrb[80].mxu1  ;;  %v5725_v13 = vpop.f32.mrb[224].mxu0 }
 0x5c4   : >> { %v5613_v48 = vadd.f32 %v5612_v50, %v10559_v31  ;;  %v5726_v51 = vadd.f32 %v5725_v13, %v10561_v21  ;;  %v5614_v27 = vpop.f32.mrb[81].mxu1  ;;  %v5727_v49 = vpop.f32.mrb[225].mxu0 }
 0x5c5   : >> { %v5615_v53 = vadd.f32 %v5614_v27, %v10563_v18  ;;  %v5728_v37 = vadd.f32 %v5727_v49, %v10565_v43  ;;  %v5616_v3 = vpop.f32.mrb[82].mxu1  ;;  %v5729_v12 = vpop.f32.mrb[226].mxu0 }
 0x5c6   : >> { %v5804_v4 = vadd.f32 %v5613_v48, %v5332_v62  ;;  %v5806_v29 = vadd.f32 %v5726_v51, %v5334_v54  ;;  %v5617_v9 = vadd.f32 %v5616_v3, %v10559_v31  ;;  %v5730_v44 = vadd.f32 %v5729_v12, %v10561_v21  ;;  %v5618_v40 = vpop.f32.mrb[83].mxu1  ;;  %v5731_v14 = vpop.f32.mrb[227].mxu0  ;;  %v5345_v62 = vld [vmem:[%s10557_s1 + $0x68] sm:$0xff]  ;;  %v5347_v54 = vld [vmem:[%s10557_s1 + $0x78] sm:$0xff] }
 0x5c7   : >> { %v5805_v5 = vadd.f32 %v5615_v53, %v5333_v56  ;;  %v5807_v11 = vadd.f32 %v5728_v37, %v5335_v17  ;;  %v5619_v25 = vadd.f32 %v5618_v40, %v10563_v18  ;;  %v5732_v63 = vadd.f32 %v5731_v14, %v10565_v43 }
 0x5c8   : >> { %v5868_v34 = vmax.f32 %v5804_v4, 0.0  ;;  %v5870_v26 = vmax.f32 %v5806_v29, 0.0  ;;  %v5808_v20 = vadd.f32 %v5617_v9, %v5336_v45  ;;  %v5810_v0 = vadd.f32 %v5730_v44, %v5338_v8 }
 0x5c9   : >> { %v5869_v55 = vmax.f32 %v5805_v5, 0.0  ;;  %v5871_v57 = vmax.f32 %v5807_v11, 0.0  ;;  %v5809_v47 = vadd.f32 %v5619_v25, %v5337_v46  ;;  %v5811_v60 = vadd.f32 %v5732_v63, %v5339_v52  ;;  %v5348_v46 = vld [vmem:[%s10557_s1 + $0x80] sm:$0xff]  ;;  %v5350_v52 = vld [vmem:[%s10557_s1 + $0x90] sm:$0xff]  ;;  %v5349_v25 = vld [vmem:[%s10557_s1 + $0x88] sm:$0xff] }
 0x5ca   : >> { %5934 = vst [vmem:[%s10584_s29] sm:$0xff] %v5868_v34  ;;  %5936 = vst [vmem:[%s10584_s29 + $0x10] sm:$0xff] %v5870_v26  ;;  %v5872_v2 = vmax.f32 %v5808_v20, 0.0  ;;  %v5874_v38 = vmax.f32 %v5810_v0, 0.0  ;;  %v5351_v34 = vld [vmem:[%s10557_s1 + $0x98] sm:$0xff] }
 0x5cb   : >> { %5935 = vst [vmem:[%s10584_s29 + $0x8] sm:$0xff] %v5869_v55  ;;  %5937 = vst [vmem:[%s10584_s29 + $0x18] sm:$0xff] %v5871_v57  ;;  %v5873_v58 = vmax.f32 %v5809_v47, 0.0  ;;  %v5875_v1 = vmax.f32 %v5811_v60, 0.0  ;;  %v5622_v61 = vpop.f32.mrb[84].mxu1  ;;  %v5735_v19 = vpop.f32.mrb[228].mxu0 }
 0x5cc   : >> { %5938 = vst [vmem:[%s10584_s29 + $0x20] sm:$0xff] %v5872_v2  ;;  %5940 = vst [vmem:[%s10584_s29 + $0x30] sm:$0xff] %v5874_v38  ;;  %v5623_v36 = vadd.f32 %v5622_v61, %v10559_v31  ;;  %v5736_v6 = vadd.f32 %v5735_v19, %v10561_v21  ;;  %v5624_v28 = vpop.f32.mrb[85].mxu1  ;;  %v5737_v41 = vpop.f32.mrb[229].mxu0  ;;  %v5352_v55 = vld [vmem:[%s10557_s1 + $0xa0] sm:$0xff]  ;;  %v5354_v47 = vld [vmem:[%s10557_s1 + $0xb0] sm:$0xff] }
 0x5cd   : >> { %5939 = vst [vmem:[%s10584_s29 + $0x28] sm:$0xff] %v5873_v58  ;;  %5941 = vst [vmem:[%s10584_s29 + $0x38] sm:$0xff] %v5875_v1  ;;  %v5625_v32 = vadd.f32 %v5624_v28, %v10563_v18  ;;  %v5738_v10 = vadd.f32 %v5737_v41, %v10565_v43  ;;  %v5626_v16 = vpop.f32.mrb[86].mxu1  ;;  %v5739_v15 = vpop.f32.mrb[230].mxu0 }
 0x5ce   : >> { %v5812_v59 = vadd.f32 %v5623_v36, %v5340_v42  ;;  %v5814_v33 = vadd.f32 %v5736_v6, %v5342_v23  ;;  %v5627_v22 = vadd.f32 %v5626_v16, %v10559_v31  ;;  %v5740_v39 = vadd.f32 %v5739_v15, %v10561_v21  ;;  %v5628_v50 = vpop.f32.mrb[87].mxu1  ;;  %v5741_v13 = vpop.f32.mrb[231].mxu0  ;;  %v5353_v42 = vld [vmem:[%s10557_s1 + $0xa8] sm:$0xff]  ;;  %v5355_v23 = vld [vmem:[%s10557_s1 + $0xb8] sm:$0xff] }
 0x5cf   : >> { %v5813_v48 = vadd.f32 %v5625_v32, %v5341_v30  ;;  %v5815_v51 = vadd.f32 %v5738_v10, %v5343_v24  ;;  %v5629_v56 = vadd.f32 %v5628_v50, %v10563_v18  ;;  %v5742_v27 = vadd.f32 %v5741_v13, %v10565_v43 }
 0x5d0   : >> { %v5876_v17 = vmax.f32 %v5812_v59, 0.0  ;;  %v5878_v49 = vmax.f32 %v5814_v33, 0.0  ;;  %v5816_v53 = vadd.f32 %v5627_v22, %v5344_v35  ;;  %v5818_v37 = vadd.f32 %v5740_v39, %v5346_v7 }
 0x5d1   : >> { %v5877_v45 = vmax.f32 %v5813_v48, 0.0  ;;  %v5879_v3 = vmax.f32 %v5815_v51, 0.0  ;;  %v5817_v8 = vadd.f32 %v5629_v56, %v5345_v62  ;;  %v5819_v12 = vadd.f32 %v5742_v27, %v5347_v54  ;;  %v5356_v62 = vld [vmem:[%s10557_s1 + $0xc0] sm:$0xff]  ;;  %v5358_v54 = vld [vmem:[%s10557_s1 + $0xd0] sm:$0xff]  ;;  %v5357_v56 = vld [vmem:[%s10557_s1 + $0xc8] sm:$0xff] }
 0x5d2   : >> { %5942 = vst [vmem:[%s10584_s29 + $0x40] sm:$0xff] %v5876_v17  ;;  %5944 = vst [vmem:[%s10584_s29 + $0x50] sm:$0xff] %v5878_v49  ;;  %v5880_v4 = vmax.f32 %v5816_v53, 0.0  ;;  %v5882_v29 = vmax.f32 %v5818_v37, 0.0  ;;  %v5359_v17 = vld [vmem:[%s10557_s1 + $0xd8] sm:$0xff] }
 0x5d3   : >> { %5943 = vst [vmem:[%s10584_s29 + $0x48] sm:$0xff] %v5877_v45  ;;  %5945 = vst [vmem:[%s10584_s29 + $0x58] sm:$0xff] %v5879_v3  ;;  %v5881_v9 = vmax.f32 %v5817_v8, 0.0  ;;  %v5883_v44 = vmax.f32 %v5819_v12, 0.0  ;;  %v5632_v40 = vpop.f32.mrb[88].mxu1  ;;  %v5745_v14 = vpop.f32.mrb[232].mxu0 }
 0x5d4   : >> { %5946 = vst [vmem:[%s10584_s29 + $0x60] sm:$0xff] %v5880_v4  ;;  %5948 = vst [vmem:[%s10584_s29 + $0x70] sm:$0xff] %v5882_v29  ;;  %v5633_v5 = vadd.f32 %v5632_v40, %v10559_v31  ;;  %v5746_v11 = vadd.f32 %v5745_v14, %v10561_v21  ;;  %v5634_v63 = vpop.f32.mrb[89].mxu1  ;;  %v5747_v26 = vpop.f32.mrb[233].mxu0  ;;  %v5360_v45 = vld [vmem:[%s10557_s1 + $0xe0] sm:$0xff]  ;;  %v5362_v8 = vld [vmem:[%s10557_s1 + $0xf0] sm:$0xff] }
 0x5d5   : >> { %5947 = vst [vmem:[%s10584_s29 + $0x68] sm:$0xff] %v5881_v9  ;;  %5949 = vst [vmem:[%s10584_s29 + $0x78] sm:$0xff] %v5883_v44  ;;  %v5635_v20 = vadd.f32 %v5634_v63, %v10563_v18  ;;  %v5748_v0 = vadd.f32 %v5747_v26, %v10565_v43  ;;  %v5636_v57 = vpop.f32.mrb[90].mxu1  ;;  %v5749_v60 = vpop.f32.mrb[234].mxu0 }
 0x5d6   : >> { %v5820_v2 = vadd.f32 %v5633_v5, %v5348_v46  ;;  %v5822_v38 = vadd.f32 %v5746_v11, %v5350_v52  ;;  %v5637_v58 = vadd.f32 %v5636_v57, %v10559_v31  ;;  %v5750_v1 = vadd.f32 %v5749_v60, %v10561_v21  ;;  %v5638_v61 = vpop.f32.mrb[91].mxu1  ;;  %v5751_v19 = vpop.f32.mrb[235].mxu0  ;;  %v5361_v46 = vld [vmem:[%s10557_s1 + $0xe8] sm:$0xff]  ;;  %v5363_v52 = vld [vmem:[%s10557_s1 + $0xf8] sm:$0xff] }
 0x5d7   : >> { %v5821_v36 = vadd.f32 %v5635_v20, %v5349_v25  ;;  %v5823_v6 = vadd.f32 %v5748_v0, %v5351_v34  ;;  %v5639_v30 = vadd.f32 %v5638_v61, %v10563_v18  ;;  %v5752_v28 = vadd.f32 %v5751_v19, %v10565_v43 }
 0x5d8   : >> { %v5884_v24 = vmax.f32 %v5820_v2, 0.0  ;;  %v5886_v41 = vmax.f32 %v5822_v38, 0.0  ;;  %v5824_v32 = vadd.f32 %v5637_v58, %v5352_v55  ;;  %v5826_v10 = vadd.f32 %v5750_v1, %v5354_v47 }
 0x5d9   : >> { %v5885_v35 = vmax.f32 %v5821_v36, 0.0  ;;  %v5887_v16 = vmax.f32 %v5823_v6, 0.0  ;;  %v5825_v7 = vadd.f32 %v5639_v30, %v5353_v42  ;;  %v5827_v15 = vadd.f32 %v5752_v28, %v5355_v23  ;;  %v5364_v42 = vld [vmem:[%s10557_s1 + $0x100] sm:$0xff]  ;;  %v5366_v23 = vld [vmem:[%s10557_s1 + $0x110] sm:$0xff]  ;;  %v5365_v30 = vld [vmem:[%s10557_s1 + $0x108] sm:$0xff] }
 0x5da   : >> { %5950 = vst [vmem:[%s10584_s29 + $0x80] sm:$0xff] %v5884_v24  ;;  %5952 = vst [vmem:[%s10584_s29 + $0x90] sm:$0xff] %v5886_v41  ;;  %v5888_v59 = vmax.f32 %v5824_v32, 0.0  ;;  %v5890_v33 = vmax.f32 %v5826_v10, 0.0  ;;  %v5367_v24 = vld [vmem:[%s10557_s1 + $0x118] sm:$0xff] }
 0x5db   : >> { %5951 = vst [vmem:[%s10584_s29 + $0x88] sm:$0xff] %v5885_v35  ;;  %5953 = vst [vmem:[%s10584_s29 + $0x98] sm:$0xff] %v5887_v16  ;;  %v5889_v22 = vmax.f32 %v5825_v7, 0.0  ;;  %v5891_v39 = vmax.f32 %v5827_v15, 0.0  ;;  %v5642_v50 = vpop.f32.mrb[92].mxu1  ;;  %v5755_v13 = vpop.f32.mrb[236].mxu0 }
 0x5dc   : >> { %5954 = vst [vmem:[%s10584_s29 + $0xa0] sm:$0xff] %v5888_v59  ;;  %5956 = vst [vmem:[%s10584_s29 + $0xb0] sm:$0xff] %v5890_v33  ;;  %v5643_v48 = vadd.f32 %v5642_v50, %v10559_v31  ;;  %v5756_v51 = vadd.f32 %v5755_v13, %v10561_v21  ;;  %v5644_v27 = vpop.f32.mrb[93].mxu1  ;;  %v5757_v49 = vpop.f32.mrb[237].mxu0  ;;  %v5368_v35 = vld [vmem:[%s10557_s1 + $0x120] sm:$0xff]  ;;  %v5370_v7 = vld [vmem:[%s10557_s1 + $0x130] sm:$0xff] }
 0x5dd   : >> { %5955 = vst [vmem:[%s10584_s29 + $0xa8] sm:$0xff] %v5889_v22  ;;  %5957 = vst [vmem:[%s10584_s29 + $0xb8] sm:$0xff] %v5891_v39  ;;  %v5645_v53 = vadd.f32 %v5644_v27, %v10563_v18  ;;  %v5758_v37 = vadd.f32 %v5757_v49, %v10565_v43  ;;  %v5646_v3 = vpop.f32.mrb[94].mxu1  ;;  %v5759_v12 = vpop.f32.mrb[238].mxu0 }
 0x5de   : >> { %v5828_v4 = vadd.f32 %v5643_v48, %v5356_v62  ;;  %v5830_v29 = vadd.f32 %v5756_v51, %v5358_v54  ;;  %v5647_v9 = vadd.f32 %v5646_v3, %v10559_v31  ;;  %v5760_v44 = vadd.f32 %v5759_v12, %v10561_v21  ;;  %v5648_v40 = vpop.f32.mrb[95].mxu1  ;;  %v5761_v14 = vpop.f32.mrb[239].mxu0  ;;  %v5369_v62 = vld [vmem:[%s10557_s1 + $0x128] sm:$0xff]  ;;  %v5371_v54 = vld [vmem:[%s10557_s1 + $0x138] sm:$0xff] }
 0x5df   : >> { %v5829_v5 = vadd.f32 %v5645_v53, %v5357_v56  ;;  %v5831_v11 = vadd.f32 %v5758_v37, %v5359_v17  ;;  %v5649_v25 = vadd.f32 %v5648_v40, %v10563_v18  ;;  %v5762_v63 = vadd.f32 %v5761_v14, %v10565_v43 }
 0x5e0   : >> { %v5892_v34 = vmax.f32 %v5828_v4, 0.0  ;;  %v5894_v26 = vmax.f32 %v5830_v29, 0.0  ;;  %v5832_v20 = vadd.f32 %v5647_v9, %v5360_v45  ;;  %v5834_v0 = vadd.f32 %v5760_v44, %v5362_v8 }
 0x5e1   : >> { %v5893_v55 = vmax.f32 %v5829_v5, 0.0  ;;  %v5895_v57 = vmax.f32 %v5831_v11, 0.0  ;;  %v5833_v47 = vadd.f32 %v5649_v25, %v5361_v46  ;;  %v5835_v60 = vadd.f32 %v5762_v63, %v5363_v52  ;;  %v5372_v46 = vld [vmem:[%s10557_s1 + $0x140] sm:$0xff]  ;;  %v5374_v52 = vld [vmem:[%s10557_s1 + $0x150] sm:$0xff]  ;;  %v5373_v25 = vld [vmem:[%s10557_s1 + $0x148] sm:$0xff] }
 0x5e2   : >> { %5958 = vst [vmem:[%s10584_s29 + $0xc0] sm:$0xff] %v5892_v34  ;;  %5960 = vst [vmem:[%s10584_s29 + $0xd0] sm:$0xff] %v5894_v26  ;;  %v5896_v2 = vmax.f32 %v5832_v20, 0.0  ;;  %v5898_v38 = vmax.f32 %v5834_v0, 0.0  ;;  %v5375_v34 = vld [vmem:[%s10557_s1 + $0x158] sm:$0xff] }
 0x5e3   : >> { %5959 = vst [vmem:[%s10584_s29 + $0xc8] sm:$0xff] %v5893_v55  ;;  %5961 = vst [vmem:[%s10584_s29 + $0xd8] sm:$0xff] %v5895_v57  ;;  %v5897_v58 = vmax.f32 %v5833_v47, 0.0  ;;  %v5899_v1 = vmax.f32 %v5835_v60, 0.0  ;;  %v5652_v61 = vpop.f32.mrb[96].mxu1  ;;  %v5765_v19 = vpop.f32.mrb[240].mxu0 }
 0x5e4   : >> { %5962 = vst [vmem:[%s10584_s29 + $0xe0] sm:$0xff] %v5896_v2  ;;  %5964 = vst [vmem:[%s10584_s29 + $0xf0] sm:$0xff] %v5898_v38  ;;  %v5653_v36 = vadd.f32 %v5652_v61, %v10559_v31  ;;  %v5766_v6 = vadd.f32 %v5765_v19, %v10561_v21  ;;  %v5654_v28 = vpop.f32.mrb[97].mxu1  ;;  %v5767_v41 = vpop.f32.mrb[241].mxu0  ;;  %v5376_v55 = vld [vmem:[%s10557_s1 + $0x160] sm:$0xff]  ;;  %v5378_v47 = vld [vmem:[%s10557_s1 + $0x170] sm:$0xff] }
 0x5e5   : >> { %5963 = vst [vmem:[%s10584_s29 + $0xe8] sm:$0xff] %v5897_v58  ;;  %5965 = vst [vmem:[%s10584_s29 + $0xf8] sm:$0xff] %v5899_v1  ;;  %v5655_v32 = vadd.f32 %v5654_v28, %v10563_v18  ;;  %v5768_v10 = vadd.f32 %v5767_v41, %v10565_v43  ;;  %v5656_v16 = vpop.f32.mrb[98].mxu1  ;;  %v5769_v15 = vpop.f32.mrb[242].mxu0 }
 0x5e6   : >> { %v5836_v59 = vadd.f32 %v5653_v36, %v5364_v42  ;;  %v5838_v33 = vadd.f32 %v5766_v6, %v5366_v23  ;;  %v5657_v22 = vadd.f32 %v5656_v16, %v10559_v31  ;;  %v5770_v39 = vadd.f32 %v5769_v15, %v10561_v21  ;;  %v5658_v50 = vpop.f32.mrb[99].mxu1  ;;  %v5771_v13 = vpop.f32.mrb[243].mxu0  ;;  %v5377_v42 = vld [vmem:[%s10557_s1 + $0x168] sm:$0xff]  ;;  %v5379_v23 = vld [vmem:[%s10557_s1 + $0x178] sm:$0xff] }
 0x5e7   : >> { %v5837_v48 = vadd.f32 %v5655_v32, %v5365_v30  ;;  %v5839_v51 = vadd.f32 %v5768_v10, %v5367_v24  ;;  %v5659_v56 = vadd.f32 %v5658_v50, %v10563_v18  ;;  %v5772_v27 = vadd.f32 %v5771_v13, %v10565_v43  ;;  %v5381_v13 = vld [vmem:[%s10557_s1 + $0x188] sm:$0xff] }
 0x5e8   : >> { %v5900_v17 = vmax.f32 %v5836_v59, 0.0  ;;  %v5902_v49 = vmax.f32 %v5838_v33, 0.0  ;;  %v5840_v53 = vadd.f32 %v5657_v22, %v5368_v35  ;;  %v5842_v37 = vadd.f32 %v5770_v39, %v5370_v7 }
 0x5e9   : >> { %v5901_v45 = vmax.f32 %v5837_v48, 0.0  ;;  %v5903_v3 = vmax.f32 %v5839_v51, 0.0  ;;  %v5841_v8 = vadd.f32 %v5659_v56, %v5369_v62  ;;  %v5843_v12 = vadd.f32 %v5772_v27, %v5371_v54  ;;  %v5380_v62 = vld [vmem:[%s10557_s1 + $0x180] sm:$0xff] }
 0x5ea   : >> { %5966 = vst [vmem:[%s10584_s29 + $0x100] sm:$0xff] %v5900_v17  ;;  %5968 = vst [vmem:[%s10584_s29 + $0x110] sm:$0xff] %v5902_v49  ;;  %v5904_v4 = vmax.f32 %v5840_v53, 0.0  ;;  %v5906_v29 = vmax.f32 %v5842_v37, 0.0  ;;  %v5384_v56 = vld [vmem:[%s10557_s1 + $0x1a0] sm:$0xff]  ;;  %v5385_v53 = vld [vmem:[%s10557_s1 + $0x1a8] sm:$0xff] }
 0x5eb   : >> { %5967 = vst [vmem:[%s10584_s29 + $0x108] sm:$0xff] %v5901_v45  ;;  %5969 = vst [vmem:[%s10584_s29 + $0x118] sm:$0xff] %v5903_v3  ;;  %v5905_v9 = vmax.f32 %v5841_v8, 0.0  ;;  %v5907_v44 = vmax.f32 %v5843_v12, 0.0  ;;  %v5662_v40 = vpop.f32.mrb[100].mxu1  ;;  %v5775_v14 = vpop.f32.mrb[244].mxu0 }
 0x5ec   : >> { %5970 = vst [vmem:[%s10584_s29 + $0x120] sm:$0xff] %v5904_v4  ;;  %5972 = vst [vmem:[%s10584_s29 + $0x130] sm:$0xff] %v5906_v29  ;;  %v5663_v5 = vadd.f32 %v5662_v40, %v10559_v31  ;;  %v5776_v11 = vadd.f32 %v5775_v14, %v10561_v21  ;;  %v5664_v63 = vpop.f32.mrb[101].mxu1  ;;  %v5777_v26 = vpop.f32.mrb[245].mxu0  ;;  %v5389_v14 = vld [vmem:[%s10557_s1 + $0x1c8] sm:$0xff] }
 0x5ed   : >> { %5971 = vst [vmem:[%s10584_s29 + $0x128] sm:$0xff] %v5905_v9  ;;  %5973 = vst [vmem:[%s10584_s29 + $0x138] sm:$0xff] %v5907_v44  ;;  %v5665_v20 = vadd.f32 %v5664_v63, %v10563_v18  ;;  %v5778_v0 = vadd.f32 %v5777_v26, %v10565_v43  ;;  %v5666_v57 = vpop.f32.mrb[102].mxu1  ;;  %v5779_v60 = vpop.f32.mrb[246].mxu0 }
 0x5ee   : >> { %v5844_v2 = vadd.f32 %v5663_v5, %v5372_v46  ;;  %v5846_v38 = vadd.f32 %v5776_v11, %v5374_v52  ;;  %v5667_v58 = vadd.f32 %v5666_v57, %v10559_v31  ;;  %v5780_v1 = vadd.f32 %v5779_v60, %v10561_v21  ;;  %v5668_v61 = vpop.f32.mrb[103].mxu1  ;;  %v5781_v19 = vpop.f32.mrb[247].mxu0  ;;  %v5388_v46 = vld [vmem:[%s10557_s1 + $0x1c0] sm:$0xff] }
 0x5ef   : >> { %v5845_v36 = vadd.f32 %v5665_v20, %v5373_v25  ;;  %v5847_v6 = vadd.f32 %v5778_v0, %v5375_v34  ;;  %v5669_v30 = vadd.f32 %v5668_v61, %v10563_v18  ;;  %v5782_v28 = vadd.f32 %v5781_v19, %v10565_v43  ;;  %v5392_v25 = vld [vmem:[%s10557_s1 + $0x1e0] sm:$0xff]  ;;  %v5393_v20 = vld [vmem:[%s10557_s1 + $0x1e8] sm:$0xff] }
 0x5f0   : >> { %v5908_v24 = vmax.f32 %v5844_v2, 0.0  ;;  %v5910_v41 = vmax.f32 %v5846_v38, 0.0  ;;  %v5848_v32 = vadd.f32 %v5667_v58, %v5376_v55  ;;  %v5850_v10 = vadd.f32 %v5780_v1, %v5378_v47 }
 0x5f1   : >> { %v5909_v35 = vmax.f32 %v5845_v36, 0.0  ;;  %v5911_v16 = vmax.f32 %v5847_v6, 0.0  ;;  %v5849_v7 = vadd.f32 %v5669_v30, %v5377_v42  ;;  %v5851_v15 = vadd.f32 %v5782_v28, %v5379_v23  ;;  %v5382_v42 = vld [vmem:[%s10557_s1 + $0x190] sm:$0xff]  ;;  %v5383_v23 = vld [vmem:[%s10557_s1 + $0x198] sm:$0xff] }
 0x5f2   : >> { %5974 = vst [vmem:[%s10584_s29 + $0x140] sm:$0xff] %v5908_v24  ;;  %5976 = vst [vmem:[%s10584_s29 + $0x150] sm:$0xff] %v5910_v41  ;;  %v5912_v59 = vmax.f32 %v5848_v32, 0.0  ;;  %v5914_v33 = vmax.f32 %v5850_v10, 0.0  ;;  %v5386_v36 = vld [vmem:[%s10557_s1 + $0x1b0] sm:$0xff]  ;;  %v5387_v24 = vld [vmem:[%s10557_s1 + $0x1b8] sm:$0xff] }
 0x5f3   : >> { %5975 = vst [vmem:[%s10584_s29 + $0x148] sm:$0xff] %v5909_v35  ;;  %5977 = vst [vmem:[%s10584_s29 + $0x158] sm:$0xff] %v5911_v16  ;;  %v5913_v22 = vmax.f32 %v5849_v7, 0.0  ;;  %v5915_v39 = vmax.f32 %v5851_v15, 0.0  ;;  %v5672_v50 = vpop.f32.mrb[104].mxu1 }
 0x5f4   : >> { %5978 = vst [vmem:[%s10584_s29 + $0x160] sm:$0xff] %v5912_v59  ;;  %5980 = vst [vmem:[%s10584_s29 + $0x170] sm:$0xff] %v5914_v33  ;;  %v5673_v54 = vadd.f32 %v5672_v50, %v10559_v31  ;;  %v5674_v48 = vpop.f32.mrb[105].mxu1  ;;  %v5391_v50 = vld [vmem:[%s10557_s1 + $0x1d8] sm:$0xff] }
 0x5f5   : >> { %5979 = vst [vmem:[%s10584_s29 + $0x168] sm:$0xff] %v5913_v22  ;;  %5981 = vst [vmem:[%s10584_s29 + $0x178] sm:$0xff] %v5915_v39  ;;  %v5675_v51 = vadd.f32 %v5674_v48, %v10563_v18  ;;  %v5676_v27 = vpop.f32.mrb[106].mxu1  ;;  %v5390_v22 = vld [vmem:[%s10557_s1 + $0x1d0] sm:$0xff] }
 0x5f6   : >> { %v5852_v17 = vadd.f32 %v5673_v54, %v5380_v62  ;;  %v5677_v49 = vadd.f32 %v5676_v27, %v10559_v31  ;;  %v5678_v37 = vpop.f32.mrb[107].mxu1  ;;  %v5394_v48 = vld [vmem:[%s10557_s1 + $0x1f0] sm:$0xff] }
 0x5f7   : >> { %v5853_v45 = vadd.f32 %v5675_v51, %v5381_v13  ;;  %v5679_v3 = vadd.f32 %v5678_v37, %v10563_v18 }
 0x5f8   : >> { %v5916_v8 = vmax.f32 %v5852_v17, 0.0  ;;  %v5856_v12 = vadd.f32 %v5677_v49, %v5384_v56  ;;  %v5395_v17 = vld [vmem:[%s10557_s1 + $0x1f8] sm:$0xff] }
 0x5f9   : >> { %v5917_v4 = vmax.f32 %v5853_v45, 0.0  ;;  %v5857_v29 = vadd.f32 %v5679_v3, %v5385_v53 }
 0x5fa   : >> { %5982 = vst [vmem:[%s10584_s29 + $0x180] sm:$0xff] %v5916_v8  ;;  %v5920_v9 = vmax.f32 %v5856_v12, 0.0 }
 0x5fb   : >> { %5983 = vst [vmem:[%s10584_s29 + $0x188] sm:$0xff] %v5917_v4  ;;  %v5921_v44 = vmax.f32 %v5857_v29, 0.0  ;;  %v5682_v40 = vpop.f32.mrb[108].mxu1 }
 0x5fc   : >> { %5986 = vst [vmem:[%s10584_s29 + $0x1a0] sm:$0xff] %v5920_v9  ;;  %v5683_v52 = vadd.f32 %v5682_v40, %v10559_v31  ;;  %v5684_v5 = vpop.f32.mrb[109].mxu1 }
 0x5fd   : >> { %5987 = vst [vmem:[%s10584_s29 + $0x1a8] sm:$0xff] %v5921_v44  ;;  %v5685_v11 = vadd.f32 %v5684_v5, %v10563_v18  ;;  %v5686_v63 = vpop.f32.mrb[110].mxu1 }
 0x5fe   : >> { %v5860_v34 = vadd.f32 %v5683_v52, %v5388_v46  ;;  %v5687_v26 = vadd.f32 %v5686_v63, %v10559_v31  ;;  %v5688_v0 = vpop.f32.mrb[111].mxu1 }
 0x5ff   : >> { %v5861_v55 = vadd.f32 %v5685_v11, %v5389_v14  ;;  %v5689_v57 = vadd.f32 %v5688_v0, %v10563_v18 }
 0x600   : >> { %v5924_v47 = vmax.f32 %v5860_v34, 0.0  ;;  %v5864_v60 = vadd.f32 %v5687_v26, %v5392_v25 }
 0x601   : >> { %v5925_v2 = vmax.f32 %v5861_v55, 0.0  ;;  %v5865_v38 = vadd.f32 %v5689_v57, %v5393_v20 }
 0x602   : >> { %5990 = vst [vmem:[%s10584_s29 + $0x1c0] sm:$0xff] %v5924_v47  ;;  %v5928_v58 = vmax.f32 %v5864_v60, 0.0 }
 0x603   : >> { %5991 = vst [vmem:[%s10584_s29 + $0x1c8] sm:$0xff] %v5925_v2  ;;  %v5929_v1 = vmax.f32 %v5865_v38, 0.0  ;;  %v5785_v61 = vpop.f32.mrb[112].mxu1 }
 0x604   : >> { %5994 = vst [vmem:[%s10584_s29 + $0x1e0] sm:$0xff] %v5928_v58  ;;  %v5786_v31 = vadd.f32 %v5785_v61, %v10561_v21  ;;  %v5787_v19 = vpop.f32.mrb[113].mxu1 }
 0x605   : >> { %5995 = vst [vmem:[%s10584_s29 + $0x1e8] sm:$0xff] %v5929_v1  ;;  %v5788_v18 = vadd.f32 %v5787_v19, %v10565_v43  ;;  %v5789_v6 = vpop.f32.mrb[114].mxu1 }
 0x606   : >> { %v5854_v30 = vadd.f32 %v5786_v31, %v5382_v42  ;;  %v5790_v28 = vadd.f32 %v5789_v6, %v10561_v21  ;;  %v5791_v41 = vpop.f32.mrb[115].mxu1 }
 0x607   : >> { %v5855_v32 = vadd.f32 %v5788_v18, %v5383_v23  ;;  %v5792_v10 = vadd.f32 %v5791_v41, %v10565_v43 }
 0x608   : >> { %v5918_v35 = vmax.f32 %v5854_v30, 0.0  ;;  %v5858_v16 = vadd.f32 %v5790_v28, %v5386_v36 }
 0x609   : >> { %v5919_v7 = vmax.f32 %v5855_v32, 0.0  ;;  %v5859_v15 = vadd.f32 %v5792_v10, %v5387_v24 }
 0x60a   : >> { %5984 = vst [vmem:[%s10584_s29 + $0x190] sm:$0xff] %v5918_v35  ;;  %v5922_v59 = vmax.f32 %v5858_v16, 0.0 }
 0x60b   : >> { %5985 = vst [vmem:[%s10584_s29 + $0x198] sm:$0xff] %v5919_v7  ;;  %v5923_v33 = vmax.f32 %v5859_v15, 0.0  ;;  %v5795_v39 = vpop.f32.mrb[116].mxu1 }
 0x60c   : >> { %5988 = vst [vmem:[%s10584_s29 + $0x1b0] sm:$0xff] %v5922_v59  ;;  %v5796_v62 = vadd.f32 %v5795_v39, %v10561_v21  ;;  %v5797_v54 = vpop.f32.mrb[117].mxu1 }
 0x60d   : >> { %5989 = vst [vmem:[%s10584_s29 + $0x1b8] sm:$0xff] %v5923_v33  ;;  %v5798_v13 = vadd.f32 %v5797_v54, %v10565_v43  ;;  %v5799_v51 = vpop.f32.mrb[118].mxu1 }
 0x60e   : >> { %v5862_v56 = vadd.f32 %v5796_v62, %v5390_v22  ;;  %v5800_v27 = vadd.f32 %v5799_v51, %v10561_v21  ;;  %v5801_v49 = vpop.f32.mrb[119].mxu1 }
 0x60f   : >> { %v5863_v53 = vadd.f32 %v5798_v13, %v5391_v50  ;;  %v5802_v37 = vadd.f32 %v5801_v49, %v10565_v43  ;;  %1409 = sbr.rel (!%p1407_p9) target bundleno = 619 (0x26b), region = 167 }
 0x610   : >> { %v5926_v45 = vmax.f32 %v5862_v56, 0.0  ;;  %v5866_v3 = vadd.f32 %v5800_v27, %v5394_v48 }
 0x611   : >> { %v5927_v8 = vmax.f32 %v5863_v53, 0.0  ;;  %v5867_v12 = vadd.f32 %v5802_v37, %v5395_v17 }
 0x612   : >> { %5992 = vst [vmem:[%s10584_s29 + $0x1d0] sm:$0xff] %v5926_v45  ;;  %v5930_v4 = vmax.f32 %v5866_v3, 0.0 }
 0x613   : >> { %5993 = vst [vmem:[%s10584_s29 + $0x1d8] sm:$0xff] %v5927_v8  ;;  %v5931_v29 = vmax.f32 %v5867_v12, 0.0 }
 0x614   : >> { %5996 = vst [vmem:[%s10584_s29 + $0x1f0] sm:$0xff] %v5930_v4 }
 0x615   : >> { %5997 = vst [vmem:[%s10584_s29 + $0x1f8] sm:$0xff] %v5931_v29 }
 0x616   : > { %8817 = shalt.err (!%p8814_p10)
}
 0x617   : > { %s8818_s8 = scalar_lea.hbm %s10771_s16, 32768  ;;  %s8822_s1 = scalar_lea.hbm %s10825_s7, 65536 }
 0x618   : > { %p8819_p11 = scmp.ne.s32.totalorder %s10771_s16, %s8818_s8  ;;  %p8823_p7 = scmp.lt.u32.totalorder %s10771_s16, %s10825_s7 }
 0x619   : > { %p8824_p6 = scmp.lt.u32.totalorder %s8822_s1, %s8818_s8  ;;  %p8826_p12 = scmp.lt.u32.totalorder %s8818_s8, %s10771_s16 }
 0x61a   : > { %p8820_p0 = pnand %p8819_p11, %p10855_p13 }
 0x61b   : > { %p8825_p9 = por %p8824_p6, %p8823_p7 }
 0x61c   : > { %p8821_p5 = pneg %p8820_p0 }
 0x61d   : > { %p8827_p1 = por %p8826_p12, %p8825_p9 }
 0x61f   : > { %p8828_p3 = pnand %p8827_p1, %p8821_p5 }
 0x621   : > { %8831 = shalt.err (!%p8828_p3)
}
 0x622   : > { %s8916_s13 = smov 512   ;;  %s8917_s15 = smov 32  }
 0x623   : > { %8203 = dma.vmem_to_hbm [thread:$0]  (%p10855_p13), %s10774_s17, 32768, %s10771_s16, %s5999_s19, %s8916_s13, %s8916_s13, %s8917_s15  }
 0x624 PF: > { %s6027_s14 = sand.u32 1, %s8878_s24   ;;  %p10856_p2 = scmp.ne.s32.totalorder %s10838_s21, 0 }
 0x625   : > { %p10857_p8 = scmp.ge.s32.totalorder %s8890_s27, 2  ;;  %s6028_s23 = scalar_lea.sflag [#allocation5], %s6027_s14 }
 0x627   : > { %p8229_p4 = pnand %p10857_p8, %p10856_p2 }
 0x629   : > { %8873 = dma.done.wait (!%p8229_p4), %s6028_s23, 32768  }
 0x62a   : > { %8875 = vsyncadd (!%p8229_p4), %s6028_s23, 4294934528  ;;  %p23_p10 = scmp.ge.s32.totalorder %s9134_s11, 4   ;;  %s10858_s24 = smov %s8882_s25 }
 0x62b   : > { %s10859_s25 = smov %s8886_s26  ;;  %s10860_s26 = smov %s9145_s20 }
 0x62c   : > { %s10861_s27 = smov %s9134_s11  ;;  %25 = sbr.rel (!%p23_p10) target bundleno = 10 (0xa), region = 178 }
 0x633   :  { %6033 = vsyncpa [#allocation4], 1 }
 0x634   :  { %6035 = vsyncpa [#allocation4 + $0x1], 1 }
 0x635   :  { %6036 = vsyncpa [#allocation7], 1 }
 0x636   :  { %6037 = vsyncpa [#allocation10], 1 }
 0x637   :  { %6038 = vsyncpa [#allocation13], 1 }
 0x638   :  { %6039 = vsyncpa [#allocation5], 1 }
 0x639   :  { %6041 = vsyncpa [#allocation5 + $0x1], 1 }

</bundles_post_ra>
